<compile_context>
chip_gen: v7x
topology: tpu7x:2x2x1
jax: 0.10.0
libtpu: 0.0.40
codegen_flags: <defaults>
</compile_context>

<pallas_src>
import jax
import jax.numpy as jnp
from jax import lax
from jax.experimental import pallas as pl
from jax.experimental.pallas import tpu as pltpu


# ----------------------------------------------------------------------------- #
# Kernels
# ----------------------------------------------------------------------------- #
def _make_vpu_kernel(*, C, K, ks, sb, nb, out_dtype):
    """Batch-on-sublane VPU kernel for small channel counts (C < 8)."""
    p = (ks - 1) // 2

    def kernel(x_ref, w1a, b1a, w1b, b1b, w2a, b2a, w2b, b2b, o_ref):
        # Shifted-in zero columns == the conv's zero padding at the K boundaries.
        zcol = jnp.zeros((sb, max(p, 1)), jnp.float32)

        def shift(plane, d):
            # result[:, k] = plane[:, k + d], zero where k + d is out of range.
            if d == 0:
                return plane
            if d > 0:
                return jnp.concatenate([plane[:, d:], zcol[:, :d]], axis=1)
            return jnp.concatenate([zcol[:, :-d], plane[:, :d]], axis=1)

        def gated(planes, wa, ba, wb, bb):
            # planes: list of C (sb, K) f32 input-channel planes.
            # One FreqGatedConv: conv_a(planes) * sigmoid(conv_b(planes)).
            shifted = [[shift(planes[ci], t - p) for t in range(ks)]
                       for ci in range(C)]
            outs = []
            for co in range(C):
                acc_a = jnp.full((sb, K), ba[co], jnp.float32)
                acc_b = jnp.full((sb, K), bb[co], jnp.float32)
                for ci in range(C):
                    base = (co * C + ci) * ks
                    for t in range(ks):
                        xs = shifted[ci][t]
                        acc_a = acc_a + wa[base + t] * xs   # SMEM scalar * dense plane
                        acc_b = acc_b + wb[base + t] * xs
                gate = 0.5 * (jnp.tanh(0.5 * acc_b) + 1.0)   # exact sigmoid, on the EUP
                outs.append(acc_a * gate)
            return outs

        def body(j, carry):
            off = pl.multiple_of(j * sb, sb)
            xb = x_ref[pl.ds(off, sb)].astype(jnp.float32)          # (sb, C, K) dense load
            x_planes = [xb[:, c, :] for c in range(C)]              # C (sb, K) planes
            hidden = gated(x_planes, w1a, b1a, w1b, b1b)            # stays in vregs
            out_planes = gated(hidden, w2a, b2a, w2b, b2b)
            out_planes = [x_planes[c] + out_planes[c] for c in range(C)]  # residual
            o_ref[pl.ds(off, sb)] = jnp.stack(out_planes, axis=1).astype(out_dtype)
            return carry

        lax.fori_loop(0, nb, body, 0, unroll=min(2, nb))

    return kernel


def _make_mxu_kernel(*, C, K, ks, bt, out_dtype, compute_dtype):
    """Per-batch-element MXU kernel for C >= 8: all ks taps and both conv branches
    of a FreqGatedConv fused into one (2C, ks*C) x (ks*C, K) matmul."""
    p = (ks - 1) // 2

    def kernel(x_ref, w1_ref, b1_ref, w2_ref, b2_ref, o_ref):
        zcol = jnp.zeros((C, max(p, 1)), compute_dtype)

        def shift(xt, d):
            if d == 0:
                return xt
            if d > 0:
                return jnp.concatenate([xt[:, d:], zcol[:, :d]], axis=1)
            return jnp.concatenate([zcol[:, :-d], xt[:, :d]], axis=1)

        def gated(xt, w_ref, b_ref):
            # xt: (C, K) in compute_dtype.  Stack the ks shifted copies along
            # sublanes and contract taps + input channels in ONE MXU dot.
            xs_cat = jnp.concatenate([shift(xt, t - p) for t in range(ks)], axis=0)
            acc = jnp.dot(w_ref[...], xs_cat,
                          preferred_element_type=jnp.float32) + b_ref[...]   # (2C, K) f32
            gate = 0.5 * (jnp.tanh(0.5 * acc[C:]) + 1.0)                     # sigmoid(conv_b)
            return acc[:C] * gate                                            # (C, K) f32

        def body(b, carry):
            xt_raw = x_ref[b]                                                # (C, K)
            hidden = gated(xt_raw.astype(compute_dtype), w1_ref, b1_ref)
            out = gated(hidden.astype(compute_dtype), w2_ref, b2_ref)
            o_ref[b] = (xt_raw.astype(jnp.float32) + out).astype(out_dtype)
            return carry

        lax.fori_loop(0, bt, body, 0, unroll=min(2, bt))

    return kernel


# ----------------------------------------------------------------------------- #
# Wrapper
# ----------------------------------------------------------------------------- #
def _pick_bt(B, C, K, itemsize, row_align):
    """Batch rows per grid step: target ~2 MiB blocks (in + out, each pipeline
    double-buffered => well under every generation's scoped-VMEM default, incl.
    v7x's smaller 64 MiB physical VMEM); keep >= 2 'parallel' grid steps only when
    the batch is big enough to feed both v7x TensorCores (never split tiny batches
    on single-TC v5e/v6e)."""
    target = 2 * 1024 * 1024
    bt = max(1, min(B, target // max(1, C * K * itemsize)))
    if B >= 16 and bt > B // 2:
        bt = B // 2
    if bt >= row_align:
        bt -= bt % row_align
    bt = max(1, bt)
    while B % bt:
        bt -= 1
    return bt


def residual_block(x, w1a, b1a, w1b, b1b, w2a, b2a, w2b, b2b):
    """ResidualBlock forward.  x: [B, C, K]; each w: [C, C, ks] (PyTorch Conv1d
    layout, out x in x tap); each b: [C]."""
    B, C, K = x.shape
    ks = w1a.shape[-1]
    if ks % 2 != 1:
        # PyTorch Conv1d with padding=(ks-1)//2 only preserves length (and hence
        # allows the residual add) for odd kernel sizes.
        raise ValueError("ResidualBlock requires an odd kernel_size")
    itemsize = jnp.dtype(x.dtype).itemsize

    cost = pl.CostEstimate(
        flops=int(B * K * C * (8 * C * ks + 12)),
        transcendentals=int(2 * B * C * K),
        bytes_accessed=int(2 * B * C * K * itemsize + 8 * C * C * ks * 4 + 8 * C * 4),
    )
    cparams = pltpu.CompilerParams(
        dimension_semantics=("parallel",),
        vmem_limit_bytes=32 * 1024 * 1024,
    )

    def io_spec(bt):
        # Last two block dims equal the full array dims (full-dim exception), so
        # no (8, 128) padding of the array is required and no output slice either.
        return pl.BlockSpec((bt, C, K), lambda i: (i, 0, 0))

    if C < 8:
        # ---------- small-C: batch-on-sublane VPU path, scalar weights in SMEM ----------
        bt = _pick_bt(B, C, K, itemsize, row_align=8 if B >= 8 else 1)
        # Inner batch sub-chunk: bounded so the live (sb, K) f32 planes stay well
        # inside the 64-vreg file (no spills), fori_loop covers the rest of the block.
        live_planes = C * ks + C + 4
        sb = max(1, min(bt, 32, (96 * 1024) // max(1, 4 * K * live_planes)))
        if sb >= 8:
            sb -= sb % 8
        sb = max(1, sb)
        while bt % sb:
            sb -= 1
        nb = bt // sb

        kernel = _make_vpu_kernel(C=C, K=K, ks=ks, sb=sb, nb=nb, out_dtype=x.dtype)
        smem = pl.BlockSpec(memory_space=pltpu.MemorySpace.SMEM)

        def flat(w):   # index = (c_out*C + c_in)*ks + t, matching PyTorch layout
            return w.astype(jnp.float32).reshape(-1)

        def vec(b):
            return b.astype(jnp.float32)

        return pl.pallas_call(
            kernel,
            out_shape=jax.ShapeDtypeStruct((B, C, K), x.dtype),
            grid=(B // bt,),
            in_specs=[io_spec(bt)] + [smem] * 8,
            out_specs=io_spec(bt),
            compiler_params=cparams,
            cost_estimate=cost,
        )(x, flat(w1a), vec(b1a), flat(w1b), vec(b1b),
          flat(w2a), vec(b2a), flat(w2b), vec(b2b))

    # ---------- C >= 8: fused-tap MXU path, operands in the input dtype ----------
    bt = _pick_bt(B, C, K, itemsize, row_align=1)
    compute_dtype = x.dtype
    kernel = _make_mxu_kernel(C=C, K=K, ks=ks, bt=bt,
                              out_dtype=x.dtype, compute_dtype=compute_dtype)

    def cat_w(wa, wb):
        # W_cat[r, t*C + ci] = wa[r, ci, t] for r < C, wb[r-C, ci, t] for r >= C.
        stack = jnp.concatenate([wa, wb], axis=0)                       # (2C, C, ks)
        return jnp.transpose(stack, (0, 2, 1)).reshape(2 * C, ks * C).astype(compute_dtype)

    def cat_b(ba, bb):
        return jnp.concatenate([ba, bb], axis=0).astype(jnp.float32).reshape(2 * C, 1)

    w_spec = pl.BlockSpec((2 * C, ks * C), lambda i: (0, 0))   # resident (constant index)
    b_spec = pl.BlockSpec((2 * C, 1), lambda i: (0, 0))

    return pl.pallas_call(
        kernel,
        out_shape=jax.ShapeDtypeStruct((B, C, K), x.dtype),
        grid=(B // bt,),
        in_specs=[io_spec(bt), w_spec, b_spec, w_spec, b_spec],
        out_specs=io_spec(bt),
        compiler_params=cparams,
        cost_estimate=cost,
    )(x, cat_w(w1a, w1b), cat_b(b1a, b1b), cat_w(w2a, w2b), cat_b(b2a, b2b))


# ----------------------------------------------------------------------------- #
# Reference + self-test
# ----------------------------------------------------------------------------- #
def _reference(x, params):
    """Pure-JAX reference with PyTorch Conv1d (cross-correlation, zero 'same'
    padding) semantics, computed in f32 at HIGHEST precision."""
    w1a, b1a, w1b, b1b, w2a, b2a, w2b, b2b = [p.astype(jnp.float32) for p in params]
    ks = w1a.shape[-1]
    p = (ks - 1) // 2

    def conv(v, w, b):
        y = lax.conv_general_dilated(
            v, w, window_strides=(1,), padding=[(p, p)],
            dimension_numbers=("NCH", "OIH", "NCH"),
            precision=lax.Precision.HIGHEST)
        return y + b[None, :, None]

    def gated(v, wa, ba, wb, bb):
        return conv(v, wa, ba) * jax.nn.sigmoid(conv(v, wb, bb))

    xf = x.astype(jnp.float32)
    hidden = gated(xf, w1a, b1a, w1b, b1b)
    return xf + gated(hidden, w2a, b2a, w2b, b2b)


def _make_params(key, C, ks, scale, dtype):
    keys = jax.random.split(key, 8)
    shapes = [(C, C, ks), (C,), (C, C, ks), (C,),
              (C, C, ks), (C,), (C, C, ks), (C,)]
    return [(scale * jax.random.normal(k, s, dtype=jnp.float32)).astype(dtype)
            for k, s in zip(keys, shapes)]


if __name__ == "__main__":
    root = jax.random.PRNGKey(0)
    k_x1, k_p1, k_x2, k_p2 = jax.random.split(root, 4)

    # --- Primary check: C < 8 -> batch-on-sublane VPU path (f32) ---
    B, C, K, ks = 8, 4, 48, 3
    x = jax.random.normal(k_x1, (B, C, K), dtype=jnp.float32)
    params = _make_params(k_p1, C, ks, scale=0.3, dtype=jnp.float32)
    out = jax.block_until_ready(residual_block(x, *params))
    ref = _reference(x, params)
    assert out.shape == x.shape
    err = float(jnp.max(jnp.abs(out - ref)))
    assert jnp.allclose(out, ref, atol=1e-4, rtol=1e-4), err

    # --- Secondary check: C >= 8 -> fused-tap MXU path, bf16 operands ---
    B2, C2, K2 = 2, 8, 32
    x2 = jax.random.normal(k_x2, (B2, C2, K2), dtype=jnp.float32).astype(jnp.bfloat16)
    params2 = _make_params(k_p2, C2, ks, scale=0.2, dtype=jnp.bfloat16)
    out2 = jax.block_until_ready(residual_block(x2, *params2))
    ref2 = _reference(x2, params2)   # f32 reference on the same bf16-rounded values
    assert out2.shape == x2.shape
    err2 = float(jnp.max(jnp.abs(out2.astype(jnp.float32) - ref2)))
    # Error budget: bf16 re-quantization of the hidden activation + bf16 output.
    assert jnp.allclose(out2.astype(jnp.float32), ref2, atol=2e-2, rtol=2e-2), err2

    print("KERNEL_OK")
</pallas_src>

<mosaic_0001>
module attributes {stable_mosaic.version = 11 : i64} {
  func.func @kernel(%arg0: i32, %arg1: memref<8x4x48xf32, #tpu.memory_space<vmem>>, %arg2: memref<48xf32, #tpu.memory_space<smem>>, %arg3: memref<4xf32, #tpu.memory_space<smem>>, %arg4: memref<48xf32, #tpu.memory_space<smem>>, %arg5: memref<4xf32, #tpu.memory_space<smem>>, %arg6: memref<48xf32, #tpu.memory_space<smem>>, %arg7: memref<4xf32, #tpu.memory_space<smem>>, %arg8: memref<48xf32, #tpu.memory_space<smem>>, %arg9: memref<4xf32, #tpu.memory_space<smem>>, %arg10: memref<8x4x48xf32, #tpu.memory_space<vmem>>) attributes {dimension_semantics = [#tpu.dimension_semantics<parallel>], iteration_bounds = array<i64: 1>, scalar_prefetch = 0 : i64, scratch_operands = 0 : i64, tpu.core_type = #tpu.core_type<tc>, window_params = [{transform_indices = @transform_0, window_bounds = array<i64: 8, 4, 48>}, {transform_indices = @transform_1, window_bounds = array<i64: 48>}, {transform_indices = @transform_2, window_bounds = array<i64: 4>}, {transform_indices = @transform_3, window_bounds = array<i64: 48>}, {transform_indices = @transform_4, window_bounds = array<i64: 4>}, {transform_indices = @transform_5, window_bounds = array<i64: 48>}, {transform_indices = @transform_6, window_bounds = array<i64: 4>}, {transform_indices = @transform_7, window_bounds = array<i64: 48>}, {transform_indices = @transform_8, window_bounds = array<i64: 4>}, {transform_indices = @transform_9, window_bounds = array<i64: 8, 4, 48>}]} {
    %cst = arith.constant 0.000000e+00 : f32
    %0 = vector.broadcast %cst : f32 to vector<8x1xf32>
    %c0_i32 = arith.constant 0 : i32
    %c8_i32 = arith.constant 8 : i32
    %1 = arith.muli %c0_i32, %c8_i32 : i32
    %2 = tpu.assume_multiple %1, 8 : i32
    %3 = arith.index_cast %2 : i32 to index
    %c0 = arith.constant 0 : index
    %c0_0 = arith.constant 0 : index
    %4 = vector.load %arg1[%3, %c0, %c0_0] : memref<8x4x48xf32, #tpu.memory_space<vmem>>, vector<8x4x48xf32>
    %5 = vector.extract_strided_slice %4 {offsets = [0, 0, 0], sizes = [8, 1, 48], strides = [1, 1, 1]} : vector<8x4x48xf32> to vector<8x1x48xf32>
    %6 = vector.shape_cast %5 : vector<8x1x48xf32> to vector<8x48xf32>
    %7 = vector.extract_strided_slice %4 {offsets = [0, 1, 0], sizes = [8, 1, 48], strides = [1, 1, 1]} : vector<8x4x48xf32> to vector<8x1x48xf32>
    %8 = vector.shape_cast %7 : vector<8x1x48xf32> to vector<8x48xf32>
    %9 = vector.extract_strided_slice %4 {offsets = [0, 2, 0], sizes = [8, 1, 48], strides = [1, 1, 1]} : vector<8x4x48xf32> to vector<8x1x48xf32>
    %10 = vector.shape_cast %9 : vector<8x1x48xf32> to vector<8x48xf32>
    %11 = vector.extract_strided_slice %4 {offsets = [0, 3, 0], sizes = [8, 1, 48], strides = [1, 1, 1]} : vector<8x4x48xf32> to vector<8x1x48xf32>
    %12 = vector.shape_cast %11 : vector<8x1x48xf32> to vector<8x48xf32>
    %13 = vector.extract_strided_slice %6 {offsets = [0, 0], sizes = [8, 47], strides = [1, 1]} : vector<8x48xf32> to vector<8x47xf32>
    %14 = tpu.concatenate %0, %13 in 1 : vector<8x1xf32>, vector<8x47xf32> -> vector<8x48xf32>
    %15 = vector.extract_strided_slice %6 {offsets = [0, 1], sizes = [8, 47], strides = [1, 1]} : vector<8x48xf32> to vector<8x47xf32>
    %16 = tpu.concatenate %15, %0 in 1 : vector<8x47xf32>, vector<8x1xf32> -> vector<8x48xf32>
    %17 = vector.extract_strided_slice %8 {offsets = [0, 0], sizes = [8, 47], strides = [1, 1]} : vector<8x48xf32> to vector<8x47xf32>
    %18 = tpu.concatenate %0, %17 in 1 : vector<8x1xf32>, vector<8x47xf32> -> vector<8x48xf32>
    %19 = vector.extract_strided_slice %8 {offsets = [0, 1], sizes = [8, 47], strides = [1, 1]} : vector<8x48xf32> to vector<8x47xf32>
    %20 = tpu.concatenate %19, %0 in 1 : vector<8x47xf32>, vector<8x1xf32> -> vector<8x48xf32>
    %21 = vector.extract_strided_slice %10 {offsets = [0, 0], sizes = [8, 47], strides = [1, 1]} : vector<8x48xf32> to vector<8x47xf32>
    %22 = tpu.concatenate %0, %21 in 1 : vector<8x1xf32>, vector<8x47xf32> -> vector<8x48xf32>
    %23 = vector.extract_strided_slice %10 {offsets = [0, 1], sizes = [8, 47], strides = [1, 1]} : vector<8x48xf32> to vector<8x47xf32>
    %24 = tpu.concatenate %23, %0 in 1 : vector<8x47xf32>, vector<8x1xf32> -> vector<8x48xf32>
    %25 = vector.extract_strided_slice %12 {offsets = [0, 0], sizes = [8, 47], strides = [1, 1]} : vector<8x48xf32> to vector<8x47xf32>
    %26 = tpu.concatenate %0, %25 in 1 : vector<8x1xf32>, vector<8x47xf32> -> vector<8x48xf32>
    %27 = vector.extract_strided_slice %12 {offsets = [0, 1], sizes = [8, 47], strides = [1, 1]} : vector<8x48xf32> to vector<8x47xf32>
    %28 = tpu.concatenate %27, %0 in 1 : vector<8x47xf32>, vector<8x1xf32> -> vector<8x48xf32>
    %c0_1 = arith.constant 0 : index
    %29 = memref.load %arg3[%c0_1] : memref<4xf32, #tpu.memory_space<smem>>
    %30 = vector.broadcast %29 : f32 to vector<8x48xf32>
    %c0_2 = arith.constant 0 : index
    %31 = memref.load %arg5[%c0_2] : memref<4xf32, #tpu.memory_space<smem>>
    %32 = vector.broadcast %31 : f32 to vector<8x48xf32>
    %c0_3 = arith.constant 0 : index
    %33 = memref.load %arg2[%c0_3] : memref<48xf32, #tpu.memory_space<smem>>
    %34 = vector.broadcast %33 : f32 to vector<8x48xf32>
    %35 = arith.mulf %34, %14 : vector<8x48xf32>
    %36 = arith.addf %30, %35 : vector<8x48xf32>
    %c0_4 = arith.constant 0 : index
    %37 = memref.load %arg4[%c0_4] : memref<48xf32, #tpu.memory_space<smem>>
    %38 = vector.broadcast %37 : f32 to vector<8x48xf32>
    %39 = arith.mulf %38, %14 : vector<8x48xf32>
    %40 = arith.addf %32, %39 : vector<8x48xf32>
    %c1 = arith.constant 1 : index
    %41 = memref.load %arg2[%c1] : memref<48xf32, #tpu.memory_space<smem>>
    %42 = vector.broadcast %41 : f32 to vector<8x48xf32>
    %43 = arith.mulf %42, %6 : vector<8x48xf32>
    %44 = arith.addf %36, %43 : vector<8x48xf32>
    %c1_5 = arith.constant 1 : index
    %45 = memref.load %arg4[%c1_5] : memref<48xf32, #tpu.memory_space<smem>>
    %46 = vector.broadcast %45 : f32 to vector<8x48xf32>
    %47 = arith.mulf %46, %6 : vector<8x48xf32>
    %48 = arith.addf %40, %47 : vector<8x48xf32>
    %c2 = arith.constant 2 : index
    %49 = memref.load %arg2[%c2] : memref<48xf32, #tpu.memory_space<smem>>
    %50 = vector.broadcast %49 : f32 to vector<8x48xf32>
    %51 = arith.mulf %50, %16 : vector<8x48xf32>
    %52 = arith.addf %44, %51 : vector<8x48xf32>
    %c2_6 = arith.constant 2 : index
    %53 = memref.load %arg4[%c2_6] : memref<48xf32, #tpu.memory_space<smem>>
    %54 = vector.broadcast %53 : f32 to vector<8x48xf32>
    %55 = arith.mulf %54, %16 : vector<8x48xf32>
    %56 = arith.addf %48, %55 : vector<8x48xf32>
    %c3 = arith.constant 3 : index
    %57 = memref.load %arg2[%c3] : memref<48xf32, #tpu.memory_space<smem>>
    %58 = vector.broadcast %57 : f32 to vector<8x48xf32>
    %59 = arith.mulf %58, %18 : vector<8x48xf32>
    %60 = arith.addf %52, %59 : vector<8x48xf32>
    %c3_7 = arith.constant 3 : index
    %61 = memref.load %arg4[%c3_7] : memref<48xf32, #tpu.memory_space<smem>>
    %62 = vector.broadcast %61 : f32 to vector<8x48xf32>
    %63 = arith.mulf %62, %18 : vector<8x48xf32>
    %64 = arith.addf %56, %63 : vector<8x48xf32>
    %c4 = arith.constant 4 : index
    %65 = memref.load %arg2[%c4] : memref<48xf32, #tpu.memory_space<smem>>
    %66 = vector.broadcast %65 : f32 to vector<8x48xf32>
    %67 = arith.mulf %66, %8 : vector<8x48xf32>
    %68 = arith.addf %60, %67 : vector<8x48xf32>
    %c4_8 = arith.constant 4 : index
    %69 = memref.load %arg4[%c4_8] : memref<48xf32, #tpu.memory_space<smem>>
    %70 = vector.broadcast %69 : f32 to vector<8x48xf32>
    %71 = arith.mulf %70, %8 : vector<8x48xf32>
    %72 = arith.addf %64, %71 : vector<8x48xf32>
    %c5 = arith.constant 5 : index
    %73 = memref.load %arg2[%c5] : memref<48xf32, #tpu.memory_space<smem>>
    %74 = vector.broadcast %73 : f32 to vector<8x48xf32>
    %75 = arith.mulf %74, %20 : vector<8x48xf32>
    %76 = arith.addf %68, %75 : vector<8x48xf32>
    %c5_9 = arith.constant 5 : index
    %77 = memref.load %arg4[%c5_9] : memref<48xf32, #tpu.memory_space<smem>>
    %78 = vector.broadcast %77 : f32 to vector<8x48xf32>
    %79 = arith.mulf %78, %20 : vector<8x48xf32>
    %80 = arith.addf %72, %79 : vector<8x48xf32>
    %c6 = arith.constant 6 : index
    %81 = memref.load %arg2[%c6] : memref<48xf32, #tpu.memory_space<smem>>
    %82 = vector.broadcast %81 : f32 to vector<8x48xf32>
    %83 = arith.mulf %82, %22 : vector<8x48xf32>
    %84 = arith.addf %76, %83 : vector<8x48xf32>
    %c6_10 = arith.constant 6 : index
    %85 = memref.load %arg4[%c6_10] : memref<48xf32, #tpu.memory_space<smem>>
    %86 = vector.broadcast %85 : f32 to vector<8x48xf32>
    %87 = arith.mulf %86, %22 : vector<8x48xf32>
    %88 = arith.addf %80, %87 : vector<8x48xf32>
    %c7 = arith.constant 7 : index
    %89 = memref.load %arg2[%c7] : memref<48xf32, #tpu.memory_space<smem>>
    %90 = vector.broadcast %89 : f32 to vector<8x48xf32>
    %91 = arith.mulf %90, %10 : vector<8x48xf32>
    %92 = arith.addf %84, %91 : vector<8x48xf32>
    %c7_11 = arith.constant 7 : index
    %93 = memref.load %arg4[%c7_11] : memref<48xf32, #tpu.memory_space<smem>>
    %94 = vector.broadcast %93 : f32 to vector<8x48xf32>
    %95 = arith.mulf %94, %10 : vector<8x48xf32>
    %96 = arith.addf %88, %95 : vector<8x48xf32>
    %c8 = arith.constant 8 : index
    %97 = memref.load %arg2[%c8] : memref<48xf32, #tpu.memory_space<smem>>
    %98 = vector.broadcast %97 : f32 to vector<8x48xf32>
    %99 = arith.mulf %98, %24 : vector<8x48xf32>
    %100 = arith.addf %92, %99 : vector<8x48xf32>
    %c8_12 = arith.constant 8 : index
    %101 = memref.load %arg4[%c8_12] : memref<48xf32, #tpu.memory_space<smem>>
    %102 = vector.broadcast %101 : f32 to vector<8x48xf32>
    %103 = arith.mulf %102, %24 : vector<8x48xf32>
    %104 = arith.addf %96, %103 : vector<8x48xf32>
    %c9 = arith.constant 9 : index
    %105 = memref.load %arg2[%c9] : memref<48xf32, #tpu.memory_space<smem>>
    %106 = vector.broadcast %105 : f32 to vector<8x48xf32>
    %107 = arith.mulf %106, %26 : vector<8x48xf32>
    %108 = arith.addf %100, %107 : vector<8x48xf32>
    %c9_13 = arith.constant 9 : index
    %109 = memref.load %arg4[%c9_13] : memref<48xf32, #tpu.memory_space<smem>>
    %110 = vector.broadcast %109 : f32 to vector<8x48xf32>
    %111 = arith.mulf %110, %26 : vector<8x48xf32>
    %112 = arith.addf %104, %111 : vector<8x48xf32>
    %c10 = arith.constant 10 : index
    %113 = memref.load %arg2[%c10] : memref<48xf32, #tpu.memory_space<smem>>
    %114 = vector.broadcast %113 : f32 to vector<8x48xf32>
    %115 = arith.mulf %114, %12 : vector<8x48xf32>
    %116 = arith.addf %108, %115 : vector<8x48xf32>
    %c10_14 = arith.constant 10 : index
    %117 = memref.load %arg4[%c10_14] : memref<48xf32, #tpu.memory_space<smem>>
    %118 = vector.broadcast %117 : f32 to vector<8x48xf32>
    %119 = arith.mulf %118, %12 : vector<8x48xf32>
    %120 = arith.addf %112, %119 : vector<8x48xf32>
    %c11 = arith.constant 11 : index
    %121 = memref.load %arg2[%c11] : memref<48xf32, #tpu.memory_space<smem>>
    %122 = vector.broadcast %121 : f32 to vector<8x48xf32>
    %123 = arith.mulf %122, %28 : vector<8x48xf32>
    %124 = arith.addf %116, %123 : vector<8x48xf32>
    %c11_15 = arith.constant 11 : index
    %125 = memref.load %arg4[%c11_15] : memref<48xf32, #tpu.memory_space<smem>>
    %126 = vector.broadcast %125 : f32 to vector<8x48xf32>
    %127 = arith.mulf %126, %28 : vector<8x48xf32>
    %128 = arith.addf %120, %127 : vector<8x48xf32>
    %cst_16 = arith.constant 5.000000e-01 : f32
    %129 = vector.broadcast %cst_16 : f32 to vector<8x48xf32>
    %130 = arith.mulf %129, %128 : vector<8x48xf32>
    %131 = math.tanh %130 : vector<8x48xf32>
    %cst_17 = arith.constant 1.000000e+00 : f32
    %132 = vector.broadcast %cst_17 : f32 to vector<8x48xf32>
    %133 = arith.addf %131, %132 : vector<8x48xf32>
    %cst_18 = arith.constant 5.000000e-01 : f32
    %134 = vector.broadcast %cst_18 : f32 to vector<8x48xf32>
    %135 = arith.mulf %134, %133 : vector<8x48xf32>
    %136 = arith.mulf %124, %135 : vector<8x48xf32>
    %c1_19 = arith.constant 1 : index
    %137 = memref.load %arg3[%c1_19] : memref<4xf32, #tpu.memory_space<smem>>
    %138 = vector.broadcast %137 : f32 to vector<8x48xf32>
    %c1_20 = arith.constant 1 : index
    %139 = memref.load %arg5[%c1_20] : memref<4xf32, #tpu.memory_space<smem>>
    %140 = vector.broadcast %139 : f32 to vector<8x48xf32>
    %c12 = arith.constant 12 : index
    %141 = memref.load %arg2[%c12] : memref<48xf32, #tpu.memory_space<smem>>
    %142 = vector.broadcast %141 : f32 to vector<8x48xf32>
    %143 = arith.mulf %142, %14 : vector<8x48xf32>
    %144 = arith.addf %138, %143 : vector<8x48xf32>
    %c12_21 = arith.constant 12 : index
    %145 = memref.load %arg4[%c12_21] : memref<48xf32, #tpu.memory_space<smem>>
    %146 = vector.broadcast %145 : f32 to vector<8x48xf32>
    %147 = arith.mulf %146, %14 : vector<8x48xf32>
    %148 = arith.addf %140, %147 : vector<8x48xf32>
    %c13 = arith.constant 13 : index
    %149 = memref.load %arg2[%c13] : memref<48xf32, #tpu.memory_space<smem>>
    %150 = vector.broadcast %149 : f32 to vector<8x48xf32>
    %151 = arith.mulf %150, %6 : vector<8x48xf32>
    %152 = arith.addf %144, %151 : vector<8x48xf32>
    %c13_22 = arith.constant 13 : index
    %153 = memref.load %arg4[%c13_22] : memref<48xf32, #tpu.memory_space<smem>>
    %154 = vector.broadcast %153 : f32 to vector<8x48xf32>
    %155 = arith.mulf %154, %6 : vector<8x48xf32>
    %156 = arith.addf %148, %155 : vector<8x48xf32>
    %c14 = arith.constant 14 : index
    %157 = memref.load %arg2[%c14] : memref<48xf32, #tpu.memory_space<smem>>
    %158 = vector.broadcast %157 : f32 to vector<8x48xf32>
    %159 = arith.mulf %158, %16 : vector<8x48xf32>
    %160 = arith.addf %152, %159 : vector<8x48xf32>
    %c14_23 = arith.constant 14 : index
    %161 = memref.load %arg4[%c14_23] : memref<48xf32, #tpu.memory_space<smem>>
    %162 = vector.broadcast %161 : f32 to vector<8x48xf32>
    %163 = arith.mulf %162, %16 : vector<8x48xf32>
    %164 = arith.addf %156, %163 : vector<8x48xf32>
    %c15 = arith.constant 15 : index
    %165 = memref.load %arg2[%c15] : memref<48xf32, #tpu.memory_space<smem>>
    %166 = vector.broadcast %165 : f32 to vector<8x48xf32>
    %167 = arith.mulf %166, %18 : vector<8x48xf32>
    %168 = arith.addf %160, %167 : vector<8x48xf32>
    %c15_24 = arith.constant 15 : index
    %169 = memref.load %arg4[%c15_24] : memref<48xf32, #tpu.memory_space<smem>>
    %170 = vector.broadcast %169 : f32 to vector<8x48xf32>
    %171 = arith.mulf %170, %18 : vector<8x48xf32>
    %172 = arith.addf %164, %171 : vector<8x48xf32>
    %c16 = arith.constant 16 : index
    %173 = memref.load %arg2[%c16] : memref<48xf32, #tpu.memory_space<smem>>
    %174 = vector.broadcast %173 : f32 to vector<8x48xf32>
    %175 = arith.mulf %174, %8 : vector<8x48xf32>
    %176 = arith.addf %168, %175 : vector<8x48xf32>
    %c16_25 = arith.constant 16 : index
    %177 = memref.load %arg4[%c16_25] : memref<48xf32, #tpu.memory_space<smem>>
    %178 = vector.broadcast %177 : f32 to vector<8x48xf32>
    %179 = arith.mulf %178, %8 : vector<8x48xf32>
    %180 = arith.addf %172, %179 : vector<8x48xf32>
    %c17 = arith.constant 17 : index
    %181 = memref.load %arg2[%c17] : memref<48xf32, #tpu.memory_space<smem>>
    %182 = vector.broadcast %181 : f32 to vector<8x48xf32>
    %183 = arith.mulf %182, %20 : vector<8x48xf32>
    %184 = arith.addf %176, %183 : vector<8x48xf32>
    %c17_26 = arith.constant 17 : index
    %185 = memref.load %arg4[%c17_26] : memref<48xf32, #tpu.memory_space<smem>>
    %186 = vector.broadcast %185 : f32 to vector<8x48xf32>
    %187 = arith.mulf %186, %20 : vector<8x48xf32>
    %188 = arith.addf %180, %187 : vector<8x48xf32>
    %c18 = arith.constant 18 : index
    %189 = memref.load %arg2[%c18] : memref<48xf32, #tpu.memory_space<smem>>
    %190 = vector.broadcast %189 : f32 to vector<8x48xf32>
    %191 = arith.mulf %190, %22 : vector<8x48xf32>
    %192 = arith.addf %184, %191 : vector<8x48xf32>
    %c18_27 = arith.constant 18 : index
    %193 = memref.load %arg4[%c18_27] : memref<48xf32, #tpu.memory_space<smem>>
    %194 = vector.broadcast %193 : f32 to vector<8x48xf32>
    %195 = arith.mulf %194, %22 : vector<8x48xf32>
    %196 = arith.addf %188, %195 : vector<8x48xf32>
    %c19 = arith.constant 19 : index
    %197 = memref.load %arg2[%c19] : memref<48xf32, #tpu.memory_space<smem>>
    %198 = vector.broadcast %197 : f32 to vector<8x48xf32>
    %199 = arith.mulf %198, %10 : vector<8x48xf32>
    %200 = arith.addf %192, %199 : vector<8x48xf32>
    %c19_28 = arith.constant 19 : index
    %201 = memref.load %arg4[%c19_28] : memref<48xf32, #tpu.memory_space<smem>>
    %202 = vector.broadcast %201 : f32 to vector<8x48xf32>
    %203 = arith.mulf %202, %10 : vector<8x48xf32>
    %204 = arith.addf %196, %203 : vector<8x48xf32>
    %c20 = arith.constant 20 : index
    %205 = memref.load %arg2[%c20] : memref<48xf32, #tpu.memory_space<smem>>
    %206 = vector.broadcast %205 : f32 to vector<8x48xf32>
    %207 = arith.mulf %206, %24 : vector<8x48xf32>
    %208 = arith.addf %200, %207 : vector<8x48xf32>
    %c20_29 = arith.constant 20 : index
    %209 = memref.load %arg4[%c20_29] : memref<48xf32, #tpu.memory_space<smem>>
    %210 = vector.broadcast %209 : f32 to vector<8x48xf32>
    %211 = arith.mulf %210, %24 : vector<8x48xf32>
    %212 = arith.addf %204, %211 : vector<8x48xf32>
    %c21 = arith.constant 21 : index
    %213 = memref.load %arg2[%c21] : memref<48xf32, #tpu.memory_space<smem>>
    %214 = vector.broadcast %213 : f32 to vector<8x48xf32>
    %215 = arith.mulf %214, %26 : vector<8x48xf32>
    %216 = arith.addf %208, %215 : vector<8x48xf32>
    %c21_30 = arith.constant 21 : index
    %217 = memref.load %arg4[%c21_30] : memref<48xf32, #tpu.memory_space<smem>>
    %218 = vector.broadcast %217 : f32 to vector<8x48xf32>
    %219 = arith.mulf %218, %26 : vector<8x48xf32>
    %220 = arith.addf %212, %219 : vector<8x48xf32>
    %c22 = arith.constant 22 : index
    %221 = memref.load %arg2[%c22] : memref<48xf32, #tpu.memory_space<smem>>
    %222 = vector.broadcast %221 : f32 to vector<8x48xf32>
    %223 = arith.mulf %222, %12 : vector<8x48xf32>
    %224 = arith.addf %216, %223 : vector<8x48xf32>
    %c22_31 = arith.constant 22 : index
    %225 = memref.load %arg4[%c22_31] : memref<48xf32, #tpu.memory_space<smem>>
    %226 = vector.broadcast %225 : f32 to vector<8x48xf32>
    %227 = arith.mulf %226, %12 : vector<8x48xf32>
    %228 = arith.addf %220, %227 : vector<8x48xf32>
    %c23 = arith.constant 23 : index
    %229 = memref.load %arg2[%c23] : memref<48xf32, #tpu.memory_space<smem>>
    %230 = vector.broadcast %229 : f32 to vector<8x48xf32>
    %231 = arith.mulf %230, %28 : vector<8x48xf32>
    %232 = arith.addf %224, %231 : vector<8x48xf32>
    %c23_32 = arith.constant 23 : index
    %233 = memref.load %arg4[%c23_32] : memref<48xf32, #tpu.memory_space<smem>>
    %234 = vector.broadcast %233 : f32 to vector<8x48xf32>
    %235 = arith.mulf %234, %28 : vector<8x48xf32>
    %236 = arith.addf %228, %235 : vector<8x48xf32>
    %cst_33 = arith.constant 5.000000e-01 : f32
    %237 = vector.broadcast %cst_33 : f32 to vector<8x48xf32>
    %238 = arith.mulf %237, %236 : vector<8x48xf32>
    %239 = math.tanh %238 : vector<8x48xf32>
    %cst_34 = arith.constant 1.000000e+00 : f32
    %240 = vector.broadcast %cst_34 : f32 to vector<8x48xf32>
    %241 = arith.addf %239, %240 : vector<8x48xf32>
    %cst_35 = arith.constant 5.000000e-01 : f32
    %242 = vector.broadcast %cst_35 : f32 to vector<8x48xf32>
    %243 = arith.mulf %242, %241 : vector<8x48xf32>
    %244 = arith.mulf %232, %243 : vector<8x48xf32>
    %c2_36 = arith.constant 2 : index
    %245 = memref.load %arg3[%c2_36] : memref<4xf32, #tpu.memory_space<smem>>
    %246 = vector.broadcast %245 : f32 to vector<8x48xf32>
    %c2_37 = arith.constant 2 : index
    %247 = memref.load %arg5[%c2_37] : memref<4xf32, #tpu.memory_space<smem>>
    %248 = vector.broadcast %247 : f32 to vector<8x48xf32>
    %c24 = arith.constant 24 : index
    %249 = memref.load %arg2[%c24] : memref<48xf32, #tpu.memory_space<smem>>
    %250 = vector.broadcast %249 : f32 to vector<8x48xf32>
    %251 = arith.mulf %250, %14 : vector<8x48xf32>
    %252 = arith.addf %246, %251 : vector<8x48xf32>
    %c24_38 = arith.constant 24 : index
    %253 = memref.load %arg4[%c24_38] : memref<48xf32, #tpu.memory_space<smem>>
    %254 = vector.broadcast %253 : f32 to vector<8x48xf32>
    %255 = arith.mulf %254, %14 : vector<8x48xf32>
    %256 = arith.addf %248, %255 : vector<8x48xf32>
    %c25 = arith.constant 25 : index
    %257 = memref.load %arg2[%c25] : memref<48xf32, #tpu.memory_space<smem>>
    %258 = vector.broadcast %257 : f32 to vector<8x48xf32>
    %259 = arith.mulf %258, %6 : vector<8x48xf32>
    %260 = arith.addf %252, %259 : vector<8x48xf32>
    %c25_39 = arith.constant 25 : index
    %261 = memref.load %arg4[%c25_39] : memref<48xf32, #tpu.memory_space<smem>>
    %262 = vector.broadcast %261 : f32 to vector<8x48xf32>
    %263 = arith.mulf %262, %6 : vector<8x48xf32>
    %264 = arith.addf %256, %263 : vector<8x48xf32>
    %c26 = arith.constant 26 : index
    %265 = memref.load %arg2[%c26] : memref<48xf32, #tpu.memory_space<smem>>
    %266 = vector.broadcast %265 : f32 to vector<8x48xf32>
    %267 = arith.mulf %266, %16 : vector<8x48xf32>
    %268 = arith.addf %260, %267 : vector<8x48xf32>
    %c26_40 = arith.constant 26 : index
    %269 = memref.load %arg4[%c26_40] : memref<48xf32, #tpu.memory_space<smem>>
    %270 = vector.broadcast %269 : f32 to vector<8x48xf32>
    %271 = arith.mulf %270, %16 : vector<8x48xf32>
    %272 = arith.addf %264, %271 : vector<8x48xf32>
    %c27 = arith.constant 27 : index
    %273 = memref.load %arg2[%c27] : memref<48xf32, #tpu.memory_space<smem>>
    %274 = vector.broadcast %273 : f32 to vector<8x48xf32>
    %275 = arith.mulf %274, %18 : vector<8x48xf32>
    %276 = arith.addf %268, %275 : vector<8x48xf32>
    %c27_41 = arith.constant 27 : index
    %277 = memref.load %arg4[%c27_41] : memref<48xf32, #tpu.memory_space<smem>>
    %278 = vector.broadcast %277 : f32 to vector<8x48xf32>
    %279 = arith.mulf %278, %18 : vector<8x48xf32>
    %280 = arith.addf %272, %279 : vector<8x48xf32>
    %c28 = arith.constant 28 : index
    %281 = memref.load %arg2[%c28] : memref<48xf32, #tpu.memory_space<smem>>
    %282 = vector.broadcast %281 : f32 to vector<8x48xf32>
    %283 = arith.mulf %282, %8 : vector<8x48xf32>
    %284 = arith.addf %276, %283 : vector<8x48xf32>
    %c28_42 = arith.constant 28 : index
    %285 = memref.load %arg4[%c28_42] : memref<48xf32, #tpu.memory_space<smem>>
    %286 = vector.broadcast %285 : f32 to vector<8x48xf32>
    %287 = arith.mulf %286, %8 : vector<8x48xf32>
    %288 = arith.addf %280, %287 : vector<8x48xf32>
    %c29 = arith.constant 29 : index
    %289 = memref.load %arg2[%c29] : memref<48xf32, #tpu.memory_space<smem>>
    %290 = vector.broadcast %289 : f32 to vector<8x48xf32>
    %291 = arith.mulf %290, %20 : vector<8x48xf32>
    %292 = arith.addf %284, %291 : vector<8x48xf32>
    %c29_43 = arith.constant 29 : index
    %293 = memref.load %arg4[%c29_43] : memref<48xf32, #tpu.memory_space<smem>>
    %294 = vector.broadcast %293 : f32 to vector<8x48xf32>
    %295 = arith.mulf %294, %20 : vector<8x48xf32>
    %296 = arith.addf %288, %295 : vector<8x48xf32>
    %c30 = arith.constant 30 : index
    %297 = memref.load %arg2[%c30] : memref<48xf32, #tpu.memory_space<smem>>
    %298 = vector.broadcast %297 : f32 to vector<8x48xf32>
    %299 = arith.mulf %298, %22 : vector<8x48xf32>
    %300 = arith.addf %292, %299 : vector<8x48xf32>
    %c30_44 = arith.constant 30 : index
    %301 = memref.load %arg4[%c30_44] : memref<48xf32, #tpu.memory_space<smem>>
    %302 = vector.broadcast %301 : f32 to vector<8x48xf32>
    %303 = arith.mulf %302, %22 : vector<8x48xf32>
    %304 = arith.addf %296, %303 : vector<8x48xf32>
    %c31 = arith.constant 31 : index
    %305 = memref.load %arg2[%c31] : memref<48xf32, #tpu.memory_space<smem>>
    %306 = vector.broadcast %305 : f32 to vector<8x48xf32>
    %307 = arith.mulf %306, %10 : vector<8x48xf32>
    %308 = arith.addf %300, %307 : vector<8x48xf32>
    %c31_45 = arith.constant 31 : index
    %309 = memref.load %arg4[%c31_45] : memref<48xf32, #tpu.memory_space<smem>>
    %310 = vector.broadcast %309 : f32 to vector<8x48xf32>
    %311 = arith.mulf %310, %10 : vector<8x48xf32>
    %312 = arith.addf %304, %311 : vector<8x48xf32>
    %c32 = arith.constant 32 : index
    %313 = memref.load %arg2[%c32] : memref<48xf32, #tpu.memory_space<smem>>
    %314 = vector.broadcast %313 : f32 to vector<8x48xf32>
    %315 = arith.mulf %314, %24 : vector<8x48xf32>
    %316 = arith.addf %308, %315 : vector<8x48xf32>
    %c32_46 = arith.constant 32 : index
    %317 = memref.load %arg4[%c32_46] : memref<48xf32, #tpu.memory_space<smem>>
    %318 = vector.broadcast %317 : f32 to vector<8x48xf32>
    %319 = arith.mulf %318, %24 : vector<8x48xf32>
    %320 = arith.addf %312, %319 : vector<8x48xf32>
    %c33 = arith.constant 33 : index
    %321 = memref.load %arg2[%c33] : memref<48xf32, #tpu.memory_space<smem>>
    %322 = vector.broadcast %321 : f32 to vector<8x48xf32>
    %323 = arith.mulf %322, %26 : vector<8x48xf32>
    %324 = arith.addf %316, %323 : vector<8x48xf32>
    %c33_47 = arith.constant 33 : index
    %325 = memref.load %arg4[%c33_47] : memref<48xf32, #tpu.memory_space<smem>>
    %326 = vector.broadcast %325 : f32 to vector<8x48xf32>
    %327 = arith.mulf %326, %26 : vector<8x48xf32>
    %328 = arith.addf %320, %327 : vector<8x48xf32>
    %c34 = arith.constant 34 : index
    %329 = memref.load %arg2[%c34] : memref<48xf32, #tpu.memory_space<smem>>
    %330 = vector.broadcast %329 : f32 to vector<8x48xf32>
    %331 = arith.mulf %330, %12 : vector<8x48xf32>
    %332 = arith.addf %324, %331 : vector<8x48xf32>
    %c34_48 = arith.constant 34 : index
    %333 = memref.load %arg4[%c34_48] : memref<48xf32, #tpu.memory_space<smem>>
    %334 = vector.broadcast %333 : f32 to vector<8x48xf32>
    %335 = arith.mulf %334, %12 : vector<8x48xf32>
    %336 = arith.addf %328, %335 : vector<8x48xf32>
    %c35 = arith.constant 35 : index
    %337 = memref.load %arg2[%c35] : memref<48xf32, #tpu.memory_space<smem>>
    %338 = vector.broadcast %337 : f32 to vector<8x48xf32>
    %339 = arith.mulf %338, %28 : vector<8x48xf32>
    %340 = arith.addf %332, %339 : vector<8x48xf32>
    %c35_49 = arith.constant 35 : index
    %341 = memref.load %arg4[%c35_49] : memref<48xf32, #tpu.memory_space<smem>>
    %342 = vector.broadcast %341 : f32 to vector<8x48xf32>
    %343 = arith.mulf %342, %28 : vector<8x48xf32>
    %344 = arith.addf %336, %343 : vector<8x48xf32>
    %cst_50 = arith.constant 5.000000e-01 : f32
    %345 = vector.broadcast %cst_50 : f32 to vector<8x48xf32>
    %346 = arith.mulf %345, %344 : vector<8x48xf32>
    %347 = math.tanh %346 : vector<8x48xf32>
    %cst_51 = arith.constant 1.000000e+00 : f32
    %348 = vector.broadcast %cst_51 : f32 to vector<8x48xf32>
    %349 = arith.addf %347, %348 : vector<8x48xf32>
    %cst_52 = arith.constant 5.000000e-01 : f32
    %350 = vector.broadcast %cst_52 : f32 to vector<8x48xf32>
    %351 = arith.mulf %350, %349 : vector<8x48xf32>
    %352 = arith.mulf %340, %351 : vector<8x48xf32>
    %c3_53 = arith.constant 3 : index
    %353 = memref.load %arg3[%c3_53] : memref<4xf32, #tpu.memory_space<smem>>
    %354 = vector.broadcast %353 : f32 to vector<8x48xf32>
    %c3_54 = arith.constant 3 : index
    %355 = memref.load %arg5[%c3_54] : memref<4xf32, #tpu.memory_space<smem>>
    %356 = vector.broadcast %355 : f32 to vector<8x48xf32>
    %c36 = arith.constant 36 : index
    %357 = memref.load %arg2[%c36] : memref<48xf32, #tpu.memory_space<smem>>
    %358 = vector.broadcast %357 : f32 to vector<8x48xf32>
    %359 = arith.mulf %358, %14 : vector<8x48xf32>
    %360 = arith.addf %354, %359 : vector<8x48xf32>
    %c36_55 = arith.constant 36 : index
    %361 = memref.load %arg4[%c36_55] : memref<48xf32, #tpu.memory_space<smem>>
    %362 = vector.broadcast %361 : f32 to vector<8x48xf32>
    %363 = arith.mulf %362, %14 : vector<8x48xf32>
    %364 = arith.addf %356, %363 : vector<8x48xf32>
    %c37 = arith.constant 37 : index
    %365 = memref.load %arg2[%c37] : memref<48xf32, #tpu.memory_space<smem>>
    %366 = vector.broadcast %365 : f32 to vector<8x48xf32>
    %367 = arith.mulf %366, %6 : vector<8x48xf32>
    %368 = arith.addf %360, %367 : vector<8x48xf32>
    %c37_56 = arith.constant 37 : index
    %369 = memref.load %arg4[%c37_56] : memref<48xf32, #tpu.memory_space<smem>>
    %370 = vector.broadcast %369 : f32 to vector<8x48xf32>
    %371 = arith.mulf %370, %6 : vector<8x48xf32>
    %372 = arith.addf %364, %371 : vector<8x48xf32>
    %c38 = arith.constant 38 : index
    %373 = memref.load %arg2[%c38] : memref<48xf32, #tpu.memory_space<smem>>
    %374 = vector.broadcast %373 : f32 to vector<8x48xf32>
    %375 = arith.mulf %374, %16 : vector<8x48xf32>
    %376 = arith.addf %368, %375 : vector<8x48xf32>
    %c38_57 = arith.constant 38 : index
    %377 = memref.load %arg4[%c38_57] : memref<48xf32, #tpu.memory_space<smem>>
    %378 = vector.broadcast %377 : f32 to vector<8x48xf32>
    %379 = arith.mulf %378, %16 : vector<8x48xf32>
    %380 = arith.addf %372, %379 : vector<8x48xf32>
    %c39 = arith.constant 39 : index
    %381 = memref.load %arg2[%c39] : memref<48xf32, #tpu.memory_space<smem>>
    %382 = vector.broadcast %381 : f32 to vector<8x48xf32>
    %383 = arith.mulf %382, %18 : vector<8x48xf32>
    %384 = arith.addf %376, %383 : vector<8x48xf32>
    %c39_58 = arith.constant 39 : index
    %385 = memref.load %arg4[%c39_58] : memref<48xf32, #tpu.memory_space<smem>>
    %386 = vector.broadcast %385 : f32 to vector<8x48xf32>
    %387 = arith.mulf %386, %18 : vector<8x48xf32>
    %388 = arith.addf %380, %387 : vector<8x48xf32>
    %c40 = arith.constant 40 : index
    %389 = memref.load %arg2[%c40] : memref<48xf32, #tpu.memory_space<smem>>
    %390 = vector.broadcast %389 : f32 to vector<8x48xf32>
    %391 = arith.mulf %390, %8 : vector<8x48xf32>
    %392 = arith.addf %384, %391 : vector<8x48xf32>
    %c40_59 = arith.constant 40 : index
    %393 = memref.load %arg4[%c40_59] : memref<48xf32, #tpu.memory_space<smem>>
    %394 = vector.broadcast %393 : f32 to vector<8x48xf32>
    %395 = arith.mulf %394, %8 : vector<8x48xf32>
    %396 = arith.addf %388, %395 : vector<8x48xf32>
    %c41 = arith.constant 41 : index
    %397 = memref.load %arg2[%c41] : memref<48xf32, #tpu.memory_space<smem>>
    %398 = vector.broadcast %397 : f32 to vector<8x48xf32>
    %399 = arith.mulf %398, %20 : vector<8x48xf32>
    %400 = arith.addf %392, %399 : vector<8x48xf32>
    %c41_60 = arith.constant 41 : index
    %401 = memref.load %arg4[%c41_60] : memref<48xf32, #tpu.memory_space<smem>>
    %402 = vector.broadcast %401 : f32 to vector<8x48xf32>
    %403 = arith.mulf %402, %20 : vector<8x48xf32>
    %404 = arith.addf %396, %403 : vector<8x48xf32>
    %c42 = arith.constant 42 : index
    %405 = memref.load %arg2[%c42] : memref<48xf32, #tpu.memory_space<smem>>
    %406 = vector.broadcast %405 : f32 to vector<8x48xf32>
    %407 = arith.mulf %406, %22 : vector<8x48xf32>
    %408 = arith.addf %400, %407 : vector<8x48xf32>
    %c42_61 = arith.constant 42 : index
    %409 = memref.load %arg4[%c42_61] : memref<48xf32, #tpu.memory_space<smem>>
    %410 = vector.broadcast %409 : f32 to vector<8x48xf32>
    %411 = arith.mulf %410, %22 : vector<8x48xf32>
    %412 = arith.addf %404, %411 : vector<8x48xf32>
    %c43 = arith.constant 43 : index
    %413 = memref.load %arg2[%c43] : memref<48xf32, #tpu.memory_space<smem>>
    %414 = vector.broadcast %413 : f32 to vector<8x48xf32>
    %415 = arith.mulf %414, %10 : vector<8x48xf32>
    %416 = arith.addf %408, %415 : vector<8x48xf32>
    %c43_62 = arith.constant 43 : index
    %417 = memref.load %arg4[%c43_62] : memref<48xf32, #tpu.memory_space<smem>>
    %418 = vector.broadcast %417 : f32 to vector<8x48xf32>
    %419 = arith.mulf %418, %10 : vector<8x48xf32>
    %420 = arith.addf %412, %419 : vector<8x48xf32>
    %c44 = arith.constant 44 : index
    %421 = memref.load %arg2[%c44] : memref<48xf32, #tpu.memory_space<smem>>
    %422 = vector.broadcast %421 : f32 to vector<8x48xf32>
    %423 = arith.mulf %422, %24 : vector<8x48xf32>
    %424 = arith.addf %416, %423 : vector<8x48xf32>
    %c44_63 = arith.constant 44 : index
    %425 = memref.load %arg4[%c44_63] : memref<48xf32, #tpu.memory_space<smem>>
    %426 = vector.broadcast %425 : f32 to vector<8x48xf32>
    %427 = arith.mulf %426, %24 : vector<8x48xf32>
    %428 = arith.addf %420, %427 : vector<8x48xf32>
    %c45 = arith.constant 45 : index
    %429 = memref.load %arg2[%c45] : memref<48xf32, #tpu.memory_space<smem>>
    %430 = vector.broadcast %429 : f32 to vector<8x48xf32>
    %431 = arith.mulf %430, %26 : vector<8x48xf32>
    %432 = arith.addf %424, %431 : vector<8x48xf32>
    %c45_64 = arith.constant 45 : index
    %433 = memref.load %arg4[%c45_64] : memref<48xf32, #tpu.memory_space<smem>>
    %434 = vector.broadcast %433 : f32 to vector<8x48xf32>
    %435 = arith.mulf %434, %26 : vector<8x48xf32>
    %436 = arith.addf %428, %435 : vector<8x48xf32>
    %c46 = arith.constant 46 : index
    %437 = memref.load %arg2[%c46] : memref<48xf32, #tpu.memory_space<smem>>
    %438 = vector.broadcast %437 : f32 to vector<8x48xf32>
    %439 = arith.mulf %438, %12 : vector<8x48xf32>
    %440 = arith.addf %432, %439 : vector<8x48xf32>
    %c46_65 = arith.constant 46 : index
    %441 = memref.load %arg4[%c46_65] : memref<48xf32, #tpu.memory_space<smem>>
    %442 = vector.broadcast %441 : f32 to vector<8x48xf32>
    %443 = arith.mulf %442, %12 : vector<8x48xf32>
    %444 = arith.addf %436, %443 : vector<8x48xf32>
    %c47 = arith.constant 47 : index
    %445 = memref.load %arg2[%c47] : memref<48xf32, #tpu.memory_space<smem>>
    %446 = vector.broadcast %445 : f32 to vector<8x48xf32>
    %447 = arith.mulf %446, %28 : vector<8x48xf32>
    %448 = arith.addf %440, %447 : vector<8x48xf32>
    %c47_66 = arith.constant 47 : index
    %449 = memref.load %arg4[%c47_66] : memref<48xf32, #tpu.memory_space<smem>>
    %450 = vector.broadcast %449 : f32 to vector<8x48xf32>
    %451 = arith.mulf %450, %28 : vector<8x48xf32>
    %452 = arith.addf %444, %451 : vector<8x48xf32>
    %cst_67 = arith.constant 5.000000e-01 : f32
    %453 = vector.broadcast %cst_67 : f32 to vector<8x48xf32>
    %454 = arith.mulf %453, %452 : vector<8x48xf32>
    %455 = math.tanh %454 : vector<8x48xf32>
    %cst_68 = arith.constant 1.000000e+00 : f32
    %456 = vector.broadcast %cst_68 : f32 to vector<8x48xf32>
    %457 = arith.addf %455, %456 : vector<8x48xf32>
    %cst_69 = arith.constant 5.000000e-01 : f32
    %458 = vector.broadcast %cst_69 : f32 to vector<8x48xf32>
    %459 = arith.mulf %458, %457 : vector<8x48xf32>
    %460 = arith.mulf %448, %459 : vector<8x48xf32>
    %461 = vector.extract_strided_slice %136 {offsets = [0, 0], sizes = [8, 47], strides = [1, 1]} : vector<8x48xf32> to vector<8x47xf32>
    %462 = tpu.concatenate %0, %461 in 1 : vector<8x1xf32>, vector<8x47xf32> -> vector<8x48xf32>
    %463 = vector.extract_strided_slice %136 {offsets = [0, 1], sizes = [8, 47], strides = [1, 1]} : vector<8x48xf32> to vector<8x47xf32>
    %464 = tpu.concatenate %463, %0 in 1 : vector<8x47xf32>, vector<8x1xf32> -> vector<8x48xf32>
    %465 = vector.extract_strided_slice %244 {offsets = [0, 0], sizes = [8, 47], strides = [1, 1]} : vector<8x48xf32> to vector<8x47xf32>
    %466 = tpu.concatenate %0, %465 in 1 : vector<8x1xf32>, vector<8x47xf32> -> vector<8x48xf32>
    %467 = vector.extract_strided_slice %244 {offsets = [0, 1], sizes = [8, 47], strides = [1, 1]} : vector<8x48xf32> to vector<8x47xf32>
    %468 = tpu.concatenate %467, %0 in 1 : vector<8x47xf32>, vector<8x1xf32> -> vector<8x48xf32>
    %469 = vector.extract_strided_slice %352 {offsets = [0, 0], sizes = [8, 47], strides = [1, 1]} : vector<8x48xf32> to vector<8x47xf32>
    %470 = tpu.concatenate %0, %469 in 1 : vector<8x1xf32>, vector<8x47xf32> -> vector<8x48xf32>
    %471 = vector.extract_strided_slice %352 {offsets = [0, 1], sizes = [8, 47], strides = [1, 1]} : vector<8x48xf32> to vector<8x47xf32>
    %472 = tpu.concatenate %471, %0 in 1 : vector<8x47xf32>, vector<8x1xf32> -> vector<8x48xf32>
    %473 = vector.extract_strided_slice %460 {offsets = [0, 0], sizes = [8, 47], strides = [1, 1]} : vector<8x48xf32> to vector<8x47xf32>
    %474 = tpu.concatenate %0, %473 in 1 : vector<8x1xf32>, vector<8x47xf32> -> vector<8x48xf32>
    %475 = vector.extract_strided_slice %460 {offsets = [0, 1], sizes = [8, 47], strides = [1, 1]} : vector<8x48xf32> to vector<8x47xf32>
    %476 = tpu.concatenate %475, %0 in 1 : vector<8x47xf32>, vector<8x1xf32> -> vector<8x48xf32>
    %c0_70 = arith.constant 0 : index
    %477 = memref.load %arg7[%c0_70] : memref<4xf32, #tpu.memory_space<smem>>
    %478 = vector.broadcast %477 : f32 to vector<8x48xf32>
    %c0_71 = arith.constant 0 : index
    %479 = memref.load %arg9[%c0_71] : memref<4xf32, #tpu.memory_space<smem>>
    %480 = vector.broadcast %479 : f32 to vector<8x48xf32>
    %c0_72 = arith.constant 0 : index
    %481 = memref.load %arg6[%c0_72] : memref<48xf32, #tpu.memory_space<smem>>
    %482 = vector.broadcast %481 : f32 to vector<8x48xf32>
    %483 = arith.mulf %482, %462 : vector<8x48xf32>
    %484 = arith.addf %478, %483 : vector<8x48xf32>
    %c0_73 = arith.constant 0 : index
    %485 = memref.load %arg8[%c0_73] : memref<48xf32, #tpu.memory_space<smem>>
    %486 = vector.broadcast %485 : f32 to vector<8x48xf32>
    %487 = arith.mulf %486, %462 : vector<8x48xf32>
    %488 = arith.addf %480, %487 : vector<8x48xf32>
    %c1_74 = arith.constant 1 : index
    %489 = memref.load %arg6[%c1_74] : memref<48xf32, #tpu.memory_space<smem>>
    %490 = vector.broadcast %489 : f32 to vector<8x48xf32>
    %491 = arith.mulf %490, %136 : vector<8x48xf32>
    %492 = arith.addf %484, %491 : vector<8x48xf32>
    %c1_75 = arith.constant 1 : index
    %493 = memref.load %arg8[%c1_75] : memref<48xf32, #tpu.memory_space<smem>>
    %494 = vector.broadcast %493 : f32 to vector<8x48xf32>
    %495 = arith.mulf %494, %136 : vector<8x48xf32>
    %496 = arith.addf %488, %495 : vector<8x48xf32>
    %c2_76 = arith.constant 2 : index
    %497 = memref.load %arg6[%c2_76] : memref<48xf32, #tpu.memory_space<smem>>
    %498 = vector.broadcast %497 : f32 to vector<8x48xf32>
    %499 = arith.mulf %498, %464 : vector<8x48xf32>
    %500 = arith.addf %492, %499 : vector<8x48xf32>
    %c2_77 = arith.constant 2 : index
    %501 = memref.load %arg8[%c2_77] : memref<48xf32, #tpu.memory_space<smem>>
    %502 = vector.broadcast %501 : f32 to vector<8x48xf32>
    %503 = arith.mulf %502, %464 : vector<8x48xf32>
    %504 = arith.addf %496, %503 : vector<8x48xf32>
    %c3_78 = arith.constant 3 : index
    %505 = memref.load %arg6[%c3_78] : memref<48xf32, #tpu.memory_space<smem>>
    %506 = vector.broadcast %505 : f32 to vector<8x48xf32>
    %507 = arith.mulf %506, %466 : vector<8x48xf32>
    %508 = arith.addf %500, %507 : vector<8x48xf32>
    %c3_79 = arith.constant 3 : index
    %509 = memref.load %arg8[%c3_79] : memref<48xf32, #tpu.memory_space<smem>>
    %510 = vector.broadcast %509 : f32 to vector<8x48xf32>
    %511 = arith.mulf %510, %466 : vector<8x48xf32>
    %512 = arith.addf %504, %511 : vector<8x48xf32>
    %c4_80 = arith.constant 4 : index
    %513 = memref.load %arg6[%c4_80] : memref<48xf32, #tpu.memory_space<smem>>
    %514 = vector.broadcast %513 : f32 to vector<8x48xf32>
    %515 = arith.mulf %514, %244 : vector<8x48xf32>
    %516 = arith.addf %508, %515 : vector<8x48xf32>
    %c4_81 = arith.constant 4 : index
    %517 = memref.load %arg8[%c4_81] : memref<48xf32, #tpu.memory_space<smem>>
    %518 = vector.broadcast %517 : f32 to vector<8x48xf32>
    %519 = arith.mulf %518, %244 : vector<8x48xf32>
    %520 = arith.addf %512, %519 : vector<8x48xf32>
    %c5_82 = arith.constant 5 : index
    %521 = memref.load %arg6[%c5_82] : memref<48xf32, #tpu.memory_space<smem>>
    %522 = vector.broadcast %521 : f32 to vector<8x48xf32>
    %523 = arith.mulf %522, %468 : vector<8x48xf32>
    %524 = arith.addf %516, %523 : vector<8x48xf32>
    %c5_83 = arith.constant 5 : index
    %525 = memref.load %arg8[%c5_83] : memref<48xf32, #tpu.memory_space<smem>>
    %526 = vector.broadcast %525 : f32 to vector<8x48xf32>
    %527 = arith.mulf %526, %468 : vector<8x48xf32>
    %528 = arith.addf %520, %527 : vector<8x48xf32>
    %c6_84 = arith.constant 6 : index
    %529 = memref.load %arg6[%c6_84] : memref<48xf32, #tpu.memory_space<smem>>
    %530 = vector.broadcast %529 : f32 to vector<8x48xf32>
    %531 = arith.mulf %530, %470 : vector<8x48xf32>
    %532 = arith.addf %524, %531 : vector<8x48xf32>
    %c6_85 = arith.constant 6 : index
    %533 = memref.load %arg8[%c6_85] : memref<48xf32, #tpu.memory_space<smem>>
    %534 = vector.broadcast %533 : f32 to vector<8x48xf32>
    %535 = arith.mulf %534, %470 : vector<8x48xf32>
    %536 = arith.addf %528, %535 : vector<8x48xf32>
    %c7_86 = arith.constant 7 : index
    %537 = memref.load %arg6[%c7_86] : memref<48xf32, #tpu.memory_space<smem>>
    %538 = vector.broadcast %537 : f32 to vector<8x48xf32>
    %539 = arith.mulf %538, %352 : vector<8x48xf32>
    %540 = arith.addf %532, %539 : vector<8x48xf32>
    %c7_87 = arith.constant 7 : index
    %541 = memref.load %arg8[%c7_87] : memref<48xf32, #tpu.memory_space<smem>>
    %542 = vector.broadcast %541 : f32 to vector<8x48xf32>
    %543 = arith.mulf %542, %352 : vector<8x48xf32>
    %544 = arith.addf %536, %543 : vector<8x48xf32>
    %c8_88 = arith.constant 8 : index
    %545 = memref.load %arg6[%c8_88] : memref<48xf32, #tpu.memory_space<smem>>
    %546 = vector.broadcast %545 : f32 to vector<8x48xf32>
    %547 = arith.mulf %546, %472 : vector<8x48xf32>
    %548 = arith.addf %540, %547 : vector<8x48xf32>
    %c8_89 = arith.constant 8 : index
    %549 = memref.load %arg8[%c8_89] : memref<48xf32, #tpu.memory_space<smem>>
    %550 = vector.broadcast %549 : f32 to vector<8x48xf32>
    %551 = arith.mulf %550, %472 : vector<8x48xf32>
    %552 = arith.addf %544, %551 : vector<8x48xf32>
    %c9_90 = arith.constant 9 : index
    %553 = memref.load %arg6[%c9_90] : memref<48xf32, #tpu.memory_space<smem>>
    %554 = vector.broadcast %553 : f32 to vector<8x48xf32>
    %555 = arith.mulf %554, %474 : vector<8x48xf32>
    %556 = arith.addf %548, %555 : vector<8x48xf32>
    %c9_91 = arith.constant 9 : index
    %557 = memref.load %arg8[%c9_91] : memref<48xf32, #tpu.memory_space<smem>>
    %558 = vector.broadcast %557 : f32 to vector<8x48xf32>
    %559 = arith.mulf %558, %474 : vector<8x48xf32>
    %560 = arith.addf %552, %559 : vector<8x48xf32>
    %c10_92 = arith.constant 10 : index
    %561 = memref.load %arg6[%c10_92] : memref<48xf32, #tpu.memory_space<smem>>
    %562 = vector.broadcast %561 : f32 to vector<8x48xf32>
    %563 = arith.mulf %562, %460 : vector<8x48xf32>
    %564 = arith.addf %556, %563 : vector<8x48xf32>
    %c10_93 = arith.constant 10 : index
    %565 = memref.load %arg8[%c10_93] : memref<48xf32, #tpu.memory_space<smem>>
    %566 = vector.broadcast %565 : f32 to vector<8x48xf32>
    %567 = arith.mulf %566, %460 : vector<8x48xf32>
    %568 = arith.addf %560, %567 : vector<8x48xf32>
    %c11_94 = arith.constant 11 : index
    %569 = memref.load %arg6[%c11_94] : memref<48xf32, #tpu.memory_space<smem>>
    %570 = vector.broadcast %569 : f32 to vector<8x48xf32>
    %571 = arith.mulf %570, %476 : vector<8x48xf32>
    %572 = arith.addf %564, %571 : vector<8x48xf32>
    %c11_95 = arith.constant 11 : index
    %573 = memref.load %arg8[%c11_95] : memref<48xf32, #tpu.memory_space<smem>>
    %574 = vector.broadcast %573 : f32 to vector<8x48xf32>
    %575 = arith.mulf %574, %476 : vector<8x48xf32>
    %576 = arith.addf %568, %575 : vector<8x48xf32>
    %cst_96 = arith.constant 5.000000e-01 : f32
    %577 = vector.broadcast %cst_96 : f32 to vector<8x48xf32>
    %578 = arith.mulf %577, %576 : vector<8x48xf32>
    %579 = math.tanh %578 : vector<8x48xf32>
    %cst_97 = arith.constant 1.000000e+00 : f32
    %580 = vector.broadcast %cst_97 : f32 to vector<8x48xf32>
    %581 = arith.addf %579, %580 : vector<8x48xf32>
    %cst_98 = arith.constant 5.000000e-01 : f32
    %582 = vector.broadcast %cst_98 : f32 to vector<8x48xf32>
    %583 = arith.mulf %582, %581 : vector<8x48xf32>
    %584 = arith.mulf %572, %583 : vector<8x48xf32>
    %c1_99 = arith.constant 1 : index
    %585 = memref.load %arg7[%c1_99] : memref<4xf32, #tpu.memory_space<smem>>
    %586 = vector.broadcast %585 : f32 to vector<8x48xf32>
    %c1_100 = arith.constant 1 : index
    %587 = memref.load %arg9[%c1_100] : memref<4xf32, #tpu.memory_space<smem>>
    %588 = vector.broadcast %587 : f32 to vector<8x48xf32>
    %c12_101 = arith.constant 12 : index
    %589 = memref.load %arg6[%c12_101] : memref<48xf32, #tpu.memory_space<smem>>
    %590 = vector.broadcast %589 : f32 to vector<8x48xf32>
    %591 = arith.mulf %590, %462 : vector<8x48xf32>
    %592 = arith.addf %586, %591 : vector<8x48xf32>
    %c12_102 = arith.constant 12 : index
    %593 = memref.load %arg8[%c12_102] : memref<48xf32, #tpu.memory_space<smem>>
    %594 = vector.broadcast %593 : f32 to vector<8x48xf32>
    %595 = arith.mulf %594, %462 : vector<8x48xf32>
    %596 = arith.addf %588, %595 : vector<8x48xf32>
    %c13_103 = arith.constant 13 : index
    %597 = memref.load %arg6[%c13_103] : memref<48xf32, #tpu.memory_space<smem>>
    %598 = vector.broadcast %597 : f32 to vector<8x48xf32>
    %599 = arith.mulf %598, %136 : vector<8x48xf32>
    %600 = arith.addf %592, %599 : vector<8x48xf32>
    %c13_104 = arith.constant 13 : index
    %601 = memref.load %arg8[%c13_104] : memref<48xf32, #tpu.memory_space<smem>>
    %602 = vector.broadcast %601 : f32 to vector<8x48xf32>
    %603 = arith.mulf %602, %136 : vector<8x48xf32>
    %604 = arith.addf %596, %603 : vector<8x48xf32>
    %c14_105 = arith.constant 14 : index
    %605 = memref.load %arg6[%c14_105] : memref<48xf32, #tpu.memory_space<smem>>
    %606 = vector.broadcast %605 : f32 to vector<8x48xf32>
    %607 = arith.mulf %606, %464 : vector<8x48xf32>
    %608 = arith.addf %600, %607 : vector<8x48xf32>
    %c14_106 = arith.constant 14 : index
    %609 = memref.load %arg8[%c14_106] : memref<48xf32, #tpu.memory_space<smem>>
    %610 = vector.broadcast %609 : f32 to vector<8x48xf32>
    %611 = arith.mulf %610, %464 : vector<8x48xf32>
    %612 = arith.addf %604, %611 : vector<8x48xf32>
    %c15_107 = arith.constant 15 : index
    %613 = memref.load %arg6[%c15_107] : memref<48xf32, #tpu.memory_space<smem>>
    %614 = vector.broadcast %613 : f32 to vector<8x48xf32>
    %615 = arith.mulf %614, %466 : vector<8x48xf32>
    %616 = arith.addf %608, %615 : vector<8x48xf32>
    %c15_108 = arith.constant 15 : index
    %617 = memref.load %arg8[%c15_108] : memref<48xf32, #tpu.memory_space<smem>>
    %618 = vector.broadcast %617 : f32 to vector<8x48xf32>
    %619 = arith.mulf %618, %466 : vector<8x48xf32>
    %620 = arith.addf %612, %619 : vector<8x48xf32>
    %c16_109 = arith.constant 16 : index
    %621 = memref.load %arg6[%c16_109] : memref<48xf32, #tpu.memory_space<smem>>
    %622 = vector.broadcast %621 : f32 to vector<8x48xf32>
    %623 = arith.mulf %622, %244 : vector<8x48xf32>
    %624 = arith.addf %616, %623 : vector<8x48xf32>
    %c16_110 = arith.constant 16 : index
    %625 = memref.load %arg8[%c16_110] : memref<48xf32, #tpu.memory_space<smem>>
    %626 = vector.broadcast %625 : f32 to vector<8x48xf32>
    %627 = arith.mulf %626, %244 : vector<8x48xf32>
    %628 = arith.addf %620, %627 : vector<8x48xf32>
    %c17_111 = arith.constant 17 : index
    %629 = memref.load %arg6[%c17_111] : memref<48xf32, #tpu.memory_space<smem>>
    %630 = vector.broadcast %629 : f32 to vector<8x48xf32>
    %631 = arith.mulf %630, %468 : vector<8x48xf32>
    %632 = arith.addf %624, %631 : vector<8x48xf32>
    %c17_112 = arith.constant 17 : index
    %633 = memref.load %arg8[%c17_112] : memref<48xf32, #tpu.memory_space<smem>>
    %634 = vector.broadcast %633 : f32 to vector<8x48xf32>
    %635 = arith.mulf %634, %468 : vector<8x48xf32>
    %636 = arith.addf %628, %635 : vector<8x48xf32>
    %c18_113 = arith.constant 18 : index
    %637 = memref.load %arg6[%c18_113] : memref<48xf32, #tpu.memory_space<smem>>
    %638 = vector.broadcast %637 : f32 to vector<8x48xf32>
    %639 = arith.mulf %638, %470 : vector<8x48xf32>
    %640 = arith.addf %632, %639 : vector<8x48xf32>
    %c18_114 = arith.constant 18 : index
    %641 = memref.load %arg8[%c18_114] : memref<48xf32, #tpu.memory_space<smem>>
    %642 = vector.broadcast %641 : f32 to vector<8x48xf32>
    %643 = arith.mulf %642, %470 : vector<8x48xf32>
    %644 = arith.addf %636, %643 : vector<8x48xf32>
    %c19_115 = arith.constant 19 : index
    %645 = memref.load %arg6[%c19_115] : memref<48xf32, #tpu.memory_space<smem>>
    %646 = vector.broadcast %645 : f32 to vector<8x48xf32>
    %647 = arith.mulf %646, %352 : vector<8x48xf32>
    %648 = arith.addf %640, %647 : vector<8x48xf32>
    %c19_116 = arith.constant 19 : index
    %649 = memref.load %arg8[%c19_116] : memref<48xf32, #tpu.memory_space<smem>>
    %650 = vector.broadcast %649 : f32 to vector<8x48xf32>
    %651 = arith.mulf %650, %352 : vector<8x48xf32>
    %652 = arith.addf %644, %651 : vector<8x48xf32>
    %c20_117 = arith.constant 20 : index
    %653 = memref.load %arg6[%c20_117] : memref<48xf32, #tpu.memory_space<smem>>
    %654 = vector.broadcast %653 : f32 to vector<8x48xf32>
    %655 = arith.mulf %654, %472 : vector<8x48xf32>
    %656 = arith.addf %648, %655 : vector<8x48xf32>
    %c20_118 = arith.constant 20 : index
    %657 = memref.load %arg8[%c20_118] : memref<48xf32, #tpu.memory_space<smem>>
    %658 = vector.broadcast %657 : f32 to vector<8x48xf32>
    %659 = arith.mulf %658, %472 : vector<8x48xf32>
    %660 = arith.addf %652, %659 : vector<8x48xf32>
    %c21_119 = arith.constant 21 : index
    %661 = memref.load %arg6[%c21_119] : memref<48xf32, #tpu.memory_space<smem>>
    %662 = vector.broadcast %661 : f32 to vector<8x48xf32>
    %663 = arith.mulf %662, %474 : vector<8x48xf32>
    %664 = arith.addf %656, %663 : vector<8x48xf32>
    %c21_120 = arith.constant 21 : index
    %665 = memref.load %arg8[%c21_120] : memref<48xf32, #tpu.memory_space<smem>>
    %666 = vector.broadcast %665 : f32 to vector<8x48xf32>
    %667 = arith.mulf %666, %474 : vector<8x48xf32>
    %668 = arith.addf %660, %667 : vector<8x48xf32>
    %c22_121 = arith.constant 22 : index
    %669 = memref.load %arg6[%c22_121] : memref<48xf32, #tpu.memory_space<smem>>
    %670 = vector.broadcast %669 : f32 to vector<8x48xf32>
    %671 = arith.mulf %670, %460 : vector<8x48xf32>
    %672 = arith.addf %664, %671 : vector<8x48xf32>
    %c22_122 = arith.constant 22 : index
    %673 = memref.load %arg8[%c22_122] : memref<48xf32, #tpu.memory_space<smem>>
    %674 = vector.broadcast %673 : f32 to vector<8x48xf32>
    %675 = arith.mulf %674, %460 : vector<8x48xf32>
    %676 = arith.addf %668, %675 : vector<8x48xf32>
    %c23_123 = arith.constant 23 : index
    %677 = memref.load %arg6[%c23_123] : memref<48xf32, #tpu.memory_space<smem>>
    %678 = vector.broadcast %677 : f32 to vector<8x48xf32>
    %679 = arith.mulf %678, %476 : vector<8x48xf32>
    %680 = arith.addf %672, %679 : vector<8x48xf32>
    %c23_124 = arith.constant 23 : index
    %681 = memref.load %arg8[%c23_124] : memref<48xf32, #tpu.memory_space<smem>>
    %682 = vector.broadcast %681 : f32 to vector<8x48xf32>
    %683 = arith.mulf %682, %476 : vector<8x48xf32>
    %684 = arith.addf %676, %683 : vector<8x48xf32>
    %cst_125 = arith.constant 5.000000e-01 : f32
    %685 = vector.broadcast %cst_125 : f32 to vector<8x48xf32>
    %686 = arith.mulf %685, %684 : vector<8x48xf32>
    %687 = math.tanh %686 : vector<8x48xf32>
    %cst_126 = arith.constant 1.000000e+00 : f32
    %688 = vector.broadcast %cst_126 : f32 to vector<8x48xf32>
    %689 = arith.addf %687, %688 : vector<8x48xf32>
    %cst_127 = arith.constant 5.000000e-01 : f32
    %690 = vector.broadcast %cst_127 : f32 to vector<8x48xf32>
    %691 = arith.mulf %690, %689 : vector<8x48xf32>
    %692 = arith.mulf %680, %691 : vector<8x48xf32>
    %c2_128 = arith.constant 2 : index
    %693 = memref.load %arg7[%c2_128] : memref<4xf32, #tpu.memory_space<smem>>
    %694 = vector.broadcast %693 : f32 to vector<8x48xf32>
    %c2_129 = arith.constant 2 : index
    %695 = memref.load %arg9[%c2_129] : memref<4xf32, #tpu.memory_space<smem>>
    %696 = vector.broadcast %695 : f32 to vector<8x48xf32>
    %c24_130 = arith.constant 24 : index
    %697 = memref.load %arg6[%c24_130] : memref<48xf32, #tpu.memory_space<smem>>
    %698 = vector.broadcast %697 : f32 to vector<8x48xf32>
    %699 = arith.mulf %698, %462 : vector<8x48xf32>
    %700 = arith.addf %694, %699 : vector<8x48xf32>
    %c24_131 = arith.constant 24 : index
    %701 = memref.load %arg8[%c24_131] : memref<48xf32, #tpu.memory_space<smem>>
    %702 = vector.broadcast %701 : f32 to vector<8x48xf32>
    %703 = arith.mulf %702, %462 : vector<8x48xf32>
    %704 = arith.addf %696, %703 : vector<8x48xf32>
    %c25_132 = arith.constant 25 : index
    %705 = memref.load %arg6[%c25_132] : memref<48xf32, #tpu.memory_space<smem>>
    %706 = vector.broadcast %705 : f32 to vector<8x48xf32>
    %707 = arith.mulf %706, %136 : vector<8x48xf32>
    %708 = arith.addf %700, %707 : vector<8x48xf32>
    %c25_133 = arith.constant 25 : index
    %709 = memref.load %arg8[%c25_133] : memref<48xf32, #tpu.memory_space<smem>>
    %710 = vector.broadcast %709 : f32 to vector<8x48xf32>
    %711 = arith.mulf %710, %136 : vector<8x48xf32>
    %712 = arith.addf %704, %711 : vector<8x48xf32>
    %c26_134 = arith.constant 26 : index
    %713 = memref.load %arg6[%c26_134] : memref<48xf32, #tpu.memory_space<smem>>
    %714 = vector.broadcast %713 : f32 to vector<8x48xf32>
    %715 = arith.mulf %714, %464 : vector<8x48xf32>
    %716 = arith.addf %708, %715 : vector<8x48xf32>
    %c26_135 = arith.constant 26 : index
    %717 = memref.load %arg8[%c26_135] : memref<48xf32, #tpu.memory_space<smem>>
    %718 = vector.broadcast %717 : f32 to vector<8x48xf32>
    %719 = arith.mulf %718, %464 : vector<8x48xf32>
    %720 = arith.addf %712, %719 : vector<8x48xf32>
    %c27_136 = arith.constant 27 : index
    %721 = memref.load %arg6[%c27_136] : memref<48xf32, #tpu.memory_space<smem>>
    %722 = vector.broadcast %721 : f32 to vector<8x48xf32>
    %723 = arith.mulf %722, %466 : vector<8x48xf32>
    %724 = arith.addf %716, %723 : vector<8x48xf32>
    %c27_137 = arith.constant 27 : index
    %725 = memref.load %arg8[%c27_137] : memref<48xf32, #tpu.memory_space<smem>>
    %726 = vector.broadcast %725 : f32 to vector<8x48xf32>
    %727 = arith.mulf %726, %466 : vector<8x48xf32>
    %728 = arith.addf %720, %727 : vector<8x48xf32>
    %c28_138 = arith.constant 28 : index
    %729 = memref.load %arg6[%c28_138] : memref<48xf32, #tpu.memory_space<smem>>
    %730 = vector.broadcast %729 : f32 to vector<8x48xf32>
    %731 = arith.mulf %730, %244 : vector<8x48xf32>
    %732 = arith.addf %724, %731 : vector<8x48xf32>
    %c28_139 = arith.constant 28 : index
    %733 = memref.load %arg8[%c28_139] : memref<48xf32, #tpu.memory_space<smem>>
    %734 = vector.broadcast %733 : f32 to vector<8x48xf32>
    %735 = arith.mulf %734, %244 : vector<8x48xf32>
    %736 = arith.addf %728, %735 : vector<8x48xf32>
    %c29_140 = arith.constant 29 : index
    %737 = memref.load %arg6[%c29_140] : memref<48xf32, #tpu.memory_space<smem>>
    %738 = vector.broadcast %737 : f32 to vector<8x48xf32>
    %739 = arith.mulf %738, %468 : vector<8x48xf32>
    %740 = arith.addf %732, %739 : vector<8x48xf32>
    %c29_141 = arith.constant 29 : index
    %741 = memref.load %arg8[%c29_141] : memref<48xf32, #tpu.memory_space<smem>>
    %742 = vector.broadcast %741 : f32 to vector<8x48xf32>
    %743 = arith.mulf %742, %468 : vector<8x48xf32>
    %744 = arith.addf %736, %743 : vector<8x48xf32>
    %c30_142 = arith.constant 30 : index
    %745 = memref.load %arg6[%c30_142] : memref<48xf32, #tpu.memory_space<smem>>
    %746 = vector.broadcast %745 : f32 to vector<8x48xf32>
    %747 = arith.mulf %746, %470 : vector<8x48xf32>
    %748 = arith.addf %740, %747 : vector<8x48xf32>
    %c30_143 = arith.constant 30 : index
    %749 = memref.load %arg8[%c30_143] : memref<48xf32, #tpu.memory_space<smem>>
    %750 = vector.broadcast %749 : f32 to vector<8x48xf32>
    %751 = arith.mulf %750, %470 : vector<8x48xf32>
    %752 = arith.addf %744, %751 : vector<8x48xf32>
    %c31_144 = arith.constant 31 : index
    %753 = memref.load %arg6[%c31_144] : memref<48xf32, #tpu.memory_space<smem>>
    %754 = vector.broadcast %753 : f32 to vector<8x48xf32>
    %755 = arith.mulf %754, %352 : vector<8x48xf32>
    %756 = arith.addf %748, %755 : vector<8x48xf32>
    %c31_145 = arith.constant 31 : index
    %757 = memref.load %arg8[%c31_145] : memref<48xf32, #tpu.memory_space<smem>>
    %758 = vector.broadcast %757 : f32 to vector<8x48xf32>
    %759 = arith.mulf %758, %352 : vector<8x48xf32>
    %760 = arith.addf %752, %759 : vector<8x48xf32>
    %c32_146 = arith.constant 32 : index
    %761 = memref.load %arg6[%c32_146] : memref<48xf32, #tpu.memory_space<smem>>
    %762 = vector.broadcast %761 : f32 to vector<8x48xf32>
    %763 = arith.mulf %762, %472 : vector<8x48xf32>
    %764 = arith.addf %756, %763 : vector<8x48xf32>
    %c32_147 = arith.constant 32 : index
    %765 = memref.load %arg8[%c32_147] : memref<48xf32, #tpu.memory_space<smem>>
    %766 = vector.broadcast %765 : f32 to vector<8x48xf32>
    %767 = arith.mulf %766, %472 : vector<8x48xf32>
    %768 = arith.addf %760, %767 : vector<8x48xf32>
    %c33_148 = arith.constant 33 : index
    %769 = memref.load %arg6[%c33_148] : memref<48xf32, #tpu.memory_space<smem>>
    %770 = vector.broadcast %769 : f32 to vector<8x48xf32>
    %771 = arith.mulf %770, %474 : vector<8x48xf32>
    %772 = arith.addf %764, %771 : vector<8x48xf32>
    %c33_149 = arith.constant 33 : index
    %773 = memref.load %arg8[%c33_149] : memref<48xf32, #tpu.memory_space<smem>>
    %774 = vector.broadcast %773 : f32 to vector<8x48xf32>
    %775 = arith.mulf %774, %474 : vector<8x48xf32>
    %776 = arith.addf %768, %775 : vector<8x48xf32>
    %c34_150 = arith.constant 34 : index
    %777 = memref.load %arg6[%c34_150] : memref<48xf32, #tpu.memory_space<smem>>
    %778 = vector.broadcast %777 : f32 to vector<8x48xf32>
    %779 = arith.mulf %778, %460 : vector<8x48xf32>
    %780 = arith.addf %772, %779 : vector<8x48xf32>
    %c34_151 = arith.constant 34 : index
    %781 = memref.load %arg8[%c34_151] : memref<48xf32, #tpu.memory_space<smem>>
    %782 = vector.broadcast %781 : f32 to vector<8x48xf32>
    %783 = arith.mulf %782, %460 : vector<8x48xf32>
    %784 = arith.addf %776, %783 : vector<8x48xf32>
    %c35_152 = arith.constant 35 : index
    %785 = memref.load %arg6[%c35_152] : memref<48xf32, #tpu.memory_space<smem>>
    %786 = vector.broadcast %785 : f32 to vector<8x48xf32>
    %787 = arith.mulf %786, %476 : vector<8x48xf32>
    %788 = arith.addf %780, %787 : vector<8x48xf32>
    %c35_153 = arith.constant 35 : index
    %789 = memref.load %arg8[%c35_153] : memref<48xf32, #tpu.memory_space<smem>>
    %790 = vector.broadcast %789 : f32 to vector<8x48xf32>
    %791 = arith.mulf %790, %476 : vector<8x48xf32>
    %792 = arith.addf %784, %791 : vector<8x48xf32>
    %cst_154 = arith.constant 5.000000e-01 : f32
    %793 = vector.broadcast %cst_154 : f32 to vector<8x48xf32>
    %794 = arith.mulf %793, %792 : vector<8x48xf32>
    %795 = math.tanh %794 : vector<8x48xf32>
    %cst_155 = arith.constant 1.000000e+00 : f32
    %796 = vector.broadcast %cst_155 : f32 to vector<8x48xf32>
    %797 = arith.addf %795, %796 : vector<8x48xf32>
    %cst_156 = arith.constant 5.000000e-01 : f32
    %798 = vector.broadcast %cst_156 : f32 to vector<8x48xf32>
    %799 = arith.mulf %798, %797 : vector<8x48xf32>
    %800 = arith.mulf %788, %799 : vector<8x48xf32>
    %c3_157 = arith.constant 3 : index
    %801 = memref.load %arg7[%c3_157] : memref<4xf32, #tpu.memory_space<smem>>
    %802 = vector.broadcast %801 : f32 to vector<8x48xf32>
    %c3_158 = arith.constant 3 : index
    %803 = memref.load %arg9[%c3_158] : memref<4xf32, #tpu.memory_space<smem>>
    %804 = vector.broadcast %803 : f32 to vector<8x48xf32>
    %c36_159 = arith.constant 36 : index
    %805 = memref.load %arg6[%c36_159] : memref<48xf32, #tpu.memory_space<smem>>
    %806 = vector.broadcast %805 : f32 to vector<8x48xf32>
    %807 = arith.mulf %806, %462 : vector<8x48xf32>
    %808 = arith.addf %802, %807 : vector<8x48xf32>
    %c36_160 = arith.constant 36 : index
    %809 = memref.load %arg8[%c36_160] : memref<48xf32, #tpu.memory_space<smem>>
    %810 = vector.broadcast %809 : f32 to vector<8x48xf32>
    %811 = arith.mulf %810, %462 : vector<8x48xf32>
    %812 = arith.addf %804, %811 : vector<8x48xf32>
    %c37_161 = arith.constant 37 : index
    %813 = memref.load %arg6[%c37_161] : memref<48xf32, #tpu.memory_space<smem>>
    %814 = vector.broadcast %813 : f32 to vector<8x48xf32>
    %815 = arith.mulf %814, %136 : vector<8x48xf32>
    %816 = arith.addf %808, %815 : vector<8x48xf32>
    %c37_162 = arith.constant 37 : index
    %817 = memref.load %arg8[%c37_162] : memref<48xf32, #tpu.memory_space<smem>>
    %818 = vector.broadcast %817 : f32 to vector<8x48xf32>
    %819 = arith.mulf %818, %136 : vector<8x48xf32>
    %820 = arith.addf %812, %819 : vector<8x48xf32>
    %c38_163 = arith.constant 38 : index
    %821 = memref.load %arg6[%c38_163] : memref<48xf32, #tpu.memory_space<smem>>
    %822 = vector.broadcast %821 : f32 to vector<8x48xf32>
    %823 = arith.mulf %822, %464 : vector<8x48xf32>
    %824 = arith.addf %816, %823 : vector<8x48xf32>
    %c38_164 = arith.constant 38 : index
    %825 = memref.load %arg8[%c38_164] : memref<48xf32, #tpu.memory_space<smem>>
    %826 = vector.broadcast %825 : f32 to vector<8x48xf32>
    %827 = arith.mulf %826, %464 : vector<8x48xf32>
    %828 = arith.addf %820, %827 : vector<8x48xf32>
    %c39_165 = arith.constant 39 : index
    %829 = memref.load %arg6[%c39_165] : memref<48xf32, #tpu.memory_space<smem>>
    %830 = vector.broadcast %829 : f32 to vector<8x48xf32>
    %831 = arith.mulf %830, %466 : vector<8x48xf32>
    %832 = arith.addf %824, %831 : vector<8x48xf32>
    %c39_166 = arith.constant 39 : index
    %833 = memref.load %arg8[%c39_166] : memref<48xf32, #tpu.memory_space<smem>>
    %834 = vector.broadcast %833 : f32 to vector<8x48xf32>
    %835 = arith.mulf %834, %466 : vector<8x48xf32>
    %836 = arith.addf %828, %835 : vector<8x48xf32>
    %c40_167 = arith.constant 40 : index
    %837 = memref.load %arg6[%c40_167] : memref<48xf32, #tpu.memory_space<smem>>
    %838 = vector.broadcast %837 : f32 to vector<8x48xf32>
    %839 = arith.mulf %838, %244 : vector<8x48xf32>
    %840 = arith.addf %832, %839 : vector<8x48xf32>
    %c40_168 = arith.constant 40 : index
    %841 = memref.load %arg8[%c40_168] : memref<48xf32, #tpu.memory_space<smem>>
    %842 = vector.broadcast %841 : f32 to vector<8x48xf32>
    %843 = arith.mulf %842, %244 : vector<8x48xf32>
    %844 = arith.addf %836, %843 : vector<8x48xf32>
    %c41_169 = arith.constant 41 : index
    %845 = memref.load %arg6[%c41_169] : memref<48xf32, #tpu.memory_space<smem>>
    %846 = vector.broadcast %845 : f32 to vector<8x48xf32>
    %847 = arith.mulf %846, %468 : vector<8x48xf32>
    %848 = arith.addf %840, %847 : vector<8x48xf32>
    %c41_170 = arith.constant 41 : index
    %849 = memref.load %arg8[%c41_170] : memref<48xf32, #tpu.memory_space<smem>>
    %850 = vector.broadcast %849 : f32 to vector<8x48xf32>
    %851 = arith.mulf %850, %468 : vector<8x48xf32>
    %852 = arith.addf %844, %851 : vector<8x48xf32>
    %c42_171 = arith.constant 42 : index
    %853 = memref.load %arg6[%c42_171] : memref<48xf32, #tpu.memory_space<smem>>
    %854 = vector.broadcast %853 : f32 to vector<8x48xf32>
    %855 = arith.mulf %854, %470 : vector<8x48xf32>
    %856 = arith.addf %848, %855 : vector<8x48xf32>
    %c42_172 = arith.constant 42 : index
    %857 = memref.load %arg8[%c42_172] : memref<48xf32, #tpu.memory_space<smem>>
    %858 = vector.broadcast %857 : f32 to vector<8x48xf32>
    %859 = arith.mulf %858, %470 : vector<8x48xf32>
    %860 = arith.addf %852, %859 : vector<8x48xf32>
    %c43_173 = arith.constant 43 : index
    %861 = memref.load %arg6[%c43_173] : memref<48xf32, #tpu.memory_space<smem>>
    %862 = vector.broadcast %861 : f32 to vector<8x48xf32>
    %863 = arith.mulf %862, %352 : vector<8x48xf32>
    %864 = arith.addf %856, %863 : vector<8x48xf32>
    %c43_174 = arith.constant 43 : index
    %865 = memref.load %arg8[%c43_174] : memref<48xf32, #tpu.memory_space<smem>>
    %866 = vector.broadcast %865 : f32 to vector<8x48xf32>
    %867 = arith.mulf %866, %352 : vector<8x48xf32>
    %868 = arith.addf %860, %867 : vector<8x48xf32>
    %c44_175 = arith.constant 44 : index
    %869 = memref.load %arg6[%c44_175] : memref<48xf32, #tpu.memory_space<smem>>
    %870 = vector.broadcast %869 : f32 to vector<8x48xf32>
    %871 = arith.mulf %870, %472 : vector<8x48xf32>
    %872 = arith.addf %864, %871 : vector<8x48xf32>
    %c44_176 = arith.constant 44 : index
    %873 = memref.load %arg8[%c44_176] : memref<48xf32, #tpu.memory_space<smem>>
    %874 = vector.broadcast %873 : f32 to vector<8x48xf32>
    %875 = arith.mulf %874, %472 : vector<8x48xf32>
    %876 = arith.addf %868, %875 : vector<8x48xf32>
    %c45_177 = arith.constant 45 : index
    %877 = memref.load %arg6[%c45_177] : memref<48xf32, #tpu.memory_space<smem>>
    %878 = vector.broadcast %877 : f32 to vector<8x48xf32>
    %879 = arith.mulf %878, %474 : vector<8x48xf32>
    %880 = arith.addf %872, %879 : vector<8x48xf32>
    %c45_178 = arith.constant 45 : index
    %881 = memref.load %arg8[%c45_178] : memref<48xf32, #tpu.memory_space<smem>>
    %882 = vector.broadcast %881 : f32 to vector<8x48xf32>
    %883 = arith.mulf %882, %474 : vector<8x48xf32>
    %884 = arith.addf %876, %883 : vector<8x48xf32>
    %c46_179 = arith.constant 46 : index
    %885 = memref.load %arg6[%c46_179] : memref<48xf32, #tpu.memory_space<smem>>
    %886 = vector.broadcast %885 : f32 to vector<8x48xf32>
    %887 = arith.mulf %886, %460 : vector<8x48xf32>
    %888 = arith.addf %880, %887 : vector<8x48xf32>
    %c46_180 = arith.constant 46 : index
    %889 = memref.load %arg8[%c46_180] : memref<48xf32, #tpu.memory_space<smem>>
    %890 = vector.broadcast %889 : f32 to vector<8x48xf32>
    %891 = arith.mulf %890, %460 : vector<8x48xf32>
    %892 = arith.addf %884, %891 : vector<8x48xf32>
    %c47_181 = arith.constant 47 : index
    %893 = memref.load %arg6[%c47_181] : memref<48xf32, #tpu.memory_space<smem>>
    %894 = vector.broadcast %893 : f32 to vector<8x48xf32>
    %895 = arith.mulf %894, %476 : vector<8x48xf32>
    %896 = arith.addf %888, %895 : vector<8x48xf32>
    %c47_182 = arith.constant 47 : index
    %897 = memref.load %arg8[%c47_182] : memref<48xf32, #tpu.memory_space<smem>>
    %898 = vector.broadcast %897 : f32 to vector<8x48xf32>
    %899 = arith.mulf %898, %476 : vector<8x48xf32>
    %900 = arith.addf %892, %899 : vector<8x48xf32>
    %cst_183 = arith.constant 5.000000e-01 : f32
    %901 = vector.broadcast %cst_183 : f32 to vector<8x48xf32>
    %902 = arith.mulf %901, %900 : vector<8x48xf32>
    %903 = math.tanh %902 : vector<8x48xf32>
    %cst_184 = arith.constant 1.000000e+00 : f32
    %904 = vector.broadcast %cst_184 : f32 to vector<8x48xf32>
    %905 = arith.addf %903, %904 : vector<8x48xf32>
    %cst_185 = arith.constant 5.000000e-01 : f32
    %906 = vector.broadcast %cst_185 : f32 to vector<8x48xf32>
    %907 = arith.mulf %906, %905 : vector<8x48xf32>
    %908 = arith.mulf %896, %907 : vector<8x48xf32>
    %909 = arith.addf %6, %584 : vector<8x48xf32>
    %910 = arith.addf %8, %692 : vector<8x48xf32>
    %911 = arith.addf %10, %800 : vector<8x48xf32>
    %912 = arith.addf %12, %908 : vector<8x48xf32>
    %913 = vector.shape_cast %909 : vector<8x48xf32> to vector<8x1x48xf32>
    %914 = vector.shape_cast %910 : vector<8x48xf32> to vector<8x1x48xf32>
    %915 = vector.shape_cast %911 : vector<8x48xf32> to vector<8x1x48xf32>
    %916 = vector.shape_cast %912 : vector<8x48xf32> to vector<8x1x48xf32>
    %917 = tpu.concatenate %913, %914, %915, %916 in 1 : vector<8x1x48xf32>, vector<8x1x48xf32>, vector<8x1x48xf32>, vector<8x1x48xf32> -> vector<8x4x48xf32>
    %918 = arith.index_cast %2 : i32 to index
    %c0_186 = arith.constant 0 : index
    %c0_187 = arith.constant 0 : index
    %919 = vector.load %arg10[%918, %c0_186, %c0_187] : memref<8x4x48xf32, #tpu.memory_space<vmem>>, vector<8x4x48xf32>
    tpu.vector_store %arg10[%918, %c0_186, %c0_187], %917 {strides = array<i32>} : memref<8x4x48xf32, #tpu.memory_space<vmem>>, vector<8x4x48xf32>,
    %c1_i32 = arith.constant 1 : i32
    return
  }
  func.func @transform_0(%arg0: i32) -> (i32, i32, i32) {
    %c0_i32 = arith.constant 0 : i32
    %c0_i32_0 = arith.constant 0 : i32
    %c0_i32_1 = arith.constant 0 : i32
    return %arg0, %c0_i32, %c0_i32_0 : i32, i32, i32
  }
  func.func @transform_1(%arg0: i32) -> i32 {
    %c0_i32 = arith.constant 0 : i32
    %c0_i32_0 = arith.constant 0 : i32
    return %c0_i32 : i32
  }
  func.func @transform_2(%arg0: i32) -> i32 {
    %c0_i32 = arith.constant 0 : i32
    %c0_i32_0 = arith.constant 0 : i32
    return %c0_i32 : i32
  }
  func.func @transform_3(%arg0: i32) -> i32 {
    %c0_i32 = arith.constant 0 : i32
    %c0_i32_0 = arith.constant 0 : i32
    return %c0_i32 : i32
  }
  func.func @transform_4(%arg0: i32) -> i32 {
    %c0_i32 = arith.constant 0 : i32
    %c0_i32_0 = arith.constant 0 : i32
    return %c0_i32 : i32
  }
  func.func @transform_5(%arg0: i32) -> i32 {
    %c0_i32 = arith.constant 0 : i32
    %c0_i32_0 = arith.constant 0 : i32
    return %c0_i32 : i32
  }
  func.func @transform_6(%arg0: i32) -> i32 {
    %c0_i32 = arith.constant 0 : i32
    %c0_i32_0 = arith.constant 0 : i32
    return %c0_i32 : i32
  }
  func.func @transform_7(%arg0: i32) -> i32 {
    %c0_i32 = arith.constant 0 : i32
    %c0_i32_0 = arith.constant 0 : i32
    return %c0_i32 : i32
  }
  func.func @transform_8(%arg0: i32) -> i32 {
    %c0_i32 = arith.constant 0 : i32
    %c0_i32_0 = arith.constant 0 : i32
    return %c0_i32 : i32
  }
  func.func @transform_9(%arg0: i32) -> (i32, i32, i32) {
    %c0_i32 = arith.constant 0 : i32
    %c0_i32_0 = arith.constant 0 : i32
    %c0_i32_1 = arith.constant 0 : i32
    return %arg0, %c0_i32, %c0_i32_0 : i32, i32, i32
  }
}

</mosaic_0001>

<bundles_post_ra>
// kernel: tpu_custom_call.1
= control target key start
LH: loop header
LB: loop body
LE: loop exit
PB: predicated region body
PF: predicated region fallthrough
CT: control target
= control target key end

     0   :  { %s5451_s0 = inlined_call_operand.hbm [shape: f32[8,4,48], index: 0, kind: input, shape index: {}]   ;;  %s5452_s1 = inlined_call_operand.vmem [shape: f32[48], index: 1, kind: input, shape index: {}]   ;;  %s5453_s2 = inlined_call_operand.vmem [shape: f32[4], index: 2, kind: input, shape index: {}]   ;;  %s5454_s3 = inlined_call_operand.vmem [shape: f32[48], index: 3, kind: input, shape index: {}]   ;;  %s5455_s4 = inlined_call_operand.vmem [shape: f32[4], index: 4, kind: input, shape index: {}]   ;;  %s5456_s5 = inlined_call_operand.vmem [shape: f32[48], index: 5, kind: input, shape index: {}]   ;;  %s5457_s6 = inlined_call_operand.vmem [shape: f32[4], index: 6, kind: input, shape index: {}]   ;;  %s5458_s7 = inlined_call_operand.vmem [shape: f32[48], index: 7, kind: input, shape index: {}]   ;;  %s5459_s8 = inlined_call_operand.vmem [shape: f32[4], index: 8, kind: input, shape index: {}]   ;;  %s5460_s9 = inlined_call_operand.hbm [shape: f32[8,4,48], index: 9, kind: output, shape index: {}]  }
   0x1   :  { %5588 = sst [smem:[#allocation100_spill]] %s5460_s9 }
   0x2   :  { %14 = vsyncpa [#allocation3], 0 }
   0x3   :  { %15 = vsyncpa [#allocation5], 0 }
   0x4   :  { %16 = vsyncpa [#allocation8], 0 }
   0x5   :  { %17 = vsyncpa [#allocation11], 0 }
   0x6   :  { %18 = vsyncpa [#allocation14], 0 }
   0x7   :  { %19 = vsyncpa [#allocation17], 0  ;;  %s49_s11 = sshll.u32 %s5453_s2, 4  ;;  %s50_s11 = int_to_ptr.vmem [resolvable:$true] %s49_s11 }
   0x8   :  { %20 = vsyncpa [#allocation4], 0  ;;  %s69_s14 = sshll.u32 %s5455_s4, 4  ;;  %s2701_s15 = scalar_lea.vmem %s50_s11, 16  ;;  %s70_s14 = int_to_ptr.vmem [resolvable:$true] %s69_s14 }
   0x9   :  { %p2702_p0 = scmp.ne.s32.totalorder %s50_s11, %s2701_s15  ;;  %p2706_p1 = scmp.lt.s32.totalorder %s50_s11, %s50_s11 }
   0xa   :  { %p2707_p2 = scmp.lt.s32.totalorder %s2701_s15, %s2701_s15 }
   0xc   :  { %p2708_p3 = por %p2707_p2, %p2706_p1 }
   0xe   :  { %p2709_p4 = pnand %p2708_p3, %p2702_p0 }
  0x10   :  { %2712 = shalt.err (!%p2709_p4)
}
  0x11   :  { %s2855_s16 = smov [#allocation7]   ;;  %s2713_s17 = scalar_lea.vmem %s70_s14, 16 }
  0x12   :  { %52 = dma.vmem_to_smem %s50_s11, 16, %s2855_s16, [#allocation8]  }
  0x13   :  { %p2714_p5 = scmp.ne.s32.totalorder %s70_s14, %s2713_s17  ;;  %p2718_p6 = scmp.lt.s32.totalorder %s70_s14, %s70_s14 }
  0x14   :  { %p2719_p7 = scmp.lt.s32.totalorder %s2713_s17, %s2713_s17 }
  0x16   :  { %p2720_p8 = por %p2719_p7, %p2718_p6 }
  0x18   :  { %p2721_p9 = pnand %p2720_p8, %p2714_p5 }
  0x1a   :  { %2724 = shalt.err (!%p2721_p9)
}
  0x1b   :  { %s2856_s2 = smov [#allocation10]   ;;  %s89_s19 = sshll.u32 %s5457_s6, 4  ;;  %s90_s19 = int_to_ptr.vmem [resolvable:$true] %s89_s19 }
  0x1c   :  { %72 = dma.vmem_to_smem %s70_s14, 16, %s2856_s2, [#allocation11]  }
  0x1d   :  { %s2725_s20 = scalar_lea.vmem %s90_s19, 16  ;;  %p2730_p11 = scmp.lt.s32.totalorder %s90_s19, %s90_s19 }
  0x1e   :  { %p2726_p10 = scmp.ne.s32.totalorder %s90_s19, %s2725_s20  ;;  %p2731_p12 = scmp.lt.s32.totalorder %s2725_s20, %s2725_s20 }
  0x20   :  { %p2732_p13 = por %p2731_p12, %p2730_p11 }
  0x22   :  { %p2733_p0 = pnand %p2732_p13, %p2726_p10 }
  0x24   :  { %2736 = shalt.err (!%p2733_p0)
}
  0x25   :  { %s2857_s21 = smov [#allocation13]   ;;  %s2858_s22 = smov [#allocation2]  }
  0x26   :  { %92 = dma.vmem_to_smem %s90_s19, 16, %s2857_s21, [#allocation14]  }
  0x27   :  { %s26_s23 = sshll.u32 %s2858_s22, 4  ;;  %s2737_s26 = scalar_lea.hbm %s5451_s0, 512  ;;  %s27_s23 = int_to_ptr.vmem [resolvable:$true] %s26_s23 }
  0x28   :  { %p2738_p1 = scmp.ne.s32.totalorder %s5451_s0, %s2737_s26  ;;  %p2741_p2 = scmp.lt.u32.totalorder %s2737_s26, %s5451_s0 }
  0x2a   :  { %p2743_p3 = pnand %p2741_p2, %p2738_p1 }
  0x2c   :  { %2746 = shalt.err (!%p2743_p3)
}
  0x2d   :  { %s2747_s30 = scalar_lea.vmem %s27_s23, 512  ;;  %p2752_p5 = scmp.lt.s32.totalorder %s27_s23, %s27_s23 }
  0x2e   :  { %p2748_p4 = scmp.ne.s32.totalorder %s27_s23, %s2747_s30  ;;  %p2753_p6 = scmp.lt.s32.totalorder %s2747_s30, %s2747_s30 }
  0x30   :  { %p2754_p7 = por %p2753_p6, %p2752_p5 }
  0x32   :  { %p2755_p8 = pnand %p2754_p7, %p2748_p4 }
  0x34   :  { %2758 = shalt.err (!%p2755_p8)
}
  0x35   :  { %s5461_s10 = smov 64   ;;  %s5462_s11 = smov 4  }
  0x36   :  { %32 = dma.hbm_to_vmem [thread:$0]  %s5451_s0, 512, %s27_s23, [#allocation3], %s5461_s10, %s5461_s10, %s5462_s11  }
  0x37   :  { %s39_s16 = sshll.u32 %s5452_s1, 4  ;;  %s59_s4 = sshll.u32 %s5454_s3, 4  ;;  %s40_s16 = int_to_ptr.vmem [resolvable:$true] %s39_s16  ;;  %s60_s4 = int_to_ptr.vmem [resolvable:$true] %s59_s4 }
  0x38   :  { %s2759_s18 = scalar_lea.vmem %s40_s16, 16  ;;  %p2764_p10 = scmp.lt.s32.totalorder %s40_s16, %s40_s16 }
  0x39   :  { %p2760_p9 = scmp.ne.s32.totalorder %s40_s16, %s2759_s18  ;;  %p2765_p11 = scmp.lt.s32.totalorder %s2759_s18, %s2759_s18 }
  0x3b   :  { %p2766_p12 = por %p2765_p11, %p2764_p10 }
  0x3d   :  { %p2767_p13 = pnand %p2766_p12, %p2760_p9 }
  0x3f   :  { %2770 = shalt.err (!%p2767_p13)
}
  0x40   :  { %s2861_s19 = smov [#allocation6]   ;;  %s2771_s0 = scalar_lea.vmem %s60_s4, 16 }
  0x41   :  { %42 = dma.vmem_to_smem %s40_s16, 16, %s2861_s19, [#allocation5]  }
  0x42   :  { %p2772_p0 = scmp.ne.s32.totalorder %s60_s4, %s2771_s0  ;;  %p2776_p1 = scmp.lt.s32.totalorder %s60_s4, %s60_s4 }
  0x43   :  { %p2777_p2 = scmp.lt.s32.totalorder %s2771_s0, %s2771_s0 }
  0x45   :  { %p2778_p3 = por %p2777_p2, %p2776_p1 }
  0x47   :  { %p2779_p4 = pnand %p2778_p3, %p2772_p0 }
  0x49   :  { %2782 = shalt.err (!%p2779_p4)
}
  0x4a   :  { %s2862_s1 = smov [#allocation9]   ;;  %s79_s21 = sshll.u32 %s5456_s5, 4  ;;  %s80_s21 = int_to_ptr.vmem [resolvable:$true] %s79_s21 }
  0x4b   :  { %62 = dma.vmem_to_smem %s60_s4, 16, %s2862_s1, [#allocation8]  }
  0x4c   :  { %s99_s24 = sshll.u32 %s5458_s7, 4  ;;  %s2783_s25 = scalar_lea.vmem %s80_s21, 16  ;;  %s100_s24 = int_to_ptr.vmem [resolvable:$true] %s99_s24 }
  0x4d   :  { %p2784_p5 = scmp.ne.s32.totalorder %s80_s21, %s2783_s25  ;;  %p2788_p6 = scmp.lt.s32.totalorder %s80_s21, %s80_s21 }
  0x4e   :  { %p2789_p7 = scmp.lt.s32.totalorder %s2783_s25, %s2783_s25 }
  0x50   :  { %p2790_p8 = por %p2789_p7, %p2788_p6 }
  0x52   :  { %p2791_p9 = pnand %p2790_p8, %p2784_p5 }
  0x54   :  { %2794 = shalt.err (!%p2791_p9)
}
  0x55   :  { %s2863_s26 = smov [#allocation12]   ;;  %s2795_s27 = scalar_lea.vmem %s100_s24, 16 }
  0x56   :  { %82 = dma.vmem_to_smem %s80_s21, 16, %s2863_s26, [#allocation11]  }
  0x57   :  { %p2796_p10 = scmp.ne.s32.totalorder %s100_s24, %s2795_s27  ;;  %p2800_p11 = scmp.lt.s32.totalorder %s100_s24, %s100_s24 }
  0x58   :  { %p2801_p12 = scmp.lt.s32.totalorder %s2795_s27, %s2795_s27 }
  0x5a   :  { %p2802_p13 = por %p2801_p12, %p2800_p11 }
  0x5c   :  { %p2803_p0 = pnand %p2802_p13, %p2796_p10 }
  0x5e   :  { %2806 = shalt.err (!%p2803_p0)
}
  0x5f   :  { %s2864_s5 = smov [#allocation15]   ;;  %s109_s6 = sshll.u32 %s5459_s8, 4  ;;  %s110_s6 = int_to_ptr.vmem [resolvable:$true] %s109_s6 }
  0x60   :  { %102 = dma.vmem_to_smem %s100_s24, 16, %s2864_s5, [#allocation14]  }
  0x61   :  { %s2807_s29 = scalar_lea.vmem %s110_s6, 16  ;;  %p2812_p2 = scmp.lt.s32.totalorder %s110_s6, %s110_s6 }
  0x62   :  { %p2808_p1 = scmp.ne.s32.totalorder %s110_s6, %s2807_s29  ;;  %p2813_p3 = scmp.lt.s32.totalorder %s2807_s29, %s2807_s29 }
  0x64   :  { %p2814_p4 = por %p2813_p3, %p2812_p2 }
  0x66   :  { %p2815_p5 = pnand %p2814_p4, %p2808_p1 }
  0x68   :  { %2818 = shalt.err (!%p2815_p5)
}
  0x69   :  { %s2865_s30 = smov [#allocation16]  }
  0x6a   :  { %112 = dma.vmem_to_smem %s110_s6, 16, %s2865_s30, [#allocation17]  }
  0x6b   :  { %2841 = dma.done.wait [#allocation3], 512  }
  0x6c   :  { %2842 = vsyncadd [#allocation3], 4294966784 }
  0x6d   :  { %2843 = dma.done.wait [#allocation5], 16  }
  0x6e   :  { %2844 = vsyncadd [#allocation5], 4294967280 }
  0x6f   :  { %2845 = dma.done.wait [#allocation8], 32  }
  0x70   :  { %2846 = vsyncadd [#allocation8], 4294967264 }
  0x71   :  { %2847 = dma.done.wait [#allocation11], 32  }
  0x72   :  { %2848 = vsyncadd [#allocation11], 4294967264 }
  0x73   :  { %2849 = dma.done.wait [#allocation14], 32  }
  0x74   :  { %2850 = vsyncadd [#allocation14], 4294967264 }
  0x75   :  { %2851 = dma.done.wait [#allocation17], 16  }
  0x76   :  { %2852 = vsyncadd [#allocation17], 4294967280 }
  0x77   :  { %140 = sfence }
  0x78   :  { %v2958_v0 = vld [vmem:[#allocation2] sm:$0xf]  ;;  %v2960_v1 = vld [vmem:[#allocation2 + $0x4] sm:$0xf]  ;;  %v2962_v2 = vld [vmem:[#allocation2 + $0x8] sm:$0xf] }
  0x79   :  { %v2964_v3 = vld [vmem:[#allocation2 + $0xc] sm:$0xf]  ;;  %v2966_v4 = vld [vmem:[#allocation2 + $0x10] sm:$0xf]  ;;  %v2968_v5 = vld [vmem:[#allocation2 + $0x14] sm:$0xf] }
  0x7a   :  { %v2970_v6 = vld [vmem:[#allocation2 + $0x18] sm:$0xf]  ;;  %v2973_v7 = vrot.slane %v2960_v1, 7  ;;  %v2976_v8 = vrot.slane %v2962_v2, 6  ;;  %vm163_vm0 = vcmask 1042434   ;;  %v2979_v9 = vrot.slane %v2964_v3, 5 }
  0x7b   :  { %vm166_vm1 = vcmask 1043459   ;;  %v2982_v10 = vrot.slane %v2966_v4, 4  ;;  %vm169_vm2 = vcmask 1044484   ;;  %v2985_v11 = vrot.slane %v2968_v5, 3  ;;  %v2990_v13 = vld [vmem:[#allocation2 + $0x1c] sm:$0xf] }
  0x7c   :  { %vm172_vm3 = vcmask 1045509   ;;  %v2988_v12 = vrot.slane %v2970_v6, 2  ;;  %vm175_vm4 = vcmask 1046534   ;;  %vm178_vm5 = vcmask 1047559   ;;  %s5465_s8 = smov 127   ;;  %s5463_s12 = smov 1  }
  0x7d   :  { %v208_v14 = vsel %vm163_vm0, %v2973_v7, %v2958_v0  ;;  %vm160_vm6 = vcmask 1041409   ;;  %v2996_v15 = vrot.slane %v2990_v13, 1  ;;  %v190_v16 = vrot.slane %v2958_v0, 1  ;;  %s3100_s13 = sld [smem:[#allocation6 + $0x5]]  ;;  %s3107_s15 = sld [smem:[#allocation6 + $0x11]] }
  0x7e   :  { %v209_v17 = vsel %vm166_vm1, %v2976_v8, %v208_v14  ;;  %v161_v18 = vsel %vm160_vm6, %v2973_v7, %v2958_v0  ;;  %v192_v19 = vrot.slane %v2962_v2, 7  ;;  %v194_v20 = vrot.slane %v2964_v3, 6  ;;  %s3102_s14 = sld [smem:[#allocation9 + $0x5]]  ;;  %s3109_s16 = sld [smem:[#allocation9 + $0x11]] }
  0x7f   :  { %v210_v21 = vsel %vm169_vm2, %v2979_v9, %v209_v17  ;;  %v164_v22 = vsel %vm163_vm0, %v2976_v8, %v161_v18  ;;  %v191_v23 = vsel %vm160_vm6, %v2960_v1, %v190_v16  ;;  %v196_v24 = vrot.slane %v2966_v4, 5  ;;  %s3112_s17 = sld [smem:[#allocation6 + $0x1d]]  ;;  %s3117_s4 = sld [smem:[#allocation6 + $0x29]] }
  0x80   :  { %v211_v25 = vsel %vm172_vm3, %v2982_v10, %v210_v21  ;;  %v167_v26 = vsel %vm166_vm1, %v2979_v9, %v164_v22  ;;  %v193_v27 = vsel %vm163_vm0, %v192_v19, %v191_v23  ;;  %v198_v28 = vrot.slane %v2968_v5, 4  ;;  %s3114_s2 = sld [smem:[#allocation9 + $0x1d]]  ;;  %s2448_s18 = sld [smem:[#allocation6 + $0x1]] }
  0x81   :  { %v212_v29 = vsel %vm175_vm4, %v2985_v11, %v211_v25  ;;  %v170_v30 = vsel %vm169_vm2, %v2982_v10, %v167_v26  ;;  %v195_v31 = vsel %vm166_vm1, %v194_v20, %v193_v27  ;;  %v200_v32 = vrot.slane %v2970_v6, 3  ;;  %s3121_s19 = sld [smem:[#allocation9 + $0x29]]  ;;  %s3123_s0 = sld [smem:[#allocation7]] }
  0x82   :  { %v213_v33 = vsel %vm178_vm5, %v2988_v12, %v212_v29  ;;  %v173_v34 = vsel %vm172_vm3, %v2985_v11, %v170_v30  ;;  %v197_v35 = vsel %vm169_vm2, %v196_v24, %v195_v31  ;;  %v202_v36 = vrot.slane %v2990_v13, 2  ;;  %s3125_s1 = sld [smem:[#allocation10]]  ;;  %s3131_s21 = sld [smem:[#allocation7 + $0x1]] }
  0x83   :  { %214 = vrot.lane.b32.xlu1 %v213_v33, %s5465_s8  ;;  %v176_v37 = vsel %vm175_vm4, %v2988_v12, %v173_v34  ;;  %v199_v38 = vsel %vm172_vm3, %v198_v28, %v197_v35  ;;  %v222_v39 = vrot.slane %v2958_v0, 2  ;;  %v223_v40 = vrot.slane %v2960_v1, 1  ;;  %5590 = sst [smem:[#allocation27_spill]] %s3107_s15  ;;  %s3127_s3 = sld [smem:[#allocation6]] }
  0x84   :  { %v179_v41 = vsel %vm178_vm5, %v2996_v15, %v176_v37  ;;  %v201_v42 = vsel %vm175_vm4, %v200_v32, %v199_v38  ;;  %v226_v43 = vrot.slane %v2964_v3, 7  ;;  %v228_v44 = vrot.slane %v2966_v4, 6  ;;  %5589 = sst [smem:[#allocation26_spill]] %s3102_s14  ;;  %s3134_s22 = sld [smem:[#allocation10 + $0x1]] }
  0x85   :  { %180 = vrot.lane.b32.xlu0 %v179_v41, %s5463_s12  ;;  %v203_v45 = vsel %vm178_vm5, %v202_v36, %v201_v42  ;;  %v224_v46 = vsel %vm160_vm6, %v223_v40, %v222_v39  ;;  %v230_v47 = vrot.slane %v2968_v5, 5  ;;  %v232_v49 = vrot.slane %v2970_v6, 4  ;;  %s3129_s20 = sld [smem:[#allocation9]]  ;;  %s3136_s23 = sld [smem:[#allocation6 + $0xc]] }
  0x86   :  { %v225_v48 = vsel %vm163_vm0, %v2962_v2, %v224_v46  ;;  %v234_v50 = vrot.slane %v2990_v13, 3  ;;  %v240_v51 = vsel %vm166_vm1, %v2973_v7, %v2958_v0  ;;  %v254_v54 = vrot.slane %v2958_v0, 3  ;;  %s3138_s24 = sld [smem:[#allocation9 + $0xc]]  ;;  %s3140_s25 = sld [smem:[#allocation7 + $0x2]] }
  0x87   :  { %204 = vrot.lane.b32.xlu1 %v203_v45, %s5463_s12  ;;  %v227_v52 = vsel %vm166_vm1, %v226_v43, %v225_v48  ;;  %v241_v53 = vsel %vm169_vm2, %v2976_v8, %v240_v51  ;;  %v255_v55 = vrot.slane %v2960_v1, 2  ;;  %v257_v58 = vrot.slane %v2962_v2, 1  ;;  %5591 = sst [smem:[#allocation28_spill]] %s3123_s0  ;;  %s3144_s27 = sld [smem:[#allocation6 + $0x18]] }
  0x88   :  { %v229_v56 = vsel %vm169_vm2, %v228_v44, %v227_v52  ;;  %v242_v57 = vsel %vm172_vm3, %v2979_v9, %v241_v53  ;;  %v260_v59 = vrot.slane %v2966_v4, 7  ;;  %v262_v62 = vrot.slane %v2968_v5, 6  ;;  %5592 = sst [smem:[#allocation29_spill]] %s3125_s1  ;;  %s3142_s26 = sld [smem:[#allocation10 + $0x2]] }
  0x89   :  { %185 = vrot.lane.b32.xlu0 %v179_v41, %s5465_s8  ;;  %v231_v60 = vsel %vm172_vm3, %v230_v47, %v229_v56  ;;  %v256_v61 = vsel %vm160_vm6, %v255_v55, %v254_v54  ;;  %v243_v14 = vsel %vm175_vm4, %v2982_v10, %v242_v57  ;;  %v264_v19 = vrot.slane %v2970_v6, 5  ;;  %s3146_s5 = sld [smem:[#allocation9 + $0x18]]  ;;  %s3148_s7 = sld [smem:[#allocation7 + $0x3]] }
  0x8a   :  { %v233_v63 = vsel %vm175_vm4, %v232_v49, %v231_v60  ;;  %v258_v16 = vsel %vm163_vm0, %v257_v58, %v256_v61  ;;  %v272_v20 = vsel %vm169_vm2, %v2973_v7, %v2958_v0  ;;  %v245_v23 = vsel %vm160_vm6, %v2996_v15, %v2988_v12  ;;  %5593 = sst [smem:[#allocation30_spill]] %s3134_s22  ;;  %s3150_s28 = sld [smem:[#allocation10 + $0x3]] }
  0x8b   :  { %v235_v17 = vsel %vm178_vm5, %v234_v50, %v233_v63  ;;  %v259_v18 = vsel %vm166_vm1, %v2964_v3, %v258_v16  ;;  %v273_v22 = vsel %vm172_vm3, %v2976_v8, %v272_v20  ;;  %v244_v25 = vsel %vm178_vm5, %v2985_v11, %v243_v14  ;;  %s3152_s6 = sld [smem:[#allocation6 + $0x24]]  ;;  %s3156_s30 = sld [smem:[#allocation6 + $0x3]] }
  0x8c   :  { %236 = vrot.lane.b32.xlu1 %v235_v17, %s5463_s12  ;;  %v261_v21 = vsel %vm169_vm2, %v260_v59, %v259_v18  ;;  %v266_v7 = vrot.slane %v2990_v13, 4  ;;  %v274_v26 = vsel %vm175_vm4, %v2979_v9, %v273_v22  ;;  %v276_v29 = vsel %vm160_vm6, %v2988_v12, %v2985_v11  ;;  %s3154_s29 = sld [smem:[#allocation9 + $0x24]]  ;;  %s3158_s10 = sld [smem:[#allocation9 + $0x3]] }
  0x8d   :  { %216 = vrot.lane.b32.xlu0 %v2996_v15, %s5465_s8  ;;  %v263_v24 = vsel %vm172_vm3, %v262_v62, %v261_v21  ;;  %v275_v8 = vsel %vm178_vm5, %v2982_v10, %v274_v26  ;;  %v277_v9 = vsel %vm163_vm0, %v2996_v15, %v276_v29  ;;  %v299_v10 = vstv %s2448_s18  ;;  %s3160_s11 = sld [smem:[#allocation6 + $0xf]]  ;;  %s3167_s18 = sld [smem:[#allocation9 + $0x1]] }
  0x8e   :  { %v265_v27 = vsel %vm175_vm4, %v264_v19, %v263_v24  ;;  %v5498_v11 = vstv %s3100_s13  ;;  %v5497_v12 = vstv %s3102_s14  ;;  %v301_v15 = vmul.f32 %v299_v10, %v2960_v1  ;;  %s3175_s9 = sld [smem:[#allocation9 + $0x1b]]  ;;  %s3181_s14 = sld [smem:[#allocation6 + $0x27]] }
  0x8f   :  { %v267_v28 = vsel %vm178_vm5, %v266_v7, %v265_v27  ;;  %v5496_v30 = vstv %s3107_s15  ;;  %v5495_v31 = vstv %s3109_s16  ;;  %v5494_v32 = vstv %s3112_s17  ;;  %s3183_s15 = sld [smem:[#allocation6 + $0x4]]  ;;  %s3191_s0 = sld [smem:[#allocation9 + $0x27]] }
  0x90   :  { %248 = vrot.lane.b32.xlu1 %v245_v23, %s5465_s8  ;;  %v5493_v33 = vstv %s3114_s2  ;;  %v5492_v34 = vstv %s3117_s4  ;;  %v5491_v35 = vstv %s3121_s19  ;;  %v302_v41 = vmul.f32 %v299_v10, %v2962_v2  ;;  %s3194_s1 = sld [smem:[#allocation9 + $0x4]]  ;;  %s3204_s22 = sld [smem:[#allocation6 + $0xd]] }
  0x91   :  { %246 = vrot.lane.b32.xlu0 %v244_v25, %s5465_s8  ;;  %5594 = sst [smem:[#allocation31_spill]] %s3156_s30  ;;  %v291_v38 = vstv %s3127_s3  ;;  %v295_v39 = vstv %s3129_s20  ;;  %v681_v43 = vstv %s3136_s23  ;;  %v300_v44 = vmul.f32 %v299_v10, %v2958_v0  ;;  %s3694_s30 = sld [smem:[#allocation6 + $0x2a]] }
  0x92   :  { %5595 = sst [smem:[#allocation32_spill]] %s3158_s10  ;;  %v316_v45 = vrot.slane %v301_v15, 7  ;;  %v303_v53 = vmul.f32 %v299_v10, %v2964_v3  ;;  %v318_v57 = vrot.slane %v302_v41, 6  ;;  %v304_v14 = vmul.f32 %v299_v10, %v2966_v4  ;;  %s5615_s3 = sld [smem:[#allocation30_spill]] }
  0x93   :  { %5596 = sst [smem:[#allocation33_spill]] %s3160_s11  ;;  %v333_v61 = vstv %s3167_s18  ;;  %v305_v16 = vmul.f32 %v299_v10, %v2968_v5  ;;  %v306_v21 = vmul.f32 %v299_v10, %v2970_v6  ;;  %v3224_v22 = vmul.f32 %v299_v10, %v2990_v13  ;;  %s3311_s18 = sld [smem:[#allocation6 + $0x10]] }
  0x94   :  { %278 = vrot.lane.b32.xlu1 %v275_v8, %s5465_s8  ;;  %5599 = sst [smem:[#allocation36_spill]] %s3175_s9  ;;  %v317_v60 = vsel %vm160_vm6, %v316_v45, %v300_v44  ;;  %v320_v19 = vrot.slane %v303_v53, 5  ;;  %v335_v24 = vmul.f32 %v333_v61, %v2960_v1  ;;  %v334_v7 = vmul.f32 %v333_v61, %v2958_v0  ;;  %s3351_s9 = sld [smem:[#allocation6 + $0xe]] }
  0x95   :  { %268 = vrot.lane.b32.xlu0 %v267_v28, %s5463_s12  ;;  %s3164_s12 = sld [smem:[#allocation9 + $0xf]]  ;;  %5600 = sst [smem:[#allocation37_spill]] %s3181_s14  ;;  %v3220_v20 = vstv %s3183_s15  ;;  %v319_v23 = vsel %vm163_vm0, %v318_v57, %v317_v60  ;;  %v336_v26 = vmul.f32 %v333_v61, %v2962_v2  ;;  %v322_v8 = vrot.slane %v304_v14, 4 }
  0x96   :  { %5601 = sst [smem:[#allocation38_spill]] %s3191_s0  ;;  %v3232_v27 = vstv %s3194_s1  ;;  %v324_v28 = vrot.slane %v305_v16, 3  ;;  %v337_v29 = vmul.f32 %v333_v61, %v2964_v3  ;;  %v321_v10 = vsel %vm166_vm1, %v320_v19, %v319_v23  ;;  %s3256_s15 = sld [smem:[#allocation9 + $0xd]] }
  0x97   :  { %v338_v15 = vmul.f32 %v333_v61, %v2966_v4  ;;  %v3240_v41 = vmul.f32 %v333_v61, %v2968_v5  ;;  %v3243_v44 = vstv %s3204_s22  ;;  %v326_v45 = vrot.slane %v306_v21, 2  ;;  %s3264_s1 = sld [smem:[#allocation6 + $0x2]]  ;;  %s3337_s0 = sld [smem:[#allocation6 + $0x19]] }
  0x98   :  { %v328_v53 = vrot.slane %v3224_v22, 1  ;;  %v350_v57 = vrot.slane %v335_v24, 7  ;;  %v418_v60 = vmul.f32 %v3232_v27, %v2958_v0  ;;  %v3249_v14 = vmul.f32 %v333_v61, %v2970_v6  ;;  %s3275_s22 = sld [smem:[#allocation9 + $0x2]]  ;;  %s3345_s14 = sld [smem:[#allocation9 + $0x19]] }
  0x99   :  { %280 = vrot.lane.b32.xlu0 %v277_v9, %s5465_s8  ;;  %s3173_s8 = sld [smem:[#allocation6 + $0x1b]]  ;;  %v384_v9 = vmul.f32 %v3220_v20, %v2958_v0  ;;  %v3252_v16 = vmul.f32 %v333_v61, %v2990_v13  ;;  %v352_v19 = vrot.slane %v336_v26, 6  ;;  %v386_v23 = vmul.f32 %v3220_v20, %v2962_v2  ;;  %s3684_s11 = sld [smem:[#allocation6 + $0x1e]] }
  0x9a   :  { %v323_v21 = vsel %vm169_vm2, %v322_v8, %v321_v10  ;;  %v385_v24 = vmul.f32 %v3220_v20, %v2960_v1  ;;  %v691_v18 = vmul.f32 %v3243_v44, %v2960_v1  ;;  %v354_v17 = vrot.slane %v337_v29, 5  ;;  %5604 = sst [smem:[#allocation41_spill]] %s3351_s9  ;;  %s3692_s10 = sld [smem:[#allocation9 + $0x1e]] }
  0x9b   :  { %5597 = sst [smem:[#allocation34_spill]] %s3164_s12  ;;  %v400_v25 = vrot.slane %v384_v9, 1  ;;  %v356_v63 = vrot.slane %v338_v15, 4  ;;  %v358_v61 = vrot.slane %v3240_v41, 3  ;;  %v420_v26 = vmul.f32 %v3232_v27, %v2962_v2  ;;  %s3503_s12 = sld [smem:[#allocation9 + $0x1a]] }
  0x9c   :  { %v351_v62 = vsel %vm160_vm6, %v350_v57, %v334_v7  ;;  %v387_v8 = vmul.f32 %v3220_v20, %v2964_v3  ;;  %v419_v9 = vmul.f32 %v3232_v27, %v2960_v1  ;;  %v434_v10 = vrot.slane %v418_v60, 1  ;;  %s3703_s9 = sld [smem:[#allocation9 + $0x2a]] }
  0x9d   :  { %5602 = sst [smem:[#allocation39_spill]] %s3264_s1  ;;  %v325_v59 = vsel %vm172_vm3, %v324_v28, %v323_v21  ;;  %v360_v29 = vrot.slane %v3249_v14, 2  ;;  %v402_v15 = vrot.slane %v386_v23, 7  ;;  %v692_v41 = vmul.f32 %v3243_v44, %v2962_v2  ;;  %s5611_s1 = sld [smem:[#allocation27_spill]] }
  0x9e   :  { %5603 = sst [smem:[#allocation40_spill]] %s3275_s22  ;;  %v401_v7 = vsel %vm160_vm6, %v385_v24, %v400_v25  ;;  %v421_v57 = vmul.f32 %v3232_v27, %v2964_v3  ;;  %v690_v58 = vmul.f32 %v3243_v44, %v2958_v0  ;;  %v706_v60 = vrot.slane %v691_v18, 7  ;;  %s5610_s22 = sld [smem:[#allocation26_spill]] }
  0x9f   :  { %5598 = sst [smem:[#allocation35_spill]] %s3173_s8  ;;  %v353_v28 = vsel %vm163_vm0, %v352_v19, %v351_v62  ;;  %v362_v21 = vrot.slane %v3252_v16, 1  ;;  %v388_v23 = vmul.f32 %v3220_v20, %v2966_v4  ;;  %v436_v56 = vrot.slane %v420_v26, 7  ;;  %s3496_s8 = sld [smem:[#allocation9 + $0x25]] }
  0xa0   :  { %v327_v52 = vsel %vm175_vm4, %v326_v45, %v325_v59  ;;  %v404_v51 = vrot.slane %v387_v8, 6  ;;  %v435_v25 = vsel %vm160_vm6, %v419_v9, %v434_v10  ;;  %v693_v24 = vmul.f32 %v3243_v44, %v2964_v3  ;;  %5609 = sst [smem:[#allocation46_spill]] %s3684_s11  ;;  %s5613_s11 = sld [smem:[#allocation29_spill]] }
  0xa1   :  { %v403_v48 = vsel %vm163_vm0, %v402_v15, %v401_v7  ;;  %v422_v62 = vmul.f32 %v3232_v27, %v2966_v4  ;;  %v708_v18 = vrot.slane %v692_v41, 6  ;;  %v3296_v19 = vstv %s3256_s15  ;;  %s3335_s15 = sld [smem:[#allocation9 + $0x10]]  ;;  %5607 = sst [smem:[#allocation44_spill]] %s3503_s12 }
  0xa2   :  { %v355_v47 = vsel %vm166_vm1, %v354_v17, %v353_v28  ;;  %v389_v59 = vmul.f32 %v3220_v20, %v2968_v5  ;;  %v438_v45 = vrot.slane %v421_v57, 6  ;;  %v707_v26 = vsel %vm160_vm6, %v706_v60, %v690_v58  ;;  %s3676_s12 = sld [smem:[#allocation6 + $0x12]]  ;;  %s5623_s20 = sld [smem:[#allocation39_spill]] }
  0xa3   :  { %v406_v9 = vrot.slane %v388_v23, 5  ;;  %v437_v10 = vsel %vm163_vm0, %v436_v56, %v435_v25  ;;  %v694_v15 = vmul.f32 %v3243_v44, %v2966_v4  ;;  %v405_v41 = vsel %vm166_vm1, %v404_v51, %v403_v48  ;;  %s5624_s23 = sld [smem:[#allocation40_spill]] }
  0xa4   :  { %v423_v7 = vmul.f32 %v3232_v27, %v2968_v5  ;;  %v710_v42 = vrot.slane %v693_v24, 5  ;;  %v725_v17 = vmul.f32 %v3296_v19, %v2960_v1  ;;  %v357_v58 = vsel %vm169_vm2, %v356_v63, %v355_v47 }
  0xa5   :  { %v440_v60 = vrot.slane %v422_v62, 5  ;;  %v709_v56 = vsel %vm163_vm0, %v708_v18, %v707_v26  ;;  %v390_v28 = vmul.f32 %v3220_v20, %v2970_v6  ;;  %v408_v23 = vrot.slane %v389_v59, 4 }
  0xa6   :  { %v439_v48 = vsel %vm166_vm1, %v438_v45, %v437_v10  ;;  %v695_v51 = vmul.f32 %v3243_v44, %v2968_v5  ;;  %v407_v25 = vsel %vm169_vm2, %v406_v9, %v405_v41  ;;  %v424_v24 = vmul.f32 %v3232_v27, %v2970_v6 }
  0xa7   :  { %v712_v8 = vrot.slane %v694_v15, 4  ;;  %v726_v47 = vmul.f32 %v3296_v19, %v2962_v2  ;;  %v442_v63 = vrot.slane %v423_v7, 4  ;;  %v711_v62 = vsel %vm166_vm1, %v710_v42, %v709_v56 }
  0xa8   :  { %v724_v18 = vmul.f32 %v3296_v19, %v2958_v0  ;;  %v740_v59 = vrot.slane %v725_v17, 7  ;;  %v359_v45 = vsel %vm172_vm3, %v358_v61, %v357_v58  ;;  %v391_v26 = vmul.f32 %v3220_v20, %v2990_v13 }
  0xa9   :  { %v441_v9 = vsel %vm169_vm2, %v440_v60, %v439_v48  ;;  %v696_v10 = vmul.f32 %v3243_v44, %v2970_v6  ;;  %v410_v42 = vrot.slane %v390_v28, 3  ;;  %v425_v15 = vmul.f32 %v3232_v27, %v2990_v13 }
  0xaa   :  { %v714_v41 = vrot.slane %v695_v51, 3  ;;  %v727_v61 = vmul.f32 %v3296_v19, %v2964_v3  ;;  %v409_v20 = vsel %vm172_vm3, %v408_v23, %v407_v25  ;;  %v444_v7 = vrot.slane %v424_v24, 3 }
  0xab   :  { %v713_v17 = vsel %vm169_vm2, %v712_v8, %v711_v62  ;;  %v742_v58 = vrot.slane %v726_v47, 6  ;;  %v443_v60 = vsel %vm172_vm3, %v442_v63, %v441_v9  ;;  %v697_v56 = vmul.f32 %v3243_v44, %v2990_v13 }
  0xac   :  { %v741_v28 = vsel %vm160_vm6, %v740_v59, %v724_v18  ;;  %v773_v27 = vstv %s3311_s18  ;;  %v3357_v23 = vsel %vm178_vm5, %v328_v53, %v327_v52  ;;  %v361_v8 = vsel %vm175_vm4, %v360_v29, %v359_v45  ;;  %s3479_s18 = sld [smem:[#allocation9 + $0x1c]] }
  0xad   :  { %v412_v48 = vrot.slane %v391_v26, 2  ;;  %v716_v51 = vrot.slane %v696_v10, 2  ;;  %v446_v25 = vrot.slane %v425_v15, 2  ;;  %v715_v44 = vsel %vm172_vm3, %v714_v41, %v713_v17 }
  0xae   :  { %v728_v24 = vmul.f32 %v3296_v19, %v2966_v4  ;;  %v744_v47 = vrot.slane %v727_v61, 5  ;;  %v411_v22 = vsel %vm175_vm4, %v410_v42, %v409_v20  ;;  %v445_v52 = vsel %vm175_vm4, %v444_v7, %v443_v60 }
  0xaf   :  { %v743_v53 = vsel %vm163_vm0, %v742_v58, %v741_v28  ;;  %v774_v14 = vmul.f32 %v773_v27, %v2958_v0  ;;  %v3372_v29 = vsel %vm178_vm5, %v362_v21, %v361_v8  ;;  %v718_v63 = vrot.slane %v697_v56, 1 }
  0xb0   :  { %v729_v62 = vmul.f32 %v3296_v19, %v2968_v5  ;;  %v730_v18 = vmul.f32 %v3296_v19, %v2970_v6  ;;  %v717_v59 = vsel %vm175_vm4, %v716_v51, %v715_v44  ;;  %v3381_v45 = vmul.f32 %v3296_v19, %v2990_v13 }
  0xb1   :  { %v3384_v26 = vstv %s3335_s15  ;;  %v3387_v16 = vstv %s3337_s0  ;;  %v3390_v21 = vsel %vm178_vm5, %v412_v48, %v411_v22  ;;  %v3393_v9 = vsel %vm178_vm5, %v446_v25, %v445_v52  ;;  %s3458_s0 = sld [smem:[#allocation9 + $0xe]]  ;;  %s3490_s15 = sld [smem:[#allocation6 + $0x25]] }
  0xb2   :  { %v745_v10 = vsel %vm166_vm1, %v744_v47, %v743_v53  ;;  %v746_v42 = vrot.slane %v728_v24, 4  ;;  %v775_v15 = vmul.f32 %v773_v27, %v2960_v1  ;;  %v776_v41 = vmul.f32 %v773_v27, %v2962_v2 }
  0xb3   :  { %v790_v61 = vrot.slane %v774_v14, 1  ;;  %v3399_v19 = vstv %s3345_s14  ;;  %v3402_v20 = vsel %vm178_vm5, %v718_v63, %v717_v59  ;;  %v808_v17 = vmul.f32 %v3384_v26, %v2958_v0  ;;  %s3425_s14 = sld [smem:[#allocation6 + $0x1c]] }
  0xb4   :  { %v1078_v58 = vmul.f32 %v3387_v16, %v2960_v1  ;;  %v748_v60 = vrot.slane %v729_v62, 3  ;;  %v750_v56 = vrot.slane %v730_v18, 2  ;;  %v752_v28 = vrot.slane %v3381_v45, 1 }
  0xb5   :  { %v777_v8 = vmul.f32 %v773_v27, %v2964_v3  ;;  %v747_v48 = vsel %vm169_vm2, %v746_v42, %v745_v10  ;;  %v778_v51 = vmul.f32 %v773_v27, %v2966_v4  ;;  %v779_v25 = vmul.f32 %v773_v27, %v2968_v5 }
  0xb6   :  { %v1112_v44 = vmul.f32 %v3399_v19, %v2960_v1  ;;  %v791_v24 = vsel %vm160_vm6, %v775_v15, %v790_v61  ;;  %v792_v47 = vrot.slane %v776_v41, 7  ;;  %v810_v22 = vmul.f32 %v3384_v26, %v2962_v2 }
  0xb7   :  { %v1079_v52 = vmul.f32 %v3387_v16, %v2962_v2  ;;  %v809_v53 = vmul.f32 %v3384_v26, %v2960_v1  ;;  %v824_v14 = vrot.slane %v808_v17, 1  ;;  %v1077_v63 = vmul.f32 %v3387_v16, %v2958_v0  ;;  %5605 = sst [smem:[#allocation42_spill]] %s3458_s0 }
  0xb8   :  { %v1093_v62 = vrot.slane %v1078_v58, 7  ;;  %v749_v18 = vsel %vm172_vm3, %v748_v60, %v747_v48  ;;  %v3429_v59 = vmul.f32 %v773_v27, %v2970_v6  ;;  %v794_v10 = vrot.slane %v777_v8, 6  ;;  %s3512_s0 = sld [smem:[#allocation6 + $0x28]] }
  0xb9   :  { %v1113_v42 = vmul.f32 %v3399_v19, %v2962_v2  ;;  %v811_v15 = vmul.f32 %v3384_v26, %v2964_v3  ;;  %v1080_v41 = vmul.f32 %v3387_v16, %v2964_v3  ;;  %v1111_v61 = vmul.f32 %v3399_v19, %v2958_v0 }
  0xba   :  { %v1127_v17 = vrot.slane %v1112_v44, 7  ;;  %v3440_v58 = vmul.f32 %v773_v27, %v2990_v13  ;;  %v793_v60 = vsel %vm163_vm0, %v792_v47, %v791_v24  ;;  %v826_v48 = vrot.slane %v810_v22, 7 }
  0xbb   :  { %v1095_v8 = vrot.slane %v1079_v52, 6  ;;  %v751_v7 = vsel %vm175_vm4, %v750_v56, %v749_v18  ;;  %v825_v57 = vsel %vm160_vm6, %v809_v53, %v824_v14  ;;  %v1094_v40 = vsel %vm160_vm6, %v1093_v62, %v1077_v63 }
  0xbc   :  { %v1114_v55 = vmul.f32 %v3399_v19, %v2964_v3  ;;  %v796_v37 = vrot.slane %v778_v51, 5  ;;  %v812_v44 = vmul.f32 %v3384_v26, %v2966_v4  ;;  %v1081_v27 = vmul.f32 %v3387_v16, %v2966_v4 }
  0xbd   :  { %v1129_v24 = vrot.slane %v1113_v42, 6  ;;  %v795_v47 = vsel %vm166_vm1, %v794_v10, %v793_v60  ;;  %v828_v22 = vrot.slane %v811_v15, 6  ;;  %v1097_v56 = vrot.slane %v1080_v41, 5 }
  0xbe   :  { %v1128_v52 = vsel %vm160_vm6, %v1127_v17, %v1111_v61  ;;  %v798_v53 = vrot.slane %v779_v25, 4  ;;  %v827_v14 = vsel %vm163_vm0, %v826_v48, %v825_v57  ;;  %v1096_v63 = vsel %vm163_vm0, %v1095_v8, %v1094_v40 }
  0xbf   :  { %v1115_v51 = vmul.f32 %v3399_v19, %v2966_v4  ;;  %v813_v62 = vmul.f32 %v3384_v26, %v2968_v5  ;;  %v1082_v18 = vmul.f32 %v3387_v16, %v2968_v5  ;;  %v1131_v10 = vrot.slane %v1114_v55, 5 }
  0xc0   :  { %v1160_v42 = vstv %s3425_s14  ;;  %v797_v15 = vsel %vm169_vm2, %v796_v37, %v795_v47  ;;  %v830_v25 = vrot.slane %v812_v44, 5  ;;  %v1099_v41 = vrot.slane %v1081_v27, 4  ;;  %s3493_s14 = sld [smem:[#allocation6 + $0x1a]] }
  0xc1   :  { %v1130_v57 = vsel %vm163_vm0, %v1129_v24, %v1128_v52  ;;  %v814_v40 = vmul.f32 %v3384_v26, %v2970_v6  ;;  %v829_v61 = vsel %vm166_vm1, %v828_v22, %v827_v14  ;;  %v1098_v17 = vsel %vm166_vm1, %v1097_v56, %v1096_v63 }
  0xc2   :  { %v1116_v60 = vmul.f32 %v3399_v19, %v2968_v5  ;;  %v800_v48 = vrot.slane %v3429_v59, 3  ;;  %v1083_v55 = vmul.f32 %v3387_v16, %v2970_v6  ;;  %v1133_v37 = vrot.slane %v1115_v51, 4 }
  0xc3   :  { %v1161_v8 = vmul.f32 %v1160_v42, %v2958_v0  ;;  %v799_v44 = vsel %vm172_vm3, %v798_v53, %v797_v15  ;;  %v832_v27 = vrot.slane %v813_v62, 4  ;;  %v1101_v24 = vrot.slane %v1082_v18, 3 }
  0xc4   :  { %v1132_v47 = vsel %vm166_vm1, %v1131_v10, %v1130_v57  ;;  %v815_v22 = vmul.f32 %v3384_v26, %v2990_v13  ;;  %v831_v59 = vsel %vm169_vm2, %v830_v25, %v829_v61  ;;  %v1100_v56 = vsel %vm169_vm2, %v1099_v41, %v1098_v17 }
  0xc5   :  { %v1117_v52 = vmul.f32 %v3399_v19, %v2970_v6  ;;  %v834_v14 = vrot.slane %v814_v40, 3  ;;  %v1084_v53 = vmul.f32 %v3387_v16, %v2990_v13  ;;  %v1135_v63 = vrot.slane %v1116_v60, 3 }
  0xc6   :  { %v1163_v51 = vmul.f32 %v1160_v42, %v2962_v2  ;;  %v1103_v62 = vrot.slane %v1083_v55, 2  ;;  %v1134_v18 = vsel %vm169_vm2, %v1133_v37, %v1132_v47  ;;  %5606 = sst [smem:[#allocation43_spill]] %s3493_s14  ;;  %v1162_v26 = vmul.f32 %v1160_v42, %v2960_v1  ;;  %s3682_s14 = sld [smem:[#allocation9 + $0x12]] }
  0xc7   :  { %v1177_v10 = vrot.slane %v1161_v8, 1  ;;  %v833_v25 = vsel %vm172_vm3, %v832_v27, %v831_v59  ;;  %v1102_v16 = vsel %vm172_vm3, %v1101_v24, %v1100_v56  ;;  %v1118_v41 = vmul.f32 %v3399_v19, %v2990_v13 }
  0xc8   :  { %v3508_v57 = vsel %vm178_vm5, %v752_v28, %v751_v7  ;;  %v802_v40 = vrot.slane %v3440_v58, 2  ;;  %v1137_v61 = vrot.slane %v1117_v52, 2  ;;  %v1164_v17 = vmul.f32 %v1160_v42, %v2964_v3 }
  0xc9   :  { %v801_v60 = vsel %vm175_vm4, %v800_v48, %v799_v44  ;;  %v836_v55 = vrot.slane %v815_v22, 2  ;;  %v1136_v19 = vsel %vm172_vm3, %v1135_v63, %v1134_v18  ;;  %v1179_v37 = vrot.slane %v1163_v51, 7 }
  0xca   :  { %v835_v45 = vsel %vm175_vm4, %v834_v14, %v833_v25  ;;  %v1104_v7 = vsel %vm175_vm4, %v1103_v62, %v1102_v16  ;;  %v1105_v28 = vrot.slane %v1084_v53, 1  ;;  %v1178_v58 = vsel %vm160_vm6, %v1162_v26, %v1177_v10 }
  0xcb   :  { %v1139_v8 = vrot.slane %v1118_v41, 1  ;;  %v1165_v27 = vmul.f32 %v1160_v42, %v2966_v4  ;;  %v1166_v48 = vmul.f32 %v1160_v42, %v2968_v5  ;;  %v1194_v44 = vstv %s3479_s18  ;;  %s3657_s18 = sld [smem:[#allocation9 + $0x26]] }
  0xcc   :  { %v3523_v24 = vsel %vm178_vm5, %v802_v40, %v801_v60  ;;  %v1138_v47 = vsel %vm175_vm4, %v1137_v61, %v1136_v19  ;;  %v3527_v22 = vmul.f32 %v1160_v42, %v2970_v6  ;;  %v1181_v59 = vrot.slane %v1164_v17, 6  ;;  %5608 = sst [smem:[#allocation45_spill]] %s3682_s14  ;;  %s5612_s14 = sld [smem:[#allocation28_spill]] }
  0xcd   :  { %v3530_v56 = vsel %vm178_vm5, %v836_v55, %v835_v45  ;;  %v3533_v52 = vmul.f32 %v1160_v42, %v2990_v13  ;;  %v1180_v14 = vsel %vm163_vm0, %v1179_v37, %v1178_v58  ;;  %v3537_v53 = vstv %s3490_s15  ;;  %s3667_s15 = sld [smem:[#allocation6 + $0x6]] }
  0xce   :  { %v3540_v63 = vsel %vm178_vm5, %v1105_v28, %v1104_v7  ;;  %v1195_v62 = vmul.f32 %v1194_v44, %v2958_v0  ;;  %v3545_v18 = vstv %s3496_s8  ;;  %v3548_v26 = vsel %vm178_vm5, %v1139_v8, %v1138_v47  ;;  %s3576_s8 = sld [smem:[#allocation9 + $0x28]] }
  0xcf   :  { %v1183_v25 = vrot.slane %v1165_v27, 5  ;;  %v1185_v16 = vrot.slane %v1166_v48, 4  ;;  %v1182_v42 = vsel %vm166_vm1, %v1181_v59, %v1180_v14  ;;  %v1187_v41 = vrot.slane %v3527_v22, 3 }
  0xd0   :  { %v1465_v40 = vmul.f32 %v3537_v53, %v2960_v1  ;;  %v3556_v61 = vstv %s3512_s0  ;;  %v1189_v17 = vrot.slane %v3533_v52, 2  ;;  %v1196_v60 = vmul.f32 %v1194_v44, %v2960_v1  ;;  %s3648_s0 = sld [smem:[#allocation6 + $0x26]] }
  0xd1   :  { %v1197_v55 = vmul.f32 %v1194_v44, %v2962_v2  ;;  %v1499_v19 = vmul.f32 %v3545_v18, %v2960_v1  ;;  %v1198_v37 = vmul.f32 %v1194_v44, %v2964_v3  ;;  %v1199_v45 = vmul.f32 %v1194_v44, %v2966_v4 }
  0xd2   :  { %v1211_v7 = vrot.slane %v1195_v62, 1  ;;  %v1548_v28 = vmul.f32 %v3556_v61, %v2958_v0  ;;  %v1184_v58 = vsel %vm169_vm2, %v1183_v25, %v1182_v42  ;;  %v3569_v8 = vmul.f32 %v1194_v44, %v2968_v5 }
  0xd3   :  { %v3572_v27 = vmul.f32 %v1194_v44, %v2970_v6  ;;  %v1466_v48 = vmul.f32 %v3537_v53, %v2962_v2  ;;  %v3579_v47 = vmul.f32 %v1194_v44, %v2990_v13  ;;  %v1464_v59 = vmul.f32 %v3537_v53, %v2958_v0 }
  0xd4   :  { %v1480_v14 = vrot.slane %v1465_v40, 7  ;;  %v1500_v62 = vmul.f32 %v3545_v18, %v2962_v2  ;;  %v1213_v25 = vrot.slane %v1197_v55, 7  ;;  %v1498_v42 = vmul.f32 %v3545_v18, %v2958_v0 }
  0xd5   :  { %v1514_v10 = vrot.slane %v1499_v19, 7  ;;  %v1550_v51 = vmul.f32 %v3556_v61, %v2962_v2  ;;  %v1212_v15 = vsel %vm160_vm6, %v1196_v60, %v1211_v7  ;;  %v1467_v44 = vmul.f32 %v3537_v53, %v2964_v3 }
  0xd6   :  { %v1549_v36 = vmul.f32 %v3556_v61, %v2960_v1  ;;  %v1564_v40 = vrot.slane %v1548_v28, 1  ;;  %v3595_v54 = vsel %vm172_vm3, %v1185_v16, %v1184_v58  ;;  %v1215_v55 = vrot.slane %v1198_v37, 6 }
  0xd7   :  { %v1482_v50 = vrot.slane %v1466_v48, 6  ;;  %v1501_v19 = vmul.f32 %v3545_v18, %v2964_v3  ;;  %v1217_v49 = vrot.slane %v1199_v45, 5  ;;  %v1481_v2 = vsel %vm160_vm6, %v1480_v14, %v1464_v59 }
  0xd8   :  { %v1516_v60 = vrot.slane %v1500_v62, 6  ;;  %v1551_v7 = vmul.f32 %v3556_v61, %v2964_v3  ;;  %v1214_v46 = vsel %vm163_vm0, %v1213_v25, %v1212_v15  ;;  %v1468_v1 = vmul.f32 %v3537_v53, %v2966_v4 }
  0xd9   :  { %v1515_v16 = vsel %vm160_vm6, %v1514_v10, %v1498_v42  ;;  %v1566_v37 = vrot.slane %v1550_v51, 7  ;;  %v1219_v28 = vrot.slane %v3569_v8, 4  ;;  %v1484_v58 = vrot.slane %v1467_v44, 5 }
  0xda   :  { %v1502_v45 = vmul.f32 %v3545_v18, %v2966_v4  ;;  %v1565_v48 = vsel %vm160_vm6, %v1549_v36, %v1564_v40  ;;  %v1483_v59 = vsel %vm163_vm0, %v1482_v50, %v1481_v2  ;;  %v1518_v14 = vrot.slane %v1501_v19, 5 }
  0xdb   :  { %v1552_v3 = vmul.f32 %v3556_v61, %v2966_v4  ;;  %v3614_v15 = vstv %s3576_s8  ;;  %v1216_v62 = vsel %vm166_vm1, %v1215_v55, %v1214_v46  ;;  %v1469_v51 = vmul.f32 %v3537_v53, %v2968_v5  ;;  %s3674_s8 = sld [smem:[#allocation9 + $0x6]] }
  0xdc   :  { %v1517_v10 = vsel %vm163_vm0, %v1516_v60, %v1515_v16  ;;  %v1568_v8 = vrot.slane %v1551_v7, 6  ;;  %v1221_v25 = vrot.slane %v3572_v27, 3  ;;  %v1486_v42 = vrot.slane %v1468_v1, 4 }
  0xdd   :  { %v1503_v36 = vmul.f32 %v3545_v18, %v2968_v5  ;;  %v1567_v50 = vsel %vm163_vm0, %v1566_v37, %v1565_v48  ;;  %v1485_v4 = vsel %vm166_vm1, %v1484_v58, %v1483_v59  ;;  %v1520_v44 = vrot.slane %v1502_v45, 4  ;;  %v3643_v37 = vld [vmem:[#allocation2 + $0x8] sm:$0xf]  ;;  %v3650_v48 = vld [vmem:[#allocation2 + $0x4] sm:$0xf] }
  0xde   :  { %v1553_v46 = vmul.f32 %v3556_v61, %v2968_v5  ;;  %v1582_v40 = vmul.f32 %v3614_v15, %v2958_v0  ;;  %v1218_v55 = vsel %vm169_vm2, %v1217_v49, %v1216_v62  ;;  %v1470_v27 = vmul.f32 %v3537_v53, %v2970_v6 }
  0xdf   :  { %v1519_v19 = vsel %vm166_vm1, %v1518_v14, %v1517_v10  ;;  %v1570_v2 = vrot.slane %v1552_v3, 5  ;;  %vm188_vm7 = vcmask 384000   ;;  %v3635_v60 = vmul.f32 %v3537_v53, %v2990_v13 }
  0xe0   :  { %v1488_v7 = vrot.slane %v1469_v51, 3  ;;  %v1504_v5 = vmul.f32 %v3545_v18, %v2970_v6  ;;  %v1569_v1 = vsel %vm166_vm1, %v1568_v8, %v1567_v50  ;;  %v1487_v0 = vsel %vm169_vm2, %v1486_v42, %v1485_v4 }
  0xe1   :  { %v1522_v49 = vrot.slane %v1503_v36, 3  ;;  %v1554_v16 = vmul.f32 %v3556_v61, %v2970_v6  ;;  %v1584_v58 = vmul.f32 %v3643_v37, %v3614_v15  ;;  %vm183_vm8 = vcmask 7168   ;;  %v3663_v36 = vld [vmem:[#allocation2 + $0xc] sm:$0xf] }
  0xe2   :  { %v1521_v53 = vsel %vm169_vm2, %v1520_v44, %v1519_v19  ;;  %v1572_v45 = vrot.slane %v1553_v46, 4  ;;  %v1583_v59 = vmul.f32 %v3650_v48, %v3614_v15  ;;  %v1598_v14 = vrot.slane %v1582_v40, 1 }
  0xe3   :  { %v1220_v3 = vsel %vm172_vm3, %v1219_v28, %v1218_v55  ;;  %v1490_v6 = vrot.slane %v1470_v27, 2  ;;  %v1505_v62 = vmul.f32 %v3545_v18, %v2990_v13  ;;  %v1571_v51 = vsel %vm169_vm2, %v1570_v2, %v1569_v1  ;;  %v3688_v55 = vld [vmem:[#allocation2 + $0x10] sm:$0xf]  ;;  %v3697_v2 = vld [vmem:[#allocation2 + $0x14] sm:$0xf] }
  0xe4   :  { %v1489_v10 = vsel %vm172_vm3, %v1488_v7, %v1487_v0  ;;  %v1524_v8 = vrot.slane %v1504_v5, 2  ;;  %v1555_v42 = vmul.f32 %v3556_v61, %v2990_v13  ;;  %v1585_v50 = vmul.f32 %v3663_v36, %v3614_v15  ;;  %v3706_v5 = vld [vmem:[#allocation2 + $0x18] sm:$0xf]  ;;  %v3712_v0 = vld [vmem:[#allocation2 + $0x1c] sm:$0xf] }
  0xe5   :  { %v1188_v18 = vsel %vm175_vm4, %v1187_v41, %v3595_v54  ;;  %v1523_v28 = vsel %vm172_vm3, %v1522_v49, %v1521_v53  ;;  %v1574_v4 = vrot.slane %v1554_v16, 3  ;;  %v1600_v44 = vrot.slane %v1584_v58, 7 }
  0xe6   :  { %v1223_v13 = vrot.slane %v3579_v47, 2  ;;  %v1492_v61 = vrot.slane %v3635_v60, 1  ;;  %v1573_v46 = vsel %vm172_vm3, %v1572_v45, %v1571_v51  ;;  %v1599_v40 = vsel %vm160_vm6, %v1583_v59, %v1598_v14 }
  0xe7   :  { %v1222_v54 = vsel %vm175_vm4, %v1221_v25, %v1220_v3  ;;  %v1491_v22 = vsel %vm175_vm4, %v1490_v6, %v1489_v10  ;;  %v1526_v41 = vrot.slane %v1505_v62, 1  ;;  %v1586_v47 = vmul.f32 %v3688_v55, %v3614_v15 }
  0xe8   :  { %v1525_v27 = vsel %vm175_vm4, %v1524_v8, %v1523_v28  ;;  %v1576_v19 = vrot.slane %v1555_v42, 2  ;;  %v3701_v25 = vmul.f32 %v3697_v2, %v3614_v15  ;;  %v1602_v60 = vrot.slane %v1585_v50, 6 }
  0xe9   :  { %v1575_v7 = vsel %vm175_vm4, %v1574_v4, %v1573_v46  ;;  %v3710_v1 = vmul.f32 %v3706_v5, %v3614_v15  ;;  %v3716_v49 = vmul.f32 %v3712_v0, %v3614_v15  ;;  %v1601_v16 = vsel %vm163_vm0, %v1600_v44, %v1599_v40 }
  0xea   :  { %v3722_v45 = vsel %vm178_vm5, %v1189_v17, %v1188_v18  ;;  %v3725_v59 = vsel %vm178_vm5, %v1223_v13, %v1222_v54  ;;  %v3728_v14 = vsel %vm178_vm5, %v1492_v61, %v1491_v22  ;;  %v1531_v15 = vstv %s3648_s0  ;;  %s5666_s0 = sld [smem:[#allocation46_spill]] }
  0xeb   :  { %v3733_v52 = vsel %vm178_vm5, %v1526_v41, %v1525_v27  ;;  %v1535_v6 = vstv %s3657_s18  ;;  %v1604_v17 = vrot.slane %v1586_v47, 5  ;;  %v3737_v62 = vsel %vm178_vm5, %v1576_v19, %v1575_v7  ;;  %s3924_s18 = sld [smem:[#allocation9 + $0x2c]] }
  0xec   :  { %v1603_v51 = vsel %vm166_vm1, %v1602_v60, %v1601_v16  ;;  %v1606_v10 = vrot.slane %v3701_v25, 4  ;;  %v1608_v50 = vrot.slane %v3710_v1, 3  ;;  %v5616_v19 = vstv %s3144_s27  ;;  %s5628_s27 = sld [smem:[#allocation32_spill]] }
  0xed   :  { %v1605_v40 = vsel %vm169_vm2, %v1604_v17, %v1603_v51  ;;  %v5617_v54 = vstv %s3146_s5  ;;  %v5618_v13 = vstv %s3152_s6  ;;  %v5619_v28 = vstv %s5612_s14  ;;  %s5629_s5 = sld [smem:[#allocation33_spill]]  ;;  %s3818_s6 = sld [smem:[#allocation6 + $0x8]] }
  0xee   :  { %v5620_v8 = vstv %s5613_s11  ;;  %s5626_s11 = sld [smem:[#allocation41_spill]]  ;;  %v5633_v44 = vstv %s3150_s28  ;;  %s5636_s14 = sld [smem:[#allocation44_spill]]  ;;  %vm456_vm9 = vcmask 1046528   ;;  %v5658_v1 = vstv %s5611_s1 }
  0xef   :  { %s5646_s28 = sld [smem:[#allocation37_spill]]  ;;  %s3910_s1 = sld [smem:[#allocation6 + $0x20]]  ;;  %vm555_vm10 = vcmask 1045504   ;;  %vm654_vm11 = vcmask 1044480   ;;  %vm2389_vm12 = vcmask 1040384   ;;  %vm2398_vm13 = vcmask 1041408  }
  0xf0   :  { %vm2407_vm14 = vcmask 1042432   ;;  %vm2417_vm15 = vcmask 388096  }
  0xf5   :  { %v215_v58 = vpop.permute.xlu1 %214 }
  0xf6   :  { %v220_v3 = vsel %vm188_vm7, %v215_v58, 0.0 }
  0xf7   :  { %v181_v53 = vpop.permute.xlu0 %180  ;;  %v3748_v4 = vmul.f32 %v5498_v11, %v220_v3  ;;  %v3755_v46 = vmul.f32 %v5497_v12, %v220_v3  ;;  %v3762_v41 = vmul.f32 %v5496_v30, %v220_v3  ;;  %v3771_v25 = vmul.f32 %v5495_v31, %v220_v3 }
  0xf8   :  { %v184_v42 = vsel %vm183_vm8, 0.0, %v181_v53  ;;  %v3775_v60 = vmul.f32 %v5494_v32, %v220_v3  ;;  %v3779_v7 = vmul.f32 %v5493_v33, %v220_v3  ;;  %v5614_v53 = vstv %s3138_s24  ;;  %s5627_s24 = sld [smem:[#allocation31_spill]] }
  0xf9   :  { %v292_v47 = vmul.f32 %v291_v38, %v184_v42  ;;  %v296_v27 = vmul.f32 %v295_v39, %v184_v42  ;;  %v682_v16 = vmul.f32 %v681_v43, %v184_v42  ;;  %v3786_v38 = vmul.f32 %v5492_v34, %v220_v3 }
  0xfa   :  { %v3790_v39 = vmul.f32 %v5491_v35, %v220_v3  ;;  %v686_v17 = vmul.f32 %v5614_v53, %v184_v42  ;;  %v1069_v22 = vmul.f32 %v5616_v19, %v184_v42  ;;  %v1073_v61 = vmul.f32 %v5617_v54, %v184_v42 }
  0xfb   :  { %v1456_v43 = vmul.f32 %v5618_v13, %v184_v42  ;;  %v186_v58 = vpop.permute.xlu0 %185  ;;  %v293_v3 = vadd.f32 %v292_v47, %v5619_v28  ;;  %v297_v35 = vadd.f32 %v296_v27, %v5620_v8  ;;  %v5621_v53 = vstv %s3154_s29  ;;  %v205_v47 = vpop.permute.xlu1 %204  ;;  %s5635_s29 = sld [smem:[#allocation43_spill]] }
  0xfc   :  { %v1460_v34 = vmul.f32 %v5621_v53, %v184_v42  ;;  %v5622_v13 = vstv %s3131_s21  ;;  %v5625_v28 = vstv %s5615_s3  ;;  %v189_v42 = vsel %vm188_vm7, %v186_v58, 0.0  ;;  %s5634_s21 = sld [smem:[#allocation42_spill]]  ;;  %s5648_s3 = sld [smem:[#allocation38_spill]] }
  0xfd   :  { %v683_v33 = vadd.f32 %v682_v16, %v5622_v13  ;;  %v687_v8 = vadd.f32 %v686_v17, %v5625_v28  ;;  %v5630_v27 = vstv %s3140_s25  ;;  %v5631_v16 = vstv %s3142_s26  ;;  %s5643_s25 = sld [smem:[#allocation34_spill]]  ;;  %s5644_s26 = sld [smem:[#allocation35_spill]] }
  0xfe   :  { %v1070_v53 = vadd.f32 %v1069_v22, %v5630_v27  ;;  %v1074_v13 = vadd.f32 %v1073_v61, %v5631_v16  ;;  %v5632_v54 = vstv %s3148_s7  ;;  %v207_v19 = vsel %vm183_vm8, 0.0, %v205_v47  ;;  %s5645_s7 = sld [smem:[#allocation36_spill]] }
  0xff   :  { %v1457_v32 = vadd.f32 %v1456_v43, %v5632_v54  ;;  %v1461_v51 = vadd.f32 %v1460_v34, %v5633_v44  ;;  %v331_v17 = vadd.f32 %v3357_v23, %v293_v3  ;;  %v365_v28 = vadd.f32 %v3372_v29, %v297_v35 }
 0x100   :  { %v1607_v58 = vsel %vm172_vm3, %v1606_v10, %v1605_v40  ;;  %v721_v22 = vadd.f32 %v3402_v20, %v683_v33  ;;  %v5637_v27 = vstv %s5623_s20  ;;  %v5638_v16 = vstv %s5624_s23  ;;  %s4172_s20 = sld [smem:[#allocation9 + $0x9]]  ;;  %s4183_s23 = sld [smem:[#allocation6 + $0x16]] }
 0x101   :  { %v368_v61 = vmul.f32 %v5637_v27, %v189_v42  ;;  %v372_v43 = vmul.f32 %v5638_v16, %v189_v42  ;;  %v5639_v54 = vstv %s5626_s11  ;;  %v5640_v31 = vstv %s5627_s24  ;;  %s4194_s11 = sld [smem:[#allocation9 + $0x16]]  ;;  %s4196_s24 = sld [smem:[#allocation6 + $0x1f]] }
 0x102   :  { %v758_v47 = vmul.f32 %v5639_v54, %v189_v42  ;;  %v376_v18 = vmul.f32 %v5640_v31, %v207_v19  ;;  %v5641_v34 = vstv %s5628_s27  ;;  %v5642_v44 = vstv %s5629_s5  ;;  %s4231_s27 = sld [smem:[#allocation9 + $0x1f]]  ;;  %s4326_s5 = sld [smem:[#allocation6 + $0x15]] }
 0x103   :  { %v380_v23 = vmul.f32 %v5641_v34, %v207_v19  ;;  %v766_v35 = vmul.f32 %v5642_v44, %v207_v19  ;;  %v755_v29 = vadd.f32 %v3508_v57, %v687_v8  ;;  %v1108_v33 = vadd.f32 %v3540_v63, %v1070_v53  ;;  %v217_v8 = vpop.permute.xlu0 %216 }
 0x104   :  { %v1142_v20 = vadd.f32 %v3548_v26, %v1074_v13  ;;  %v1495_v10 = vadd.f32 %v3728_v14, %v1457_v32  ;;  %v5647_v40 = vstv %s5634_s21  ;;  %v1529_v3 = vadd.f32 %v3733_v52, %v1461_v51  ;;  %s4353_s21 = sld [smem:[#allocation9 + $0x22]] }
 0x105   :  { %v762_v31 = vmul.f32 %v5647_v40, %v189_v42  ;;  %v5649_v27 = vstv %s5635_s29  ;;  %v5650_v54 = vstv %s5636_s14  ;;  %v1532_v57 = vmul.f32 %v1531_v15, %v189_v42  ;;  %s4360_s29 = sld [smem:[#allocation6 + $0x22]]  ;;  %s4362_s14 = sld [smem:[#allocation9 + $0x2b]] }
 0x106   :  { %v1145_v16 = vmul.f32 %v5649_v27, %v189_v42  ;;  %v1149_v34 = vmul.f32 %v5650_v54, %v189_v42  ;;  %v369_v44 = vadd.f32 %v368_v61, %v331_v17  ;;  %v373_v63 = vadd.f32 %v372_v43, %v365_v28 }
 0x107   :  { %v759_v53 = vadd.f32 %v758_v47, %v721_v22  ;;  %v1536_v26 = vmul.f32 %v1535_v6, %v189_v42  ;;  %v5651_v13 = vstv %s5643_s25  ;;  %v5652_v32 = vstv %s5644_s26  ;;  %s4372_s25 = sld [smem:[#allocation6 + $0x21]] }
 0x108   :  { %v770_v30 = vmul.f32 %v5651_v13, %v207_v19  ;;  %v1153_v14 = vmul.f32 %v5652_v32, %v207_v19  ;;  %v5653_v12 = vstv %s5645_s7  ;;  %v550_v11 = vstv %s3818_s6  ;;  %s4337_s6 = sld [smem:[#allocation9 + $0x15]]  ;;  %s4381_s26 = sld [smem:[#allocation9 + $0x21]] }
 0x109   :  { %v1157_v40 = vmul.f32 %v5653_v12, %v207_v19  ;;  %v5654_v52 = vstv %s5646_s28  ;;  %v5655_v27 = vstv %s5648_s3  ;;  %v763_v15 = vadd.f32 %v762_v31, %v755_v29  ;;  %s4411_s7 = sld [smem:[#allocation6 + $0x2b]]  ;;  %s4450_s28 = sld [smem:[#allocation9 + $0x2e]] }
 0x10a   :  { %v1540_v51 = vmul.f32 %v5654_v52, %v207_v19  ;;  %v1544_v54 = vmul.f32 %v5655_v27, %v207_v19  ;;  %v221_v17 = vsel %vm188_vm7, %v217_v8, 0.0  ;;  %v1609_v6 = vsel %vm175_vm4, %v1608_v50, %v1607_v58  ;;  %v237_v19 = vpop.permute.xlu1 %236  ;;  %s4531_s3 = sld [smem:[#allocation6 + $0x2e]] }
 0x10b   :  { %v1146_v42 = vadd.f32 %v1145_v16, %v1108_v33  ;;  %v1150_v12 = vadd.f32 %v1149_v34, %v1142_v20  ;;  %v1533_v28 = vadd.f32 %v1532_v57, %v1495_v10  ;;  %v377_v22 = vadd.f32 %v376_v18, %v369_v44 }
 0x10c   :  { %v381_v61 = vadd.f32 %v380_v23, %v373_v63  ;;  %v767_v43 = vadd.f32 %v766_v35, %v759_v53  ;;  %v1537_v47 = vadd.f32 %v1536_v26, %v1529_v3  ;;  %v239_v29 = vsel %vm183_vm8, 0.0, %v237_v19 }
 0x10d   :  { %v5656_v31 = vstv %s3100_s13  ;;  %v5657_v8 = vstv %s5610_s22  ;;  %v843_v52 = vmul.f32 %v5658_v1, %v221_v17  ;;  %v5659_v50 = vrot.slane %v3716_v49, 2  ;;  %s3894_s13 = sld [smem:[#allocation9 + $0x8]] }
 0x10e   :  { %v453_v13 = vmul.f32 %v5656_v31, %v221_v17  ;;  %v465_v32 = vmul.f32 %v5657_v8, %v221_v17  ;;  %v771_v33 = vadd.f32 %v770_v30, %v763_v15  ;;  %v5660_v18 = vstv %s3109_s16  ;;  %s3898_s16 = sld [smem:[#allocation6 + $0x7]]  ;;  %s3912_s22 = sld [smem:[#allocation9 + $0x20]] }
 0x10f   :  { %v1611_v58 = vsel %vm178_vm5, %v5659_v50, %v1609_v6  ;;  %v854_v20 = vmul.f32 %v5660_v18, %v221_v17  ;;  %v5661_v23 = vstv %s3112_s17  ;;  %v1154_v10 = vadd.f32 %v1153_v14, %v1146_v42  ;;  %s3903_s17 = sld [smem:[#allocation6 + $0x14]] }
 0x110   :  { %v1230_v35 = vmul.f32 %v5661_v23, %v221_v17  ;;  %v1158_v3 = vadd.f32 %v1157_v40, %v1150_v12  ;;  %v1541_v16 = vadd.f32 %v1540_v51, %v1533_v28  ;;  %v5662_v34 = vstv %s3114_s2  ;;  %s3905_s2 = sld [smem:[#allocation9 + $0x14]] }
 0x111   :  { %v1241_v57 = vmul.f32 %v5662_v34, %v221_v17  ;;  %v415_v44 = vadd.f32 %v3390_v21, %v377_v22  ;;  %v449_v63 = vadd.f32 %v3393_v9, %v381_v61  ;;  %v805_v49 = vadd.f32 %v3523_v24, %v767_v43 }
 0x112   :  { %v1545_v53 = vadd.f32 %v1544_v54, %v1537_v47  ;;  %v458_v30 = vrot.slane %v453_v13, 1  ;;  %v469_v26 = vrot.slane %v465_v32, 1  ;;  %v847_v27 = vrot.slane %v843_v52, 1 }
 0x113   :  { %v5663_v15 = vstv %s3117_s4  ;;  %v839_v40 = vadd.f32 %v3530_v56, %v771_v33  ;;  %v858_v21 = vrot.slane %v854_v20, 1  ;;  %v1234_v51 = vrot.slane %v1230_v35, 1  ;;  %s5665_s4 = sld [smem:[#allocation45_spill]] }
 0x114   :  { %v1617_v14 = vmul.f32 %v5663_v15, %v221_v17  ;;  %v5664_v9 = vstv %s3121_s19  ;;  %v1192_v24 = vadd.f32 %v3722_v45, %v1154_v10  ;;  %v1226_v54 = vadd.f32 %v3725_v59, %v1158_v3  ;;  %s3922_s19 = sld [smem:[#allocation6 + $0x2c]]  ;;  %v249_v10 = vpop.permute.xlu1 %248 }
 0x115   :  { %v1628_v6 = vmul.f32 %v5664_v9, %v221_v17  ;;  %v1579_v42 = vadd.f32 %v3737_v62, %v1541_v16  ;;  %v1245_v12 = vrot.slane %v1241_v57, 1  ;;  %v1613_v56 = vadd.f32 %v1611_v58, %v1545_v53 }
 0x116   :  { %v5667_v28 = vstv %s3667_s15  ;;  %v5668_v22 = vstv %s3674_s8  ;;  %v5669_v43 = vstv %s3676_s12  ;;  %v5670_v59 = vrot.slane %v3748_v4, 1  ;;  %s3945_s12 = sld [smem:[#allocation9 + $0x7]]  ;;  %s4094_s15 = sld [smem:[#allocation6 + $0x9]] }
 0x117   :  { %v475_v17 = vmul.f32 %v5667_v28, %v239_v29  ;;  %v479_v61 = vmul.f32 %v5668_v22, %v239_v29  ;;  %v3920_v45 = vmul.f32 %v5669_v43, %v239_v29  ;;  %v5671_v47 = vrot.slane %v3755_v46, 1  ;;  %s4112_s8 = sld [smem:[#allocation9 + $0x13]] }
 0x118   :  { %v459_v62 = vsel %vm456_vm9, %v5670_v59, %v458_v30  ;;  %v5672_v31 = vrot.slane %v3762_v41, 1  ;;  %v1621_v8 = vrot.slane %v1617_v14, 1  ;;  %v5674_v52 = vrot.slane %v3771_v25, 1 }
 0x119   :  { %v470_v19 = vsel %vm456_vm9, %v5671_v47, %v469_v26  ;;  %v5673_v32 = vstv %s5665_s4  ;;  %v5675_v4 = vrot.slane %v3775_v60, 1  ;;  %v1632_v46 = vrot.slane %v1628_v6, 1  ;;  %s4579_s4 = sld [smem:[#allocation9 + $0x2f]] }
 0x11a   :  { %v848_v13 = vsel %vm456_vm9, %v5672_v31, %v847_v27  ;;  %v3937_v1 = vmul.f32 %v5673_v32, %v239_v29  ;;  %v859_v50 = vsel %vm456_vm9, %v5674_v52, %v858_v21  ;;  %v5676_v33 = vstv %s5666_s0  ;;  %s4658_s0 = sld [smem:[#allocation6 + $0x23]] }
 0x11b   :  { %v1235_v58 = vsel %vm456_vm9, %v5675_v4, %v1234_v51  ;;  %v3949_v41 = vmul.f32 %v5676_v33, %v239_v29  ;;  %v5677_v18 = vstv %s3692_s10  ;;  %v5678_v23 = vstv %s3694_s30  ;;  %s4045_s10 = sld [smem:[#allocation9 + $0xa]]  ;;  %s4080_s30 = sld [smem:[#allocation6 + $0x13]] }
 0x11c   :  { %v3953_v20 = vmul.f32 %v5677_v18, %v239_v29  ;;  %v3957_v25 = vmul.f32 %v5678_v23, %v239_v29  ;;  %v5680_v35 = vrot.slane %v3779_v7, 1  ;;  %v5681_v3 = vstv %s3703_s9  ;;  %s4023_s9 = sld [smem:[#allocation6 + $0xa]] }
 0x11d   :  { %v3964_v16 = vmul.f32 %v5681_v3, %v239_v29  ;;  %v461_v34 = vadd.f32 %v459_v62, %v415_v44  ;;  %v472_v57 = vadd.f32 %v470_v19, %v449_v63  ;;  %v3966_v53 = vadd.f32 %v848_v13, %v805_v49 }
 0x11e   :  { %5679 = vst [vmem:[#allocation47_spill] sm:$0xff] %v3957_v25  ;;  %v1246_v60 = vsel %vm456_vm9, %v5680_v35, %v1245_v12  ;;  %v3968_v30 = vadd.f32 %v859_v50, %v839_v40  ;;  %v3970_v26 = vadd.f32 %v1235_v58, %v1192_v24  ;;  %v5682_v7 = vrot.slane %v3786_v38, 1  ;;  %v247_v24 = vpop.permute.xlu0 %246  ;;  %v3991_v12 = vld [vmem:[#allocation2] sm:$0xf] }
 0x11f   :  { %v3976_v15 = vstv %s3898_s16  ;;  %v3978_v14 = vadd.f32 %v1246_v60, %v1226_v54  ;;  %v5683_v29 = vrot.slane %v3790_v39, 1  ;;  %v562_v63 = vstv %s3894_s13  ;;  %s4546_s13 = sld [smem:[#allocation9 + $0xb]]  ;;  %s4552_s16 = sld [smem:[#allocation9 + $0x2d]] }
 0x120   :  { %v1622_v27 = vsel %vm456_vm9, %v5682_v7, %v1621_v8  ;;  %v253_v49 = vsel %vm188_vm7, %v249_v10, 0.0  ;;  %v939_v40 = vstv %s3903_s17  ;;  %v950_v21 = vstv %s3905_s2  ;;  %s4554_s17 = sld [smem:[#allocation9 + $0x17]]  ;;  %s4565_s2 = sld [smem:[#allocation9 + $0x23]] }
 0x121   :  { %v1633_v44 = vsel %vm456_vm9, %v5683_v29, %v1632_v46  ;;  %v1326_v51 = vstv %s3910_s1  ;;  %v1337_v9 = vstv %s3912_s22  ;;  %v1713_v38 = vstv %s3922_s19  ;;  %s4640_s1 = sld [smem:[#allocation6 + $0xb]]  ;;  %s4647_s22 = sld [smem:[#allocation6 + $0x17]] }
 0x122   :  { %v1724_v6 = vstv %s3924_s18  ;;  %v483_v54 = vmul.f32 %v3991_v12, %v3976_v15  ;;  %v484_v39 = vmul.f32 %v3650_v48, %v3976_v15  ;;  %v3997_v28 = vadd.f32 %v1622_v27, %v1579_v42  ;;  %s4672_s19 = sld [smem:[#allocation6 + $0x2f]]  ;;  %s4680_s18 = sld [smem:[#allocation6 + $0x2d]] }
 0x123   :  { %v3999_v22 = vadd.f32 %v1633_v44, %v1613_v56  ;;  %v4003_v43 = vmul.f32 %v550_v11, %v253_v49  ;;  %v4005_v59 = vmul.f32 %v562_v63, %v253_v49  ;;  %v4007_v62 = vmul.f32 %v939_v40, %v253_v49 }
 0x124   :  { %5684 = vst [vmem:[#allocation48_spill] sm:$0xff] %v3997_v28  ;;  %v4009_v47 = vmul.f32 %v950_v21, %v253_v49  ;;  %v4011_v19 = vmul.f32 %v1326_v51, %v253_v49  ;;  %v4014_v31 = vstv %s3945_s12  ;;  %v4016_v13 = vmul.f32 %v1337_v9, %v253_v49  ;;  %s5708_s12 = smov 127  }
 0x125   :  { %v4018_v8 = vmul.f32 %v1713_v38, %v253_v49  ;;  %v4020_v42 = vmul.f32 %v1724_v6, %v253_v49  ;;  %v252_v56 = vsel %vm188_vm7, %v247_v24, 0.0  ;;  %v4025_v32 = vadd.f32 %v475_v17, %v461_v34 }
 0x126   :  { %v4027_v52 = vadd.f32 %v479_v61, %v472_v57  ;;  %v499_v50 = vrot.slane %v483_v54, 2  ;;  %v500_v4 = vrot.slane %v484_v39, 1  ;;  %v517_v33 = vmul.f32 %v3991_v12, %v4014_v31 }
 0x127   :  { %5685 = vst [vmem:[#allocation49_spill] sm:$0xff] %v4018_v8  ;;  %v518_v18 = vmul.f32 %v3650_v48, %v4014_v31  ;;  %v486_v35 = vmul.f32 %v3663_v36, %v3976_v15  ;;  %v485_v34 = vmul.f32 %v3643_v37, %v3976_v15  ;;  %v4049_v57 = vmul.f32 %v550_v11, %v252_v56 }
 0x128   :  { %v4051_v7 = vmul.f32 %v562_v63, %v252_v56  ;;  %v4053_v27 = vmul.f32 %v939_v40, %v252_v56  ;;  %v501_v29 = vsel %vm160_vm6, %v500_v4, %v499_v50  ;;  %v4056_v44 = vmul.f32 %v950_v21, %v252_v56 }
 0x129   :  { %v487_v49 = vmul.f32 %v3688_v55, %v3976_v15  ;;  %v533_v24 = vrot.slane %v517_v33, 2  ;;  %v534_v54 = vrot.slane %v518_v18, 1  ;;  %v4060_v39 = vmul.f32 %v1326_v51, %v252_v56 }
 0x12a   :  { %v4062_v10 = vmul.f32 %v1337_v9, %v252_v56  ;;  %v4064_v3 = vmul.f32 %v1713_v38, %v252_v56  ;;  %v503_v11 = vrot.slane %v486_v35, 7  ;;  %v4066_v63 = vmul.f32 %v1724_v6, %v252_v56 }
 0x12b   :  { %v502_v40 = vsel %vm163_vm0, %v485_v34, %v501_v29  ;;  %v520_v21 = vmul.f32 %v3663_v36, %v4014_v31  ;;  %v4072_v50 = vstv %s4023_s9  ;;  %v556_v4 = vrot.slane %v4049_v57, 2  ;;  %s5709_s9 = smov 1  }
 0x12c   :  { %5686 = vst [vmem:[#allocation50_spill] sm:$0xff] %v4064_v3  ;;  %v488_v51 = vmul.f32 %v3697_v2, %v3976_v15  ;;  %v519_v9 = vmul.f32 %v3643_v37, %v4014_v31  ;;  %v505_v6 = vrot.slane %v487_v49, 6  ;;  %v521_v56 = vmul.f32 %v3688_v55, %v4014_v31 }
 0x12d   :  { %v535_v18 = vsel %vm160_vm6, %v534_v54, %v533_v24  ;;  %v504_v34 = vsel %vm166_vm1, %v503_v11, %v502_v40  ;;  %v582_v57 = vmul.f32 %v3991_v12, %v4072_v50  ;;  %v583_v29 = vmul.f32 %v3650_v48, %v4072_v50 }
 0x12e   :  { %v537_v49 = vrot.slane %v520_v21, 7  ;;  %v4097_v17 = vstv %s4045_s10  ;;  %v489_v54 = vmul.f32 %v3706_v5, %v3976_v15  ;;  %v507_v11 = vrot.slane %v488_v51, 5  ;;  %s4754_s10 = sld [smem:[#allocation12 + $0x1]] }
 0x12f   :  { %v536_v40 = vsel %vm163_vm0, %v519_v9, %v535_v18  ;;  %v506_v35 = vsel %vm169_vm2, %v505_v6, %v504_v34  ;;  %v522_v60 = vmul.f32 %v3697_v2, %v4014_v31  ;;  %v539_v61 = vrot.slane %v521_v56, 6 }
 0x130   :  { %v584_v21 = vmul.f32 %v3643_v37, %v4072_v50  ;;  %v598_v38 = vrot.slane %v582_v57, 3  ;;  %v599_v23 = vrot.slane %v583_v29, 2  ;;  %v616_v24 = vmul.f32 %v3991_v12, %v4097_v17 }
 0x131   :  { %v617_v51 = vmul.f32 %v3650_v48, %v4097_v17  ;;  %v490_v6 = vmul.f32 %v3712_v0, %v3976_v15  ;;  %v538_v56 = vsel %vm166_vm1, %v537_v49, %v536_v40  ;;  %v509_v18 = vrot.slane %v489_v54, 4 }
 0x132   :  { %v523_v34 = vmul.f32 %v3706_v5, %v4014_v31  ;;  %v524_v57 = vmul.f32 %v3712_v0, %v4014_v31  ;;  %v4123_v29 = vstv %s4080_s30  ;;  %v508_v33 = vsel %vm172_vm3, %v507_v11, %v506_v35  ;;  %s4756_s30 = sld [smem:[#allocation15 + $0x1]] }
 0x133   :  { %v541_v46 = vrot.slane %v522_v60, 5  ;;  %v601_v9 = vrot.slane %v584_v21, 1  ;;  %v618_v58 = vmul.f32 %v3643_v37, %v4097_v17  ;;  %v540_v15 = vsel %vm169_vm2, %v539_v61, %v538_v56 }
 0x134   :  { %v600_v49 = vsel %vm160_vm6, %v599_v23, %v598_v38  ;;  %v632_v54 = vrot.slane %v616_v24, 3  ;;  %v633_v40 = vrot.slane %v617_v51, 2  ;;  %v586_v31 = vmul.f32 %v3688_v55, %v4072_v50  ;;  %5710 = sst [smem:[#allocation26_spill]] %s4754_s10 }
 0x135   :  { %v872_v8 = vmul.f32 %v3991_v12, %v4123_v29  ;;  %v873_v60 = vmul.f32 %v3650_v48, %v4123_v29  ;;  %v511_v35 = vrot.slane %v490_v6, 3  ;;  %v543_v11 = vrot.slane %v523_v34, 4 }
 0x136   :  { %v545_v21 = vrot.slane %v524_v57, 3  ;;  %v585_v61 = vmul.f32 %v3663_v36, %v4072_v50  ;;  %v510_v23 = vsel %vm175_vm4, %v509_v18, %v508_v33  ;;  %v542_v38 = vsel %vm172_vm3, %v541_v46, %v540_v15 }
 0x137   :  { %v602_v24 = vsel %vm163_vm0, %v601_v9, %v600_v49  ;;  %v635_v51 = vrot.slane %v618_v58, 1  ;;  %v5687_v56 = vrot.slane %v4003_v43, 2  ;;  %v587_v25 = vmul.f32 %v3697_v2, %v4072_v50 }
 0x138   :  { %v634_v6 = vsel %vm160_vm6, %v633_v40, %v632_v54  ;;  %v4149_v34 = vstv %s4112_s8  ;;  %v604_v57 = vrot.slane %v586_v31, 7  ;;  %v620_v33 = vmul.f32 %v3688_v55, %v4097_v17  ;;  %5711 = sst [smem:[#allocation27_spill]] %s4756_s30  ;;  %s4760_s8 = sld [smem:[#allocation15 + $0xd]] }
 0x139   :  { %v558_v3 = vsel %vm555_vm10, %v556_v4, %v5687_v56  ;;  %v888_v18 = vrot.slane %v872_v8, 2  ;;  %v889_v46 = vrot.slane %v873_v60, 1  ;;  %v544_v9 = vsel %vm175_vm4, %v543_v11, %v542_v38 }
 0x13a   :  { %v588_v43 = vmul.f32 %v3706_v5, %v4072_v50  ;;  %v603_v58 = vsel %vm166_vm1, %v585_v61, %v602_v24  ;;  %v619_v4 = vmul.f32 %v3663_v36, %v4097_v17  ;;  %v636_v15 = vsel %vm163_vm0, %v635_v51, %v634_v6 }
 0x13b   :  { %v875_v49 = vmul.f32 %v3663_v36, %v4123_v29  ;;  %v906_v54 = vmul.f32 %v3991_v12, %v4149_v34  ;;  %v907_v8 = vmul.f32 %v3650_v48, %v4149_v34  ;;  %v512_v40 = vsel %vm178_vm5, %v511_v35, %v510_v23 }
 0x13c   :  { %v606_v31 = vrot.slane %v587_v25, 6  ;;  %v621_v60 = vmul.f32 %v3697_v2, %v4097_v17  ;;  %v874_v11 = vmul.f32 %v3643_v37, %v4123_v29  ;;  %v546_v61 = vsel %vm178_vm5, %v545_v21, %v544_v9 }
 0x13d   :  { %v605_v38 = vsel %vm169_vm2, %v604_v57, %v603_v58  ;;  %v638_v24 = vrot.slane %v620_v33, 7  ;;  %v890_v51 = vsel %vm160_vm6, %v889_v46, %v888_v18  ;;  %v589_v56 = vmul.f32 %v3712_v0, %v4072_v50 }
 0x13e   :  { %v608_v35 = vrot.slane %v588_v43, 5  ;;  %v637_v25 = vsel %vm166_vm1, %v619_v4, %v636_v15  ;;  %v876_v23 = vmul.f32 %v3688_v55, %v4123_v29  ;;  %v622_v6 = vmul.f32 %v3706_v5, %v4097_v17  ;;  %5713 = sst [smem:[#allocation29_spill]] %s4760_s8 }
 0x13f   :  { %v892_v21 = vrot.slane %v875_v49, 7  ;;  %v922_v9 = vrot.slane %v906_v54, 2  ;;  %v923_v28 = vrot.slane %v907_v8, 1  ;;  %v514_v57 = vadd.f32 %v512_v40, %v4025_v32 }
 0x140   :  { %v607_v33 = vsel %vm172_vm3, %v606_v31, %v605_v38  ;;  %v640_v18 = vrot.slane %v621_v60, 6  ;;  %v891_v50 = vsel %vm163_vm0, %v874_v11, %v890_v51  ;;  %v548_v46 = vadd.f32 %v546_v61, %v4027_v52 }
 0x141   :  { %v639_v43 = vsel %vm169_vm2, %v638_v24, %v637_v25  ;;  %v877_v58 = vmul.f32 %v3697_v2, %v4123_v29  ;;  %v909_v4 = vmul.f32 %v3663_v36, %v4149_v34  ;;  %v610_v32 = vrot.slane %v589_v56, 4 }
 0x142   :  { %v623_v15 = vmul.f32 %v3712_v0, %v4097_v17  ;;  %v894_v49 = vrot.slane %v876_v23, 6  ;;  %v908_v52 = vmul.f32 %v3643_v37, %v4149_v34  ;;  %v609_v54 = vsel %vm175_vm4, %v608_v35, %v607_v33 }
 0x143   :  { %v642_v8 = vrot.slane %v622_v6, 5  ;;  %v893_v40 = vsel %vm166_vm1, %v892_v21, %v891_v50  ;;  %v924_v31 = vsel %vm160_vm6, %v923_v28, %v922_v9  ;;  %v5688_v60 = vrot.slane %v4005_v59, 2 }
 0x144   :  { %v5689_v11 = vrot.slane %v4051_v7, 2  ;;  %v641_v17 = vsel %vm172_vm3, %v640_v18, %v639_v43  ;;  %v878_v38 = vmul.f32 %v3706_v5, %v4123_v29  ;;  %v910_v24 = vmul.f32 %v3688_v55, %v4149_v34 }
 0x145   :  { %v4215_v51 = vadd.f32 %v558_v3, %v514_v57  ;;  %v577_v56 = vstv %s4172_s20  ;;  %v896_v35 = vrot.slane %v877_v58, 5  ;;  %v926_v28 = vrot.slane %v909_v4, 7  ;;  %s4762_s20 = sld [smem:[#allocation12 + $0x19]] }
 0x146   :  { %v569_v61 = vsel %vm555_vm10, %v5689_v11, %v5688_v60  ;;  %v4221_v7 = vsel %vm178_vm5, %v610_v32, %v609_v54  ;;  %v895_v25 = vsel %vm169_vm2, %v894_v49, %v893_v40  ;;  %v925_v23 = vsel %vm163_vm0, %v908_v52, %v924_v31 }
 0x147   :  { %v4218_v59 = vadd.f32 %v569_v61, %v548_v46  ;;  %v643_v6 = vsel %vm175_vm4, %v642_v8, %v641_v17  ;;  %v644_v21 = vrot.slane %v623_v15, 4  ;;  %v879_v3 = vmul.f32 %v3712_v0, %v4123_v29 }
 0x148   :  { %v4229_v9 = vstv %s4183_s23  ;;  %v898_v57 = vrot.slane %v878_v38, 4  ;;  %v911_v33 = vmul.f32 %v3697_v2, %v4149_v34  ;;  %v912_v18 = vmul.f32 %v3706_v5, %v4149_v34  ;;  %s4764_s23 = sld [smem:[#allocation15 + $0x19]] }
 0x149   :  { %v928_v50 = vrot.slane %v910_v24, 6  ;;  %v897_v46 = vsel %vm172_vm3, %v896_v35, %v895_v25  ;;  %v927_v43 = vsel %vm166_vm1, %v926_v28, %v925_v23  ;;  %v4240_v58 = vstv %s4194_s11  ;;  %s4766_s11 = sld [smem:[#allocation12 + $0x25]] }
 0x14a   :  { %v4243_v4 = vstv %s4196_s24  ;;  %v970_v29 = vmul.f32 %v3991_v12, %v4229_v9  ;;  %v971_v32 = vmul.f32 %v3650_v48, %v4229_v9  ;;  %v4254_v52 = vsel %vm178_vm5, %v644_v21, %v643_v6  ;;  %s4768_s24 = sld [smem:[#allocation15 + $0x25]] }
 0x14b   :  { %v1259_v15 = vmul.f32 %v3991_v12, %v4243_v4  ;;  %v1260_v49 = vmul.f32 %v3650_v48, %v4243_v4  ;;  %v865_v54 = vadd.f32 %v3920_v45, %v3966_v53  ;;  %v4260_v8 = vadd.f32 %v3937_v1, %v3968_v30  ;;  %5714 = sst [smem:[#allocation30_spill]] %s4762_s20 }
 0x14c   :  { %v4264_v40 = vmul.f32 %v3712_v0, %v4149_v34  ;;  %v900_v31 = vrot.slane %v879_v3, 3  ;;  %v930_v60 = vrot.slane %v911_v33, 5  ;;  %v1004_v11 = vmul.f32 %v3991_v12, %v4240_v58 }
 0x14d   :  { %v1005_v61 = vmul.f32 %v3650_v48, %v4240_v58  ;;  %v899_v17 = vsel %vm175_vm4, %v898_v57, %v897_v46  ;;  %v929_v45 = vsel %vm169_vm2, %v928_v50, %v927_v43  ;;  %v932_v53 = vrot.slane %v912_v18, 4 }
 0x14e   :  { %v972_v1 = vmul.f32 %v3643_v37, %v4229_v9  ;;  %v986_v30 = vrot.slane %v970_v29, 3  ;;  %v987_v34 = vrot.slane %v971_v32, 2  ;;  %v1275_v38 = vrot.slane %v1259_v15, 2  ;;  %5715 = sst [smem:[#allocation39_spill]] %s4764_s23 }
 0x14f   :  { %v1276_v24 = vrot.slane %v1260_v49, 1  ;;  %v934_v35 = vrot.slane %v4264_v40, 3  ;;  %v5690_v28 = vrot.slane %v4007_v62, 2  ;;  %v5691_v25 = vrot.slane %v4053_v27, 2  ;;  %5716 = sst [smem:[#allocation40_spill]] %s4766_s11 }
 0x150   :  { %v1006_v6 = vmul.f32 %v3643_v37, %v4240_v58  ;;  %v4285_v21 = vstv %s4231_s27  ;;  %v901_v3 = vsel %vm178_vm5, %v900_v31, %v899_v17  ;;  %v1020_v57 = vrot.slane %v1004_v11, 3  ;;  %5717 = sst [smem:[#allocation41_spill]] %s4768_s24  ;;  %s4770_s27 = sld [smem:[#allocation12 + $0x4]] }
 0x151   :  { %v4280_v23 = vsel %vm555_vm10, %v5691_v25, %v5690_v28  ;;  %v1021_v33 = vrot.slane %v1005_v61, 2  ;;  %v1262_v18 = vmul.f32 %v3663_v36, %v4243_v4  ;;  %v931_v50 = vsel %vm172_vm3, %v930_v60, %v929_v45 }
 0x152   :  { %v5692_v62 = vrot.slane %v4009_v47, 2  ;;  %v5693_v27 = vrot.slane %v4056_v44, 2  ;;  %v989_v43 = vrot.slane %v972_v1, 1  ;;  %v1261_v29 = vmul.f32 %v3643_v37, %v4243_v4 }
 0x153   :  { %v988_v32 = vsel %vm160_vm6, %v987_v34, %v986_v30  ;;  %v1277_v15 = vsel %vm160_vm6, %v1276_v24, %v1275_v38  ;;  %v1293_v49 = vmul.f32 %v3991_v12, %v4285_v21  ;;  %v1294_v40 = vmul.f32 %v3650_v48, %v4285_v21 }
 0x154   :  { %v4296_v46 = vsel %vm555_vm10, %v5693_v27, %v5692_v62  ;;  %v4306_v47 = vadd.f32 %v901_v3, %v865_v54  ;;  %v974_v44 = vmul.f32 %v3688_v55, %v4229_v9  ;;  %v1023_v31 = vrot.slane %v1006_v6, 1 }
 0x155   :  { %v1263_v60 = vmul.f32 %v3688_v55, %v4243_v4  ;;  %v933_v11 = vsel %vm175_vm4, %v932_v53, %v931_v50  ;;  %v973_v61 = vmul.f32 %v3663_v36, %v4229_v9  ;;  %v1022_v17 = vsel %vm160_vm6, %v1021_v33, %v1020_v57 }
 0x156   :  { %v1279_v45 = vrot.slane %v1262_v18, 7  ;;  %v975_v48 = vmul.f32 %v3697_v2, %v4229_v9  ;;  %v990_v54 = vsel %vm163_vm0, %v989_v43, %v988_v32  ;;  %v1008_v1 = vmul.f32 %v3688_v55, %v4240_v58  ;;  %5718 = sst [smem:[#allocation31_spill]] %s4770_s27 }
 0x157   :  { %v1278_v30 = vsel %vm163_vm0, %v1261_v29, %v1277_v15  ;;  %v1007_v34 = vmul.f32 %v3663_v36, %v4240_v58  ;;  %v1264_v53 = vmul.f32 %v3697_v2, %v4243_v4  ;;  %v1309_v38 = vrot.slane %v1293_v49, 2 }
 0x158   :  { %v1310_v24 = vrot.slane %v1294_v40, 1  ;;  %v976_v28 = vmul.f32 %v3706_v5, %v4229_v9  ;;  %v992_v25 = vrot.slane %v974_v44, 7  ;;  %v1024_v6 = vsel %vm163_vm0, %v1023_v31, %v1022_v17 }
 0x159   :  { %v1281_v3 = vrot.slane %v1263_v60, 6  ;;  %v991_v57 = vsel %vm166_vm1, %v973_v61, %v990_v54  ;;  %v1009_v33 = vmul.f32 %v3697_v2, %v4240_v58  ;;  %v1280_v18 = vsel %vm166_vm1, %v1279_v45, %v1278_v30 }
 0x15a   :  { %v1296_v50 = vmul.f32 %v3663_v36, %v4285_v21  ;;  %v977_v62 = vmul.f32 %v3712_v0, %v4229_v9  ;;  %v1026_v27 = vrot.slane %v1008_v1, 7  ;;  %v1265_v43 = vmul.f32 %v3706_v5, %v4243_v4 }
 0x15b   :  { %v1295_v29 = vmul.f32 %v3643_v37, %v4285_v21  ;;  %v994_v32 = vrot.slane %v975_v48, 6  ;;  %v1025_v15 = vsel %vm166_vm1, %v1007_v34, %v1024_v6  ;;  %v1283_v49 = vrot.slane %v1264_v53, 5 }
 0x15c   :  { %v1311_v40 = vsel %vm160_vm6, %v1310_v24, %v1309_v38  ;;  %v993_v36 = vsel %vm169_vm2, %v992_v25, %v991_v57  ;;  %v1010_v44 = vmul.f32 %v3706_v5, %v4240_v58  ;;  %v1282_v9 = vsel %vm169_vm2, %v1281_v3, %v1280_v18 }
 0x15d   :  { %v1297_v31 = vmul.f32 %v3688_v55, %v4285_v21  ;;  %v935_v37 = vsel %vm178_vm5, %v934_v35, %v933_v11  ;;  %v1028_v60 = vrot.slane %v1009_v33, 6  ;;  %v1266_v61 = vmul.f32 %v3712_v0, %v4243_v4 }
 0x15e   :  { %v1313_v17 = vrot.slane %v1296_v50, 7  ;;  %v996_v45 = vrot.slane %v976_v28, 5  ;;  %v1027_v48 = vsel %vm169_vm2, %v1026_v27, %v1025_v15  ;;  %v1285_v54 = vrot.slane %v1265_v43, 4 }
 0x15f   :  { %v1312_v1 = vsel %vm163_vm0, %v1295_v29, %v1311_v40  ;;  %v995_v55 = vsel %vm172_vm3, %v994_v32, %v993_v36  ;;  %v1011_v35 = vmul.f32 %v3712_v0, %v4240_v58  ;;  %v1284_v11 = vsel %vm172_vm3, %v1283_v49, %v1282_v9  ;;  %v4422_v40 = vld [vmem:[#allocation2 + $0x4] sm:$0xf] }
 0x160   :  { %v1298_v4 = vmul.f32 %v3697_v2, %v4285_v21  ;;  %v937_v30 = vadd.f32 %v935_v37, %v4260_v8  ;;  %v961_v34 = vstv %s4326_s5  ;;  %v1030_v53 = vrot.slane %v1010_v44, 5  ;;  %s4772_s5 = sld [smem:[#allocation15 + $0x4]] }
 0x161   :  { %v1315_v38 = vrot.slane %v1297_v31, 6  ;;  %v998_v24 = vrot.slane %v977_v62, 4  ;;  %v1029_v28 = vsel %vm172_vm3, %v1028_v60, %v1027_v48  ;;  %v1287_v25 = vrot.slane %v1266_v61, 3 }
 0x162   :  { %v1314_v6 = vsel %vm166_vm1, %v1313_v17, %v1312_v1  ;;  %v965_v58 = vstv %s4337_s6  ;;  %v997_v3 = vsel %vm175_vm4, %v996_v45, %v995_v55  ;;  %v1286_v57 = vsel %vm175_vm4, %v1285_v54, %v1284_v11  ;;  %v4440_v1 = vld [vmem:[#allocation2 + $0x8] sm:$0xf]  ;;  %v4445_v55 = vld [vmem:[#allocation2 + $0xc] sm:$0xf]  ;;  %s4774_s6 = sld [smem:[#allocation12 + $0x10]] }
 0x163   :  { %v1299_v2 = vmul.f32 %v3706_v5, %v4285_v21  ;;  %v4385_v8 = vadd.f32 %v4280_v23, %v4306_v47  ;;  %v1032_v33 = vrot.slane %v1011_v35, 4  ;;  %v1252_v18 = vadd.f32 %v3949_v41, %v3970_v26 }
 0x164   :  { %v1317_v50 = vrot.slane %v1298_v4, 5  ;;  %v1031_v62 = vsel %vm175_vm4, %v1030_v53, %v1029_v28  ;;  %v1300_v27 = vmul.f32 %v3712_v0, %v4285_v21  ;;  %v1316_v5 = vsel %vm169_vm2, %v1315_v38, %v1314_v6  ;;  %v4454_v38 = vld [vmem:[#allocation2 + $0x10] sm:$0xf] }
 0x165   :  { %v4394_v43 = vstv %s4353_s21  ;;  %v4397_v29 = vadd.f32 %v4296_v46, %v937_v30  ;;  %v4400_v23 = vsel %vm178_vm5, %v998_v24, %v997_v3  ;;  %v1256_v41 = vadd.f32 %v3953_v20, %v3978_v14  ;;  %s4776_s21 = sld [smem:[#allocation15 + $0x10]] }
 0x166   :  { %v1288_v26 = vsel %vm178_vm5, %v1287_v25, %v1286_v57  ;;  %v1319_v47 = vrot.slane %v1299_v2, 4  ;;  %v5694_v32 = vrot.slane %v4011_v19, 2  ;;  %v5695_v0 = vrot.slane %v4060_v39, 2  ;;  %5719 = sst [smem:[#allocation32_spill]] %s4772_s5 }
 0x167   :  { %v1356_v15 = vstv %s4360_s29  ;;  %v4414_v46 = vstv %s4362_s14  ;;  %v4417_v49 = vsel %vm178_vm5, %v1032_v33, %v1031_v62  ;;  %v1318_v20 = vsel %vm172_vm3, %v1317_v50, %v1316_v5  ;;  %v4464_v33 = vld [vmem:[#allocation2 + $0x14] sm:$0xf]  ;;  %v4473_v5 = vld [vmem:[#allocation2 + $0x18] sm:$0xf]  ;;  %s4778_s29 = sld [smem:[#allocation12 + $0x1c]] }
 0x168   :  { %v1333_v21 = vsel %vm555_vm10, %v5695_v0, %v5694_v32  ;;  %v1391_v14 = vmul.f32 %v3991_v12, %v4394_v43  ;;  %v1392_v19 = vmul.f32 %v4422_v40, %v4394_v43  ;;  %v1290_v39 = vadd.f32 %v1288_v26, %v1252_v18  ;;  %5720 = sst [smem:[#allocation33_spill]] %s4774_s6  ;;  %s4780_s14 = sld [smem:[#allocation15 + $0x1c]] }
 0x169   :  { %v1321_v36 = vrot.slane %v1300_v27, 3  ;;  %v5696_v44 = vrot.slane %v4016_v13, 2  ;;  %v5697_v9 = vrot.slane %v4062_v10, 2  ;;  %v1357_v60 = vmul.f32 %v3991_v12, %v1356_v15 }
 0x16a   :  { %v1358_v61 = vmul.f32 %v4422_v40, %v1356_v15  ;;  %v1680_v17 = vmul.f32 %v3991_v12, %v4414_v46  ;;  %v1681_v45 = vmul.f32 %v4422_v40, %v4414_v46  ;;  %v1320_v48 = vsel %vm175_vm4, %v1319_v47, %v1318_v20  ;;  %v4478_v47 = vld [vmem:[#allocation2 + $0x1c] sm:$0xf] }
 0x16b   :  { %v1344_v31 = vsel %vm555_vm10, %v5697_v9, %v5696_v44  ;;  %v1352_v54 = vstv %s4381_s26  ;;  %v1359_v13 = vmul.f32 %v4440_v1, %v1356_v15  ;;  %v1393_v10 = vmul.f32 %v4440_v1, %v4394_v43  ;;  %5721 = sst [smem:[#allocation42_spill]] %s4776_s21 }
 0x16c   :  { %v4448_v35 = vmul.f32 %v4445_v55, %v1356_v15  ;;  %v1407_v11 = vrot.slane %v1391_v14, 3  ;;  %v1408_v4 = vrot.slane %v1392_v19, 2  ;;  %v1696_v30 = vrot.slane %v1680_v17, 2  ;;  %s4784_s26 = sld [smem:[#allocation15 + $0x28]] }
 0x16d   :  { %v4452_v53 = vadd.f32 %v1333_v21, %v1290_v39  ;;  %v4457_v24 = vmul.f32 %v4454_v38, %v1356_v15  ;;  %v1683_v28 = vmul.f32 %v4445_v55, %v4414_v46  ;;  %v1697_v25 = vrot.slane %v1681_v45, 1  ;;  %5722 = sst [smem:[#allocation43_spill]] %s4778_s29 }
 0x16e   :  { %v1322_v6 = vsel %vm178_vm5, %v1321_v36, %v1320_v48  ;;  %v1373_v3 = vrot.slane %v1357_v60, 3  ;;  %v1374_v57 = vrot.slane %v1358_v61, 2  ;;  %v1682_v2 = vmul.f32 %v4440_v1, %v4414_v46  ;;  %5723 = sst [smem:[#allocation44_spill]] %s4780_s14 }
 0x16f   :  { %v4467_v18 = vmul.f32 %v4464_v33, %v1356_v15  ;;  %v1410_v50 = vrot.slane %v1393_v10, 1  ;;  %v4470_v62 = vstv %s4411_s7  ;;  %v1698_v27 = vsel %vm160_vm6, %v1697_v25, %v1696_v30  ;;  %s4786_s7 = sld [smem:[#allocation12 + $0x7]] }
 0x170   :  { %v4476_v26 = vmul.f32 %v4473_v5, %v1356_v15  ;;  %v4481_v32 = vmul.f32 %v4478_v47, %v1356_v15  ;;  %v1409_v0 = vsel %vm160_vm6, %v1408_v4, %v1407_v11  ;;  %v1684_v21 = vmul.f32 %v4454_v38, %v4414_v46 }
 0x171   :  { %v1324_v20 = vadd.f32 %v1322_v6, %v1256_v41  ;;  %v1376_v14 = vrot.slane %v1359_v13, 1  ;;  %v1395_v19 = vmul.f32 %v4454_v38, %v4394_v43  ;;  %v1700_v39 = vrot.slane %v1683_v28, 7 }
 0x172   :  { %v1375_v36 = vsel %vm160_vm6, %v1374_v57, %v1373_v3  ;;  %v1394_v44 = vmul.f32 %v4445_v55, %v4394_v43  ;;  %v1646_v15 = vmul.f32 %v3991_v12, %v4470_v62  ;;  %v1699_v9 = vsel %vm163_vm0, %v1682_v2, %v1698_v27  ;;  %5725 = sst [smem:[#allocation35_spill]] %s4784_s26  ;;  %s4832_s26 = sld [smem:[#allocation15 + $0x2e]] }
 0x173   :  { %v1379_v60 = vrot.slane %v4457_v24, 7  ;;  %v1411_v61 = vsel %vm163_vm0, %v1410_v50, %v1409_v0  ;;  %v1647_v41 = vmul.f32 %v4422_v40, %v4470_v62  ;;  %v1685_v17 = vmul.f32 %v4464_v33, %v4414_v46 }
 0x174   :  { %v1381_v45 = vrot.slane %v4467_v18, 6  ;;  %v1396_v48 = vmul.f32 %v4464_v33, %v4394_v43  ;;  %v1702_v13 = vrot.slane %v1684_v21, 6  ;;  %v4504_v10 = vstv %s4450_s28  ;;  %s4788_s28 = sld [smem:[#allocation15 + $0x7]] }
 0x175   :  { %v4506_v11 = vadd.f32 %v1344_v31, %v1324_v20  ;;  %v1377_v4 = vsel %vm163_vm0, %v1376_v14, %v1375_v36  ;;  %v1413_v30 = vrot.slane %v1395_v19, 7  ;;  %v1701_v28 = vsel %vm166_vm1, %v1700_v39, %v1699_v9  ;;  %5726 = sst [smem:[#allocation36_spill]] %s4786_s7  ;;  %s4830_s7 = sld [smem:[#allocation12 + $0x2e]] }
 0x176   :  { %v1397_v25 = vmul.f32 %v4473_v5, %v4394_v43  ;;  %v1412_v6 = vsel %vm166_vm1, %v1394_v44, %v1411_v61  ;;  %v1662_v3 = vrot.slane %v1646_v15, 2  ;;  %v1686_v57 = vmul.f32 %v4473_v5, %v4414_v46 }
 0x177   :  { %v1663_v2 = vrot.slane %v1647_v41, 1  ;;  %v1704_v50 = vrot.slane %v1685_v17, 5  ;;  %v1778_v31 = vmul.f32 %v3991_v12, %v4504_v10  ;;  %v1779_v27 = vmul.f32 %v4422_v40, %v4504_v10 }
 0x178   :  { %v1398_v0 = vmul.f32 %v4478_v47, %v4394_v43  ;;  %v1415_v21 = vrot.slane %v1396_v48, 6  ;;  %v1703_v20 = vsel %vm169_vm2, %v1702_v13, %v1701_v28  ;;  %v1780_v14 = vmul.f32 %v4440_v1, %v4504_v10  ;;  %5749 = sst [smem:[#allocation69_spill]] %s4832_s26  ;;  %s4848_s26 = sld [smem:[#allocation16 + $0x1]] }
 0x179   :  { %v1414_v19 = vsel %vm169_vm2, %v1413_v30, %v1412_v6  ;;  %v1648_v39 = vmul.f32 %v4440_v1, %v4470_v62  ;;  %v1649_v36 = vmul.f32 %v4445_v55, %v4470_v62  ;;  %v1687_v44 = vmul.f32 %v4478_v47, %v4414_v46 }
 0x17a   :  { %v1706_v15 = vrot.slane %v1686_v57, 4  ;;  %v1782_v43 = vmul.f32 %v4454_v38, %v4504_v10  ;;  %v1794_v9 = vrot.slane %v1778_v31, 3  ;;  %v1795_v61 = vrot.slane %v1779_v27, 2  ;;  %5727 = sst [smem:[#allocation37_spill]] %s4788_s28  ;;  %s4828_s28 = sld [smem:[#allocation15 + $0x22]] }
 0x17b   :  { %v1664_v41 = vsel %vm160_vm6, %v1663_v2, %v1662_v3  ;;  %v1705_v17 = vsel %vm172_vm3, %v1704_v50, %v1703_v20  ;;  %v1781_v48 = vmul.f32 %v4445_v55, %v4504_v10  ;;  %v1797_v13 = vrot.slane %v1780_v14, 1  ;;  %5748 = sst [smem:[#allocation68_spill]] %s4830_s7  ;;  %s4846_s7 = sld [smem:[#allocation13 + $0x1]] }
 0x17c   :  { %v1416_v30 = vsel %vm172_vm3, %v1415_v21, %v1414_v19  ;;  %v1417_v28 = vrot.slane %v1397_v25, 5  ;;  %v1650_v46 = vmul.f32 %v4454_v38, %v4470_v62  ;;  %v1796_v6 = vsel %vm160_vm6, %v1795_v61, %v1794_v9 }
 0x17d   :  { %v1666_v57 = vrot.slane %v1649_v36, 7  ;;  %v1708_v37 = vrot.slane %v1687_v44, 3  ;;  %v1783_v31 = vmul.f32 %v4464_v33, %v4504_v10  ;;  %v1798_v3 = vsel %vm163_vm0, %v1797_v13, %v1796_v6 }
 0x17e   :  { %v1378_v2 = vsel %vm166_vm1, %v4448_v35, %v1377_v4  ;;  %v1665_v50 = vsel %vm163_vm0, %v1648_v39, %v1664_v41  ;;  %v1707_v25 = vsel %vm175_vm4, %v1706_v15, %v1705_v17  ;;  %v1800_v27 = vrot.slane %v1782_v43, 7  ;;  %v269_v4 = vpop.permute.xlu0 %268  ;;  %v279_v17 = vpop.permute.xlu1 %278  ;;  %5757 = sst [smem:[#allocation77_spill]] %s4848_s26 }
 0x17f   :  { %v1419_v21 = vrot.slane %v1398_v0, 4  ;;  %v4558_v20 = vmul.f32 %v4464_v33, %v4470_v62  ;;  %v4562_v14 = vmul.f32 %v4473_v5, %v4470_v62  ;;  %v1799_v35 = vsel %vm166_vm1, %v1781_v48, %v1798_v3 }
 0x180   :  { %v1418_v19 = vsel %vm175_vm4, %v1417_v28, %v1416_v30  ;;  %v1643_v39 = vadd.f32 %v3964_v16, %v3999_v22  ;;  %v1668_v0 = vrot.slane %v1650_v46, 6  ;;  %v1784_v36 = vmul.f32 %v4473_v5, %v4504_v10  ;;  %5747 = sst [smem:[#allocation67_spill]] %s4828_s28  ;;  %s4844_s28 = sld [smem:[#allocation16]] }
 0x181   :  { %v4575_v44 = vsel %vm169_vm2, %v1379_v60, %v1378_v2  ;;  %v1667_v15 = vsel %vm166_vm1, %v1666_v57, %v1665_v50  ;;  %v1709_v43 = vsel %vm178_vm5, %v1708_v37, %v1707_v25  ;;  %v1802_v9 = vrot.slane %v1783_v31, 6  ;;  %5756 = sst [smem:[#allocation76_spill]] %s4846_s7  ;;  %s4861_s7 = sld [smem:[#allocation12 + $0x18]] }
 0x182   :  { %v4583_v16 = vmul.f32 %v4478_v47, %v4470_v62  ;;  %v4586_v22 = vstv %s4531_s3  ;;  %v1801_v24 = vsel %vm169_vm2, %v1800_v27, %v1799_v35  ;;  %v4590_v60 = vsel %vm183_vm8, 0.0, %v269_v4  ;;  %s4790_s3 = sld [smem:[#allocation12 + $0x13]] }
 0x183   :  { %v1420_v37 = vsel %vm178_vm5, %v1419_v21, %v1418_v19  ;;  %v1670_v61 = vrot.slane %v4558_v20, 5  ;;  %v1672_v41 = vrot.slane %v4562_v14, 4  ;;  %v1785_v62 = vmul.f32 %v4478_v47, %v4504_v10 }
 0x184   :  { %v1669_v48 = vsel %vm169_vm2, %v1668_v0, %v1667_v15  ;;  %v1711_v13 = vadd.f32 %v1709_v43, %v1643_v39  ;;  %v5698_v30 = vrot.slane %v4020_v42, 2  ;;  %v5699_v28 = vrot.slane %v4066_v63, 2 }
 0x185   :  { %v1804_v6 = vrot.slane %v1784_v36, 5  ;;  %v1744_v57 = vmul.f32 %v3991_v12, %v4586_v22  ;;  %v1803_v31 = vsel %vm172_vm3, %v1802_v9, %v1801_v24  ;;  %v578_v10 = vmul.f32 %v577_v56, %v4590_v60 }
 0x186   :  { %v1731_v46 = vsel %vm555_vm10, %v5699_v28, %v5698_v30  ;;  %v661_v3 = vstv %s4546_s13  ;;  %v1739_v2 = vstv %s4552_s16  ;;  %v1745_v42 = vmul.f32 %v4422_v40, %v4586_v22  ;;  %v281_v40 = vpop.permute.xlu0 %280  ;;  %s4792_s13 = sld [smem:[#allocation15 + $0x13]]  ;;  %s4794_s16 = sld [smem:[#allocation12 + $0x1f]] }
 0x187   :  { %v1048_v63 = vstv %s4554_s17  ;;  %v4615_v50 = vsel %vm188_vm7, %v279_v17, 0.0  ;;  %v1746_v25 = vmul.f32 %v4440_v1, %v4586_v22  ;;  %v1806_v12 = vrot.slane %v1785_v62, 4  ;;  %s4796_s17 = sld [smem:[#allocation15 + $0x1f]]  ;;  %5755 = sst [smem:[#allocation75_spill]] %s4844_s28 }
 0x188   :  { %v579_v27 = vadd.f32 %v578_v10, %v4218_v59  ;;  %v1435_v21 = vstv %s4565_s2  ;;  %v1733_v20 = vadd.f32 %v1731_v46, %v1711_v13  ;;  %v1805_v56 = vsel %vm175_vm4, %v1804_v6, %v1803_v31  ;;  %5728 = sst [smem:[#allocation38_spill]] %s4790_s3  ;;  %s4798_s2 = sld [smem:[#allocation12 + $0x2b]] }
 0x189   :  { %v966_v35 = vmul.f32 %v965_v58, %v4590_v60  ;;  %v662_v4 = vmul.f32 %v661_v3, %v4615_v50  ;;  %v1760_v19 = vrot.slane %v1744_v57, 3  ;;  %v1353_v39 = vmul.f32 %v1352_v54, %v4590_v60  ;;  %s4826_s3 = sld [smem:[#allocation12 + $0x22]]  ;;  %s4863_s28 = sld [smem:[#allocation15 + $0x18]] }
 0x18a   :  { %v1822_v0 = vstv %s4579_s4  ;;  %v1049_v1 = vmul.f32 %v1048_v63, %v4615_v50  ;;  %v1761_v36 = vrot.slane %v1745_v42, 2  ;;  %v1740_v15 = vmul.f32 %v1739_v2, %v4590_v60  ;;  %s4800_s4 = sld [smem:[#allocation15 + $0x2b]]  ;;  %5760 = sst [smem:[#allocation80_spill]] %s4861_s7 }
 0x18b   :  { %v967_v59 = vadd.f32 %v966_v35, %v4397_v29  ;;  %v1436_v43 = vmul.f32 %v1435_v21, %v4615_v50  ;;  %v1807_v9 = vsel %vm178_vm5, %v1806_v12, %v1805_v56  ;;  %v647_v58 = vadd.f32 %v4254_v52, %v579_v27 }
 0x18c   :  { %v1354_v24 = vadd.f32 %v1353_v39, %v4506_v11  ;;  %v4638_v62 = vsel %vm188_vm7, %v281_v40, 0.0  ;;  %v1741_v54 = vadd.f32 %v1740_v15, %v1733_v20  ;;  %v666_v17 = vrot.slane %v662_v4, 3  ;;  %5729 = sst [smem:[#allocation45_spill]] %s4792_s13  ;;  %s4824_s13 = sld [smem:[#allocation15 + $0x16]] }
 0x18d   :  { %v1823_v13 = vmul.f32 %v1822_v0, %v4615_v50  ;;  %v663_v29 = vmul.f32 %v661_v3, %v4638_v62  ;;  %v1053_v30 = vrot.slane %v1049_v1, 3  ;;  %v1050_v28 = vmul.f32 %v1048_v63, %v4638_v62  ;;  %5730 = sst [smem:[#allocation46_spill]] %s4794_s16  ;;  %s4816_s16 = sld [smem:[#allocation15 + $0x26]] }
 0x18e   :  { %v1437_v46 = vmul.f32 %v1435_v21, %v4638_v62  ;;  %v1035_v52 = vadd.f32 %v4417_v49, %v967_v59  ;;  %v1440_v11 = vrot.slane %v1436_v43, 3  ;;  %v1824_v57 = vmul.f32 %v1822_v0, %v4638_v62  ;;  %5731 = sst [smem:[#allocation51_spill]] %s4796_s17  ;;  %s4818_s17 = sld [smem:[#allocation12 + $0xa]] }
 0x18f   :  { %v667_v6 = vrot.slane %v663_v29, 3  ;;  %v1763_v31 = vrot.slane %v1746_v25, 1  ;;  %v1422_v10 = vadd.f32 %v1420_v37, %v1354_v24  ;;  %v1054_v2 = vrot.slane %v1050_v28, 3  ;;  %v5700_v24 = vld [vmem:[#allocation48_spill] sm:$0xff]  ;;  %5732 = sst [smem:[#allocation52_spill]] %s4798_s2 }
 0x190   :  { %v1441_v42 = vrot.slane %v1437_v46, 3  ;;  %v1762_v3 = vsel %vm160_vm6, %v1761_v36, %v1760_v19  ;;  %v1827_v12 = vrot.slane %v1823_v13, 3  ;;  %v1828_v63 = vrot.slane %v1824_v57, 3  ;;  %5733 = sst [smem:[#allocation53_spill]] %s4800_s4  ;;  %s4820_s4 = sld [smem:[#allocation15 + $0xa]] }
 0x191   :  { %v668_v27 = vsel %vm654_vm11, %v666_v17, %v667_v6  ;;  %v1671_v21 = vsel %vm172_vm3, %v1670_v61, %v1669_v48  ;;  %v1809_v49 = vadd.f32 %v1807_v9, %v1741_v54  ;;  %v1055_v56 = vsel %vm654_vm11, %v1053_v30, %v1054_v2  ;;  %v5701_v54 = vld [vmem:[#allocation47_spill] sm:$0xff]  ;;  %v5705_v2 = vld [vmem:[#allocation50_spill] sm:$0xff]  ;;  %s4822_s2 = sld [smem:[#allocation12 + $0x16]]  ;;  %5746 = sst [smem:[#allocation66_spill]] %s4826_s3 }
 0x192   :  { %v670_v20 = vadd.f32 %v668_v27, %v647_v58  ;;  %v1747_v35 = vmul.f32 %v4445_v55, %v4586_v22  ;;  %v1748_v37 = vmul.f32 %v4454_v38, %v4586_v22  ;;  %v1057_v25 = vadd.f32 %v1055_v56, %v1035_v52  ;;  %5745 = sst [smem:[#allocation65_spill]] %s4824_s13  ;;  %s4842_s3 = sld [smem:[#allocation13]] }
 0x193   :  { %v1442_v4 = vsel %vm654_vm11, %v1440_v11, %v1441_v42  ;;  %v1674_v40 = vrot.slane %v4583_v16, 3  ;;  %v1764_v61 = vsel %vm163_vm0, %v1763_v31, %v1762_v3  ;;  %v1673_v39 = vsel %vm175_vm4, %v1672_v41, %v1671_v21  ;;  %5741 = sst [smem:[#allocation61_spill]] %s4816_s16  ;;  %s4853_s13 = sld [smem:[#allocation13 + $0x2]] }
 0x194   :  { %v671_v48 = vmul.f32 0.5, %v670_v20  ;;  %v1444_v19 = vadd.f32 %v1442_v4, %v1422_v10  ;;  %v649_v55 = vstv %s4640_s1  ;;  %v1058_v0 = vmul.f32 0.5, %v1057_v25  ;;  %v5703_v10 = vld [vmem:[#allocation49_spill] sm:$0xff]  ;;  %s4802_s1 = sld [smem:[#allocation12 + $0x2]]  ;;  %5742 = sst [smem:[#allocation62_spill]] %s4818_s17 }
 0x195   :  { %v1829_v38 = vsel %vm654_vm11, %v1827_v12, %v1828_v63  ;;  %v1749_v1 = vmul.f32 %v4464_v33, %v4586_v22  ;;  %v1765_v16 = vsel %vm166_vm1, %v1747_v35, %v1764_v61  ;;  %v1766_v15 = vrot.slane %v1748_v37, 7  ;;  %s4834_s17 = sld [smem:[#allocation12]]  ;;  %5761 = sst [smem:[#allocation81_spill]] %s4863_s28 }
 0x196   :  { %2662 = vtanh.f32 %v671_v48  ;;  %v1445_v36 = vmul.f32 0.5, %v1444_v19  ;;  %v1831_v59 = vadd.f32 %v1829_v38, %v1809_v49  ;;  %v1037_v43 = vstv %s4647_s22  ;;  %s4804_s22 = sld [smem:[#allocation15 + $0x2]]  ;;  %5743 = sst [smem:[#allocation63_spill]] %s4820_s4 }
 0x197   :  { %2664 = vtanh.f32 %v1058_v0  ;;  %v650_v14 = vmul.f32 %v649_v55, %v4615_v50  ;;  %v651_v41 = vmul.f32 %v649_v55, %v4638_v62  ;;  %v1383_v33 = vrot.slane %v4476_v26, 5  ;;  %5744 = sst [smem:[#allocation64_spill]] %s4822_s2  ;;  %s4836_s4 = sld [smem:[#allocation15]] }
 0x198   :  { %2666 = vtanh.f32 %v1445_v36  ;;  %v1832_v9 = vmul.f32 0.5, %v1831_v59  ;;  %v1385_v58 = vrot.slane %v4481_v32, 4  ;;  %v1639_v17 = vadd.f32 %v5701_v54, %v5700_v24  ;;  %s4838_s2 = sld [smem:[#allocation12 + $0xc]]  ;;  %s5767_s16 = sld [smem:[#allocation35_spill]] }
 0x199   :  { %v5702_v13 = vstv %s4094_s15  ;;  %v1382_v30 = vsel %vm172_vm3, %v1381_v45, %v4575_v44  ;;  %v1675_v28 = vsel %vm178_vm5, %v1674_v40, %v1673_v39  ;;  %v1750_v26 = vmul.f32 %v4473_v5, %v4586_v22  ;;  %s4758_s15 = sld [smem:[#allocation12 + $0xd]]  ;;  %5754 = sst [smem:[#allocation74_spill]] %s4842_s3 }
 0x19a   :  { %v574_v29 = vmul.f32 %v5702_v13, %v4590_v60  ;;  %v1768_v32 = vrot.slane %v1749_v1, 6  ;;  %v1767_v46 = vsel %vm169_vm2, %v1766_v15, %v1765_v16  ;;  %v1424_v11 = vstv %s4658_s0  ;;  %5734 = sst [smem:[#allocation54_spill]] %s4802_s1  ;;  %s4806_s0 = sld [smem:[#allocation12 + $0xe]] }
 0x19b   :  { %v1038_v6 = vmul.f32 %v1037_v43, %v4615_v50  ;;  %v655_v57 = vrot.slane %v650_v14, 3  ;;  %v656_v18 = vrot.slane %v651_v41, 3  ;;  %v1039_v31 = vmul.f32 %v1037_v43, %v4638_v62  ;;  %5750 = sst [smem:[#allocation70_spill]] %s4834_s17 }
 0x19c   :  { %v575_v52 = vadd.f32 %v574_v29, %v4215_v51  ;;  %2668 = vtanh.f32 %v1832_v9  ;;  %v1384_v45 = vsel %vm175_vm4, %v1383_v33, %v1382_v30  ;;  %v1677_v44 = vadd.f32 %v1675_v28, %v1639_v17  ;;  %5735 = sst [smem:[#allocation55_spill]] %s4804_s22 }
 0x19d   :  { %v5704_v5 = vrot.slane %v5703_v10, 2  ;;  %v5706_v42 = vrot.slane %v5705_v2, 2  ;;  %v962_v51 = vmul.f32 %v961_v34, %v4590_v60  ;;  %v1751_v12 = vmul.f32 %v4478_v47, %v4586_v22  ;;  %5751 = sst [smem:[#allocation71_spill]] %s4836_s4 }
 0x19e   :  { %v1769_v27 = vsel %vm172_vm3, %v1768_v32, %v1767_v46  ;;  %v1770_v63 = vrot.slane %v1750_v26, 5  ;;  %v5707_v21 = vstv %s4372_s25  ;;  %v613_v20 = vadd.f32 %v4221_v7, %v575_v52  ;;  %s4782_s25 = sld [smem:[#allocation12 + $0x28]]  ;;  %5752 = sst [smem:[#allocation72_spill]] %s4838_s2 }
 0x19f   :  { %v1720_v3 = vsel %vm555_vm10, %v5706_v42, %v5704_v5  ;;  %v1349_v49 = vmul.f32 %v5707_v21, %v4590_v60  ;;  %v963_v56 = vadd.f32 %v962_v51, %v4385_v8  ;;  %v1811_v35 = vstv %s4672_s19  ;;  %5712 = sst [smem:[#allocation28_spill]] %s4758_s15  ;;  %s4808_s19 = sld [smem:[#allocation15 + $0xe]] }
 0x1a0   :  { %v1425_v37 = vmul.f32 %v1424_v11, %v4615_v50  ;;  %v2663_v25 = vpop.eup %2662  ;;  %v1042_v4 = vrot.slane %v1038_v6, 3  ;;  %v657_v34 = vsel %vm654_vm11, %v655_v57, %v656_v18  ;;  %v1043_v40 = vrot.slane %v1039_v31, 3  ;;  %5736 = sst [smem:[#allocation56_spill]] %s4806_s0 }
 0x1a1   :  { %v1426_v47 = vmul.f32 %v1424_v11, %v4638_v62  ;;  %v2665_v22 = vpop.eup %2664  ;;  %v1386_v61 = vsel %vm178_vm5, %v1385_v58, %v1384_v45  ;;  %v1722_v48 = vadd.f32 %v1720_v3, %v1677_v44  ;;  %v1735_v19 = vstv %s4680_s18  ;;  %s4810_s18 = sld [smem:[#allocation12 + $0x1a]]  ;;  %5758 = sst [smem:[#allocation78_spill]] %s4853_s13 }
 0x1a2   :  { %v673_v39 = vadd.f32 1.0, %v2663_v25  ;;  %v2667_v55 = vpop.eup %2666  ;;  %v1771_v7 = vsel %vm175_vm4, %v1770_v63, %v1769_v27  ;;  %v1772_v8 = vrot.slane %v1751_v12, 4  ;;  %v1350_v0 = vadd.f32 %v1349_v49, %v4452_v53 }
 0x1a3   :  { %v1060_v38 = vadd.f32 1.0, %v2665_v22  ;;  %v1001_v1 = vadd.f32 %v4400_v23, %v963_v56  ;;  %v1812_v36 = vmul.f32 %v1811_v35, %v4615_v50  ;;  %v659_v59 = vadd.f32 %v657_v34, %v613_v20 }
 0x1a4   :  { %v674_v16 = vmul.f32 0.5, %v673_v39  ;;  %v1429_v15 = vrot.slane %v1425_v37, 3  ;;  %v1044_v43 = vsel %vm654_vm11, %v1042_v4, %v1043_v40  ;;  %v1430_v14 = vrot.slane %v1426_v47, 3  ;;  %5724 = sst [smem:[#allocation34_spill]] %s4782_s25  ;;  %s4840_s25 = sld [smem:[#allocation15 + $0xc]] }
 0x1a5   :  { %v1813_v41 = vmul.f32 %v1811_v35, %v4638_v62  ;;  %v1736_v9 = vmul.f32 %v1735_v19, %v4590_v60  ;;  %v1061_v58 = vmul.f32 0.5, %v1060_v38  ;;  %v1447_v24 = vadd.f32 1.0, %v2667_v55  ;;  %5737 = sst [smem:[#allocation57_spill]] %s4808_s19 }
 0x1a6   :  { %v4727_v33 = vmul.f32 %v674_v16, %v659_v59  ;;  %v2669_v53 = vpop.eup %2668  ;;  %v1388_v54 = vadd.f32 %v1386_v61, %v1350_v0  ;;  %v1046_v23 = vadd.f32 %v1044_v43, %v1001_v1  ;;  %v1773_v50 = vsel %vm178_vm5, %v1772_v8, %v1771_v7 }
 0x1a7   :  { %v1737_v17 = vadd.f32 %v1736_v9, %v1722_v48  ;;  %v1816_v13 = vrot.slane %v1812_v36, 3  ;;  %v1431_v62 = vsel %vm654_vm11, %v1429_v15, %v1430_v14  ;;  %v1817_v60 = vrot.slane %v1813_v41, 3  ;;  %5738 = sst [smem:[#allocation58_spill]] %s4810_s18 }
 0x1a8   :  { %1842 = vrot.lane.b32.xlu0 %v4727_v33, %s5708_s12  ;;  %1838 = vrot.lane.b32.xlu1 %v4727_v33, %s5709_s9  ;;  %v4735_v29 = vmul.f32 %v1061_v58, %v1046_v23  ;;  %v1448_v30 = vmul.f32 0.5, %v1447_v24  ;;  %v1834_v28 = vadd.f32 1.0, %v2669_v53  ;;  %v1433_v32 = vadd.f32 %v1431_v62, %v1388_v54 }
 0x1a9   :  { %v1775_v26 = vadd.f32 %v1773_v50, %v1737_v17  ;;  %v1818_v46 = vsel %vm654_vm11, %v1816_v13, %v1817_v60  ;;  %v1894_v18 = vstv %s4802_s1  ;;  %v1898_v31 = vstv %s4804_s22  ;;  %s5768_s22 = sld [smem:[#allocation36_spill]]  ;;  %s5769_s1 = sld [smem:[#allocation37_spill]] }
 0x1aa   :  { %v4742_v52 = vmul.f32 %v1448_v30, %v1433_v32  ;;  %v1835_v11 = vmul.f32 0.5, %v1834_v28  ;;  %5753 = sst [smem:[#allocation73_spill]] %s4840_s25  ;;  %v1999_v45 = vstv %s4806_s0  ;;  %s4855_s25 = sld [smem:[#allocation16 + $0x2]]  ;;  %v2003_v44 = vstv %s4808_s19 }
 0x1ab   :  { %v1820_v6 = vadd.f32 %v1818_v46, %v1775_v26  ;;  %v2104_v10 = vstv %s4810_s18  ;;  %v1886_v3 = vstv %s4754_s10  ;;  %v1890_v51 = vstv %s4756_s30  ;;  %s4869_s0 = sld [smem:[#allocation13 + $0x3]]  ;;  %s4878_s18 = sld [smem:[#allocation15 + $0x24]] }
 0x1ac   :  { %1851 = vrot.lane.b32.xlu0 %v4735_v29, %s5708_s12  ;;  %1847 = vrot.lane.b32.xlu1 %v4735_v29, %s5709_s9  ;;  %v1991_v12 = vstv %s4758_s15  ;;  %s4871_s19 = sld [smem:[#allocation16 + $0x3]]  ;;  %v1995_v27 = vstv %s4760_s8  ;;  %s4882_s15 = sld [smem:[#allocation12 + $0x5]]  ;;  %v4964_v26 = vmul.f32 %v1886_v3, %v4727_v33  ;;  %v4969_v32 = vmul.f32 %v1890_v51, %v4727_v33 }
 0x1ad   :  { %v4748_v57 = vmul.f32 %v1835_v11, %v1820_v6  ;;  %v2096_v63 = vstv %s4762_s20  ;;  %v2100_v21 = vstv %s4764_s23  ;;  %v2201_v49 = vstv %s4766_s11  ;;  %s5771_s30 = sld [smem:[#allocation38_spill]]  ;;  %s4884_s10 = sld [smem:[#allocation15 + $0x5]] }
 0x1ae   :  { %v2205_v20 = vstv %s4768_s24  ;;  %v1910_v56 = vstv %s4770_s27  ;;  %v1914_v35 = vstv %s4772_s5  ;;  %v2015_v37 = vstv %s4774_s6  ;;  %s4889_s23 = sld [smem:[#allocation12 + $0x11]]  ;;  %s5774_s20 = sld [smem:[#allocation45_spill]] }
 0x1af   :  { %s4891_s8 = sld [smem:[#allocation15 + $0x11]]  ;;  %v2019_v25 = vstv %s4776_s21  ;;  %v2120_v4 = vstv %s4778_s29  ;;  %s5777_s24 = sld [smem:[#allocation73_spill]]  ;;  %v2124_v34 = vstv %s4780_s14  ;;  %v2229_v47 = vstv %s5767_s16 }
 0x1b0   :  { %1860 = vrot.lane.b32.xlu0 %v4742_v52, %s5708_s12  ;;  %1856 = vrot.lane.b32.xlu1 %v4742_v52, %s5709_s9  ;;  %5759 = sst [smem:[#allocation79_spill]] %s4855_s25  ;;  %s4897_s11 = sld [smem:[#allocation12 + $0x1d]]  ;;  %v1934_v22 = vstv %s5768_s22  ;;  %v1938_v61 = vstv %s5769_s1  ;;  %v4974_v46 = vmul.f32 %v1991_v12, %v4727_v33  ;;  %v4984_v6 = vmul.f32 %v1995_v27, %v4727_v33 }
 0x1b1   :  { %5762 = sst [smem:[#allocation82_spill]] %s4869_s0  ;;  %s5781_s27 = sld [smem:[#allocation52_spill]]  ;;  %v1878_v19 = vstv %s4834_s17  ;;  %v1882_v39 = vstv %s4836_s4  ;;  %v1983_v8 = vstv %s4838_s2  ;;  %v1874_v36 = vstv %s4842_s3 }
 0x1b2   :  { %5763 = sst [smem:[#allocation83_spill]] %s4871_s19  ;;  %s5783_s5 = sld [smem:[#allocation53_spill]]  ;;  %v1981_v14 = vstv %s4848_s26  ;;  %v2084_v58 = vstv %s4853_s13  ;;  %v2086_v24 = vstv %s4855_s25  ;;  %v2088_v17 = vstv %s4861_s7 }
 0x1b3   :  { %5766 = sst [smem:[#allocation85_spill]] %s4878_s18  ;;  %s5776_s18 = sld [smem:[#allocation46_spill]]  ;;  %v2039_v48 = vstv %s5771_s30  ;;  %v2092_v23 = vstv %s4863_s28  ;;  %v2189_v50 = vstv %s4869_s0  ;;  %v2191_v13 = vstv %s4871_s19 }
 0x1b4   :  { %1869 = vrot.lane.b32.xlu0 %v4748_v57, %s5708_s12  ;;  %1865 = vrot.lane.b32.xlu1 %v4748_v57, %s5709_s9  ;;  %s4812_s12 = sld [smem:[#allocation15 + $0x1a]]  ;;  %s4814_s9 = sld [smem:[#allocation12 + $0x26]]  ;;  %v2043_v55 = vstv %s5774_s20  ;;  %v4989_v3 = vmul.f32 %v2096_v63, %v4727_v33  ;;  %v4994_v51 = vmul.f32 %v2100_v21, %v4727_v33  ;;  %v4999_v12 = vmul.f32 %v2201_v49, %v4727_v33 }
 0x1b5   :  { %5770 = sst [smem:[#allocation86_spill]] %s4882_s15  ;;  %s4899_s15 = sld [smem:[#allocation15 + $0x1d]]  ;;  %v1987_v0 = vstv %s5777_s24  ;;  %v5008_v27 = vmul.f32 %v2205_v20, %v4727_v33  ;;  %v5029_v20 = vmul.f32 %v1910_v56, %v4735_v29  ;;  %v5034_v21 = vmul.f32 %v1914_v35, %v4735_v29 }
 0x1b6   :  { %5772 = sst [smem:[#allocation87_spill]] %s4884_s10  ;;  %s5779_s10 = sld [smem:[#allocation51_spill]]  ;;  %v5045_v49 = vmul.f32 %v2015_v37, %v4735_v29  ;;  %v5050_v56 = vmul.f32 %v2019_v25, %v4735_v29  ;;  %v5061_v63 = vmul.f32 %v2120_v4, %v4735_v29  ;;  %v5066_v37 = vmul.f32 %v2124_v34, %v4735_v29 }
 0x1b7   :  { %5773 = sst [smem:[#allocation88_spill]] %s4889_s23  ;;  %s5782_s6 = sld [smem:[#allocation75_spill]]  ;;  %v2249_v1 = vstv %s5781_s27  ;;  %v5082_v4 = vmul.f32 %v2229_v47, %v4735_v29  ;;  %v5114_v30 = vmul.f32 %v1938_v61, %v4742_v52  ;;  %v5119_v34 = vmul.f32 %v2039_v48, %v4742_v52 }
 0x1b8   :  { %5775 = sst [smem:[#allocation89_spill]] %s4891_s8  ;;  %s5784_s21 = sld [smem:[#allocation62_spill]]  ;;  %v2253_v16 = vstv %s5783_s5  ;;  %v5130_v61 = vmul.f32 %v2043_v55, %v4742_v52  ;;  %v5150_v55 = vmul.f32 %v2249_v1, %v4742_v52 }
 0x1b9   :  { %5778 = sst [smem:[#allocation90_spill]] %s4897_s11  ;;  %s4907_s29 = sld [smem:[#allocation12 + $0x29]]  ;;  %v2144_v7 = vstv %s5776_s18 }
 0x1ba   :  { %5739 = sst [smem:[#allocation59_spill]] %s4812_s12  ;;  %s4876_s12 = sld [smem:[#allocation12 + $0x24]]  ;;  %v5135_v48 = vmul.f32 %v2144_v7, %v4742_v52 }
 0x1bb   :  { %5740 = sst [smem:[#allocation60_spill]] %s4814_s9  ;;  %s5764_s9 = sld [smem:[#allocation34_spill]] }
 0x1bc   :  { %5780 = sst [smem:[#allocation91_spill]] %s4899_s15  ;;  %s5786_s14 = sld [smem:[#allocation76_spill]]  ;;  %v2148_v38 = vstv %s5779_s10 }
 0x1bd   :  { %s5788_s15 = sld [smem:[#allocation63_spill]]  ;;  %s5789_s16 = sld [smem:[#allocation64_spill]]  ;;  %v1876_v59 = vstv %s5782_s6  ;;  %v5145_v47 = vmul.f32 %v2148_v38, %v4742_v52 }
 0x1be   :  { %s4915_s22 = sld [smem:[#allocation12 + $0x3]]  ;;  %s5793_s17 = sld [smem:[#allocation66_spill]]  ;;  %v1958_v15 = vstv %s5784_s21 }
 0x1bf   :  { %5785 = sst [smem:[#allocation92_spill]] %s4907_s29  ;;  %s4917_s30 = sld [smem:[#allocation15 + $0x3]] }
 0x1c0   :  { %5765 = sst [smem:[#allocation84_spill]] %s4876_s12  ;;  %s5792_s4 = sld [smem:[#allocation65_spill]]  ;;  %v2193_v62 = vstv %s4876_s12 }
 0x1c1   :  { %v2225_v40 = vstv %s5764_s9  ;;  %s4909_s9 = sld [smem:[#allocation15 + $0x29]]  ;;  %s4923_s1 = sld [smem:[#allocation12 + $0xf]] }
 0x1c2   :  { %s4925_s18 = sld [smem:[#allocation15 + $0xf]]  ;;  %v1979_v43 = vstv %s5786_s14  ;;  %s4931_s24 = sld [smem:[#allocation12 + $0x1b]]  ;;  %v5077_v11 = vmul.f32 %v2225_v40, %v4735_v29  ;;  %v5095_v40 = vmul.f32 %v1934_v22, %v4742_v52  ;;  %v5158_v22 = vmul.f32 %v2253_v16, %v4742_v52 }
 0x1c3   :  { %s4933_s2 = sld [smem:[#allocation15 + $0x1b]]  ;;  %s5798_s3 = sld [smem:[#allocation85_spill]]  ;;  %v1962_v41 = vstv %s5788_s15  ;;  %v2063_v9 = vstv %s5789_s16  ;;  %v5163_v29 = vmul.f32 %v1958_v15, %v4748_v57 }
 0x1c4   :  { %5790 = sst [smem:[#allocation94_spill]] %s4915_s22  ;;  %s5800_s27 = sld [smem:[#allocation67_spill]]  ;;  %v2168_v54 = vstv %s5793_s17  ;;  %v5169_v1 = vmul.f32 %v1962_v41, %v4748_v57  ;;  %v5174_v7 = vmul.f32 %v2063_v9, %v4748_v57 }
 0x1c5   :  { %5791 = sst [smem:[#allocation95_spill]] %s4917_s30  ;;  %s4939_s10 = sld [smem:[#allocation12 + $0x27]]  ;;  %v5184_v16 = vmul.f32 %v2168_v54, %v4748_v57 }
 0x1c6   :  { %s4941_s20 = sld [smem:[#allocation15 + $0x27]]  ;;  %v2067_v53 = vstv %s5792_s4  ;;  %s4949_s16 = sld [smem:[#allocation12 + $0x8]] }
 0x1c7   :  { %5787 = sst [smem:[#allocation93_spill]] %s4909_s9  ;;  %s4951_s13 = sld [smem:[#allocation15 + $0x8]]  ;;  %v5179_v52 = vmul.f32 %v2067_v53, %v4748_v57 }
 0x1c8   :  { %5794 = sst [smem:[#allocation96_spill]] %s4923_s1  ;;  %s4956_s4 = sld [smem:[#allocation12 + $0x14]] }
 0x1c9   :  { %5795 = sst [smem:[#allocation97_spill]] %s4925_s18  ;;  %v2197_v60 = vstv %s5798_s3  ;;  %s4958_s17 = sld [smem:[#allocation15 + $0x14]] }
 0x1ca   :  { %5796 = sst [smem:[#allocation98_spill]] %s4931_s24  ;;  %v2172_v28 = vstv %s5800_s27  ;;  %s4977_s19 = sld [smem:[#allocation12 + $0x20]] }
 0x1cb   :  { %5797 = sst [smem:[#allocation99_spill]] %s4933_s2  ;;  %s4979_s0 = sld [smem:[#allocation15 + $0x20]]  ;;  %v5189_v15 = vmul.f32 %v2172_v28, %v4748_v57 }
 0x1cc   :  { %5801 = sst [smem:[#allocation67_spill]] %s4939_s10  ;;  %s5001_s21 = sld [smem:[#allocation12 + $0x2c]] }
 0x1cd   :  { %5803 = sst [smem:[#allocation26_spill]] %s4941_s20  ;;  %s5003_s2 = sld [smem:[#allocation15 + $0x2c]] }
 0x1ce   :  { %5809 = sst [smem:[#allocation27_spill]] %s4949_s16  ;;  %s5013_s10 = sld [smem:[#allocation12 + $0x6]] }
 0x1cf   :  { %5811 = sst [smem:[#allocation28_spill]] %s4951_s13  ;;  %s5015_s14 = sld [smem:[#allocation15 + $0x6]] }
 0x1d0   :  { %5814 = sst [smem:[#allocation29_spill]] %s4956_s4  ;;  %s5021_s12 = sld [smem:[#allocation12 + $0x12]] }
 0x1d1   :  { %5815 = sst [smem:[#allocation30_spill]] %s4958_s17  ;;  %s5023_s23 = sld [smem:[#allocation15 + $0x12]] }
 0x1d2   :  { %5817 = sst [smem:[#allocation39_spill]] %s4977_s19  ;;  %s5037_s6 = sld [smem:[#allocation12 + $0x1e]] }
 0x1d3   :  { %5818 = sst [smem:[#allocation40_spill]] %s4979_s0  ;;  %s5053_s5 = sld [smem:[#allocation12 + $0x2a]] }
 0x1d4   :  { %5820 = sst [smem:[#allocation41_spill]] %s5001_s21  ;;  %s5039_s22 = sld [smem:[#allocation15 + $0x1e]] }
 0x1d5   :  { %5822 = sst [smem:[#allocation31_spill]] %s5003_s2  ;;  %s5055_s26 = sld [smem:[#allocation15 + $0x2a]] }
 0x1d6   :  { %5824 = sst [smem:[#allocation32_spill]] %s5013_s10  ;;  %s5069_s15 = sld [smem:[#allocation15 + $0xb]] }
 0x1d7   :  { %5826 = sst [smem:[#allocation33_spill]] %s5015_s14  ;;  %s5085_s28 = sld [smem:[#allocation15 + $0x23]] }
 0x1d8   :  { %s5071_s25 = sld [smem:[#allocation15 + $0x17]]  ;;  %s5097_s11 = sld [smem:[#allocation12 + $0x9]] }
 0x1d9   :  { %s5087_s8 = sld [smem:[#allocation15 + $0x2f]]  ;;  %s5099_s16 = sld [smem:[#allocation15 + $0x9]] }
 0x1da   :  { %s5105_s4 = sld [smem:[#allocation12 + $0x15]]  ;;  %s5846_s24 = sld [smem:[#allocation68_spill]] }
 0x1db   :  { %s5107_s1 = sld [smem:[#allocation15 + $0x15]]  ;;  %s5121_s0 = sld [smem:[#allocation12 + $0x21]] }
 0x1dc   :  { %5835 = sst [smem:[#allocation42_spill]] %s5069_s15  ;;  %s5123_s19 = sld [smem:[#allocation15 + $0x21]] }
 0x1dd   :  { %5837 = sst [smem:[#allocation44_spill]] %s5085_s28  ;;  %s5137_s14 = sld [smem:[#allocation12 + $0x2d]] }
 0x1de   :  { %5836 = sst [smem:[#allocation43_spill]] %s5071_s25  ;;  %s5139_s30 = sld [smem:[#allocation15 + $0x2d]] }
 0x1df   :  { %5839 = sst [smem:[#allocation34_spill]] %s5087_s8  ;;  %s5876_s13 = sld [smem:[#allocation59_spill]] }
 0x1e0   :  { %5842 = sst [smem:[#allocation35_spill]] %s5099_s16  ;;  %v2273_v42 = vstv %s5846_s24  ;;  %s5877_s17 = sld [smem:[#allocation60_spill]] }
 0x1e1   :  { %v5192_v41 = vmul.f32 %v2273_v42, %v4748_v57  ;;  %s5878_s27 = sld [smem:[#allocation61_spill]]  ;;  %s5879_s8 = sld [smem:[#allocation86_spill]] }
 0x1e2   :  { %s5880_s7 = sld [smem:[#allocation87_spill]]  ;;  %s5882_s15 = sld [smem:[#allocation94_spill]] }
 0x1e3   :  { %5853 = sst [smem:[#allocation36_spill]] %s5137_s14  ;;  %s5883_s16 = sld [smem:[#allocation95_spill]] }
 0x1e4   :  { %s5884_s25 = sld [smem:[#allocation96_spill]]  ;;  %s5885_s28 = sld [smem:[#allocation97_spill]] }
 0x1e5   :  { %s5888_s14 = sld [smem:[#allocation98_spill]]  ;;  %s5889_s18 = sld [smem:[#allocation99_spill]] }
 0x1e6   :  { %s5896_s21 = sld [smem:[#allocation67_spill]]  ;;  %s5898_s2 = sld [smem:[#allocation26_spill]] }
 0x1e7   :  { %s5900_s10 = sld [smem:[#allocation88_spill]]  ;;  %s5901_s9 = sld [smem:[#allocation89_spill]] }
 0x1e8   :  { %s5902_s20 = sld [smem:[#allocation90_spill]]  ;;  %s5903_s3 = sld [smem:[#allocation91_spill]] }
 0x1e9   :  { %s5904_s24 = sld [smem:[#allocation92_spill]]  ;;  %s5905_s29 = sld [smem:[#allocation93_spill]] }
 0x21a   :  { %v1843_v38 = vpop.permute.xlu0 %1842  ;;  %v1839_v53 = vpop.permute.xlu1 %1838 }
 0x21b   :  { %v1845_v28 = vsel %vm188_vm7, %v1843_v38, 0.0  ;;  %v1841_v42 = vsel %vm183_vm8, 0.0, %v1839_v53 }
 0x21c   :  { %v1895_v33 = vmul.f32 %v1894_v18, %v1845_v28  ;;  %v1899_v38 = vmul.f32 %v1898_v31, %v1845_v28  ;;  %v1879_v2 = vmul.f32 %v1878_v19, %v1841_v42  ;;  %v1883_v5 = vmul.f32 %v1882_v39, %v1841_v42 }
 0x21d   :  { %v1984_v35 = vmul.f32 %v1983_v8, %v1841_v42  ;;  %v1988_v54 = vmul.f32 %v1987_v0, %v1841_v42  ;;  %v2089_v25 = vmul.f32 %v2088_v17, %v1841_v42  ;;  %v2093_v18 = vmul.f32 %v2092_v23, %v1841_v42 }
 0x21e   :  { %v2194_v31 = vmul.f32 %v2193_v62, %v1841_v42  ;;  %v2198_v9 = vmul.f32 %v2197_v60, %v1841_v42  ;;  %v1880_v19 = vadd.f32 %v1879_v2, %v1874_v36  ;;  %v1884_v39 = vadd.f32 %v1883_v5, %v1876_v59  ;;  %v1852_v60 = vpop.permute.xlu0 %1851  ;;  %v1848_v42 = vpop.permute.xlu1 %1847 }
 0x21f   :  { %v1985_v8 = vadd.f32 %v1984_v35, %v1979_v43  ;;  %v1989_v0 = vadd.f32 %v1988_v54, %v1981_v14  ;;  %v2000_v17 = vmul.f32 %v1999_v45, %v1845_v28  ;;  %v2004_v53 = vmul.f32 %v2003_v44, %v1845_v28 }
 0x220   :  { %v2090_v23 = vadd.f32 %v2089_v25, %v2084_v58  ;;  %v2094_v62 = vadd.f32 %v2093_v18, %v2086_v24  ;;  %v1888_v2 = vadd.f32 %v4964_v26, %v1880_v19  ;;  %v1892_v5 = vadd.f32 %v4969_v32, %v1884_v39 }
 0x221   :  { %v2195_v36 = vadd.f32 %v2194_v31, %v2189_v50  ;;  %v2199_v59 = vadd.f32 %v2198_v9, %v2191_v13  ;;  %v2105_v45 = vmul.f32 %v2104_v10, %v1845_v28  ;;  %v5881_v44 = vstv %s5876_s13  ;;  %s5908_s13 = sld [smem:[#allocation27_spill]] }
 0x222   :  { %v2109_v43 = vmul.f32 %v5881_v44, %v1845_v28  ;;  %v1993_v14 = vadd.f32 %v4974_v46, %v1985_v8  ;;  %v1997_v58 = vadd.f32 %v4984_v6, %v1989_v0  ;;  %v2098_v24 = vadd.f32 %v4989_v3, %v2090_v23 }
 0x223   :  { %v2102_v26 = vadd.f32 %v4994_v51, %v2094_v62  ;;  %v1854_v50 = vsel %vm188_vm7, %v1852_v60, 0.0  ;;  %v1850_v13 = vsel %vm183_vm8, 0.0, %v1848_v42  ;;  %v5886_v32 = vstv %s5877_s17  ;;  %s5910_s17 = sld [smem:[#allocation28_spill]] }
 0x224   :  { %v2210_v10 = vmul.f32 %v5886_v32, %v1845_v28  ;;  %v5887_v35 = vstv %s5878_s27  ;;  %v1896_v9 = vadd.f32 %v1895_v33, %v1888_v2  ;;  %v1900_v54 = vadd.f32 %v1899_v38, %v1892_v5  ;;  %s5911_s27 = sld [smem:[#allocation32_spill]] }
 0x225   :  { %v2214_v25 = vmul.f32 %v5887_v35, %v1845_v28  ;;  %v2203_v46 = vadd.f32 %v4999_v12, %v2195_v36  ;;  %v2207_v6 = vadd.f32 %v5008_v27, %v2199_v59  ;;  %v5890_v3 = vstv %s5879_s8  ;;  %s5913_s8 = sld [smem:[#allocation33_spill]] }
 0x226   :  { %v1919_v18 = vmul.f32 %v5890_v3, %v1854_v50  ;;  %v5891_v51 = vstv %s5880_s7  ;;  %v5892_v19 = vstv %s5882_s15  ;;  %v5893_v8 = vstv %s5883_s16  ;;  %s5924_s7 = sld [smem:[#allocation29_spill]]  ;;  %s5927_s15 = sld [smem:[#allocation30_spill]] }
 0x227   :  { %v1923_v31 = vmul.f32 %v5891_v51, %v1854_v50  ;;  %v1903_v39 = vmul.f32 %v5892_v19, %v1850_v13  ;;  %v1907_v0 = vmul.f32 %v5893_v8, %v1850_v13  ;;  %v2001_v23 = vadd.f32 %v2000_v17, %v1993_v14  ;;  %v1861_v17 = vpop.permute.xlu0 %1860  ;;  %s5928_s16 = sld [smem:[#allocation39_spill]] }
 0x228   :  { %v2005_v62 = vadd.f32 %v2004_v53, %v1997_v58  ;;  %v5894_v60 = vstv %s5884_s25  ;;  %v5895_v33 = vstv %s5885_s28  ;;  %v2106_v38 = vadd.f32 %v2105_v45, %v2098_v24  ;;  %v1857_v24 = vpop.permute.xlu1 %1856  ;;  %s5934_s25 = sld [smem:[#allocation43_spill]] }
 0x229   :  { %v2008_v28 = vmul.f32 %v5894_v60, %v1850_v13  ;;  %v2012_v42 = vmul.f32 %v5895_v33, %v1850_v13  ;;  %v2110_v2 = vadd.f32 %v2109_v43, %v2102_v26  ;;  %v1904_v5 = vadd.f32 %v1903_v39, %v1896_v9  ;;  %s5939_s28 = sld [smem:[#allocation35_spill]] }
 0x22a   :  { %v1908_v12 = vadd.f32 %v1907_v0, %v1900_v54  ;;  %v5897_v27 = vstv %s5888_s14  ;;  %v5899_v59 = vstv %s5889_s18  ;;  %v2211_v3 = vadd.f32 %v2210_v10, %v2203_v46  ;;  %s2868_s14 = smov [#allocation18]  }
 0x22b   :  { %v2113_v36 = vmul.f32 %v5897_v27, %v1850_v13  ;;  %v2117_v44 = vmul.f32 %v5899_v59, %v1850_v13  ;;  %v2009_v32 = vadd.f32 %v2008_v28, %v2001_v23  ;;  %v2013_v35 = vadd.f32 %v2012_v42, %v2005_v62  ;;  %s2431_s18 = sshll.u32 %s2868_s14, 4  ;;  %s2432_s18 = int_to_ptr.vmem [resolvable:$true] %s2431_s18 }
 0x22c   :  { %v2215_v53 = vadd.f32 %v2214_v25, %v2207_v6  ;;  %v1912_v14 = vadd.f32 %v5029_v20, %v1904_v5  ;;  %v1916_v45 = vadd.f32 %v5034_v21, %v1908_v12  ;;  %v5906_v54 = vstv %s5896_s21  ;;  %s2819_s21 = scalar_lea.vmem %s2432_s18, 512  ;;  %p2824_p7 = scmp.lt.s32.totalorder %s2432_s18, %s2432_s18 }
 0x22d   :  { %v2114_v43 = vadd.f32 %v2113_v36, %v2106_v38  ;;  %v2118_v58 = vadd.f32 %v2117_v44, %v2110_v2  ;;  %v2017_v26 = vadd.f32 %v5045_v49, %v2009_v32  ;;  %v2021_v9 = vadd.f32 %v5050_v56, %v2013_v35  ;;  %p2820_p6 = scmp.ne.s32.totalorder %s2432_s18, %s2819_s21  ;;  %p2825_p8 = scmp.lt.s32.totalorder %s2819_s21, %s2819_s21 }
 0x22e   :  { %v2218_v10 = vmul.f32 %v5906_v54, %v1850_v13  ;;  %v5907_v46 = vstv %s5898_s2  ;;  %v5909_v6 = vstv %s5900_s10  ;;  %v1863_v19 = vsel %vm188_vm7, %v1861_v17, 0.0 }
 0x22f   :  { %v2222_v25 = vmul.f32 %v5907_v46, %v1850_v13  ;;  %v2024_v20 = vmul.f32 %v5909_v6, %v1854_v50  ;;  %v2122_v21 = vadd.f32 %v5061_v63, %v2114_v43  ;;  %v2126_v51 = vadd.f32 %v5066_v37, %v2118_v58  ;;  %p2826_p9 = por %p2825_p8, %p2824_p7 }
 0x230   :  { %v5912_v39 = vstv %s5901_s9  ;;  %v2219_v8 = vadd.f32 %v2218_v10, %v2211_v3  ;;  %v1859_v0 = vsel %vm183_vm8, 0.0, %v1857_v24  ;;  %v5914_v23 = vstv %s5902_s20 }
 0x231   :  { %v2028_v49 = vmul.f32 %v5912_v39, %v1854_v50  ;;  %v2223_v56 = vadd.f32 %v2222_v25, %v2215_v53  ;;  %v2129_v13 = vmul.f32 %v5914_v23, %v1854_v50  ;;  %v5915_v62 = vstv %s5903_s3  ;;  %p2827_p10 = pnand %p2826_p9, %p2820_p6 }
 0x232   :  { %v2133_v60 = vmul.f32 %v5915_v62, %v1854_v50  ;;  %v5916_v28 = vstv %s5904_s24  ;;  %v5917_v33 = vstv %s5905_s29  ;;  %v2227_v42 = vadd.f32 %v5077_v11, %v2219_v8 }
 0x233   :  { %v2234_v63 = vmul.f32 %v5916_v28, %v1854_v50  ;;  %v2238_v37 = vmul.f32 %v5917_v33, %v1854_v50  ;;  %v2231_v38 = vadd.f32 %v5082_v4, %v2223_v56  ;;  %v5918_v2 = vstv %s5908_s13  ;;  %v1866_v56 = vpop.permute.xlu1 %1865 }
 0x234   :  { %v1943_v5 = vmul.f32 %v5918_v2, %v1863_v19  ;;  %v5919_v12 = vstv %s5910_s17  ;;  %v1920_v36 = vadd.f32 %v1919_v18, %v1912_v14  ;;  %v1924_v59 = vadd.f32 %v1923_v31, %v1916_v45 }
 0x235   :  { %v1947_v27 = vmul.f32 %v5919_v12, %v1863_v19  ;;  %v5920_v44 = vstv %s5911_s27  ;;  %v5921_v35 = vstv %s5913_s8  ;;  %v2025_v53 = vadd.f32 %v2024_v20, %v2017_v26  ;;  %v1870_v26 = vpop.permute.xlu0 %1869 }
 0x236   :  { %v1927_v32 = vmul.f32 %v5920_v44, %v1859_v0  ;;  %v1931_v3 = vmul.f32 %v5921_v35, %v1859_v0  ;;  %v2029_v17 = vadd.f32 %v2028_v49, %v2021_v9  ;;  %v5922_v43 = vstv %s5021_s12  ;;  %s5930_s12 = sld [smem:[#allocation41_spill]] }
 0x237   :  { %v2032_v50 = vmul.f32 %v5922_v43, %v1859_v0  ;;  %v5923_v58 = vstv %s5023_s23  ;;  %v2130_v54 = vadd.f32 %v2129_v13, %v2122_v21  ;;  %v2134_v10 = vadd.f32 %v2133_v60, %v2126_v51  ;;  %s5929_s23 = sld [smem:[#allocation40_spill]] }
 0x238   :  { %v2036_v11 = vmul.f32 %v5923_v58, %v1859_v0  ;;  %v1928_v24 = vadd.f32 %v1927_v32, %v1920_v36  ;;  %v1932_v4 = vadd.f32 %v1931_v3, %v1924_v59  ;;  %v5925_v31 = vstv %s5037_s6  ;;  %s5931_s6 = sld [smem:[#allocation31_spill]] }
 0x239   :  { %v2033_v46 = vadd.f32 %v2032_v50, %v2025_v53  ;;  %v2137_v14 = vmul.f32 %v5925_v31, %v1859_v0  ;;  %v5926_v45 = vstv %s5039_s22  ;;  %v2235_v20 = vadd.f32 %v2234_v63, %v2227_v42  ;;  %s5932_s22 = sld [smem:[#allocation42_spill]] }
 0x23a   :  { %v2037_v18 = vadd.f32 %v2036_v11, %v2029_v17  ;;  %v2141_v25 = vmul.f32 %v5926_v45, %v1859_v0  ;;  %v1936_v9 = vadd.f32 %v5095_v40, %v1928_v24  ;;  %v1940_v6 = vadd.f32 %v5114_v30, %v1932_v4 }
 0x23b   :  { %v2239_v21 = vadd.f32 %v2238_v37, %v2231_v38  ;;  %v2041_v51 = vadd.f32 %v5119_v34, %v2033_v46  ;;  %v2138_v49 = vadd.f32 %v2137_v14, %v2130_v54  ;;  %v5933_v23 = vstv %s5924_s7 }
 0x23c   :  { %v2045_v39 = vadd.f32 %v5130_v61, %v2037_v18  ;;  %v2142_v8 = vadd.f32 %v2141_v25, %v2134_v10  ;;  %v2048_v13 = vmul.f32 %v5933_v23, %v1863_v19  ;;  %v5935_v62 = vstv %s5053_s5  ;;  %s5949_s5 = sld [smem:[#allocation36_spill]] }
 0x23d   :  { %v2242_v40 = vmul.f32 %v5935_v62, %v1859_v0  ;;  %v5936_v60 = vstv %s5055_s26  ;;  %v5336_v28 = vsel %vm188_vm7, %v1870_v26, 0.0  ;;  %v5937_v63 = vstv %s5927_s15  ;;  %s5950_s26 = sld [smem:[#allocation44_spill]] }
 0x23e   :  { %v2246_v30 = vmul.f32 %v5936_v60, %v1859_v0  ;;  %v2052_v34 = vmul.f32 %v5937_v63, %v1863_v19  ;;  %v5938_v33 = vstv %s5928_s16  ;;  %v2146_v37 = vadd.f32 %v5135_v48, %v2138_v49 }
 0x23f   :  { %v2153_v61 = vmul.f32 %v5938_v33, %v1863_v19  ;;  %v2150_v42 = vadd.f32 %v5145_v47, %v2142_v8  ;;  %v5940_v38 = vstv %s5929_s23  ;;  %v2243_v12 = vadd.f32 %v2242_v40, %v2235_v20 }
 0x240   :  { %v2157_v2 = vmul.f32 %v5940_v38, %v1863_v19  ;;  %v2247_v36 = vadd.f32 %v2246_v30, %v2239_v21  ;;  %v1868_v0 = vsel %vm183_vm8, 0.0, %v1866_v56  ;;  %v5941_v59 = vstv %s5930_s12 }
 0x241   :  { %v2258_v44 = vmul.f32 %v5941_v59, %v1863_v19  ;;  %v5942_v32 = vstv %s5931_s6  ;;  %v5943_v3 = vstv %s5932_s22  ;;  %v5944_v17 = vstv %s5934_s25 }
 0x242   :  { %v2262_v35 = vmul.f32 %v5942_v32, %v1863_v19  ;;  %v1971_v53 = vmul.f32 %v5943_v3, %v5336_v28  ;;  %v2076_v48 = vmul.f32 %v5944_v17, %v5336_v28  ;;  %v2251_v47 = vadd.f32 %v5150_v55, %v2243_v12 }
 0x243   :  { %v2255_v43 = vadd.f32 %v5158_v22, %v2247_v36  ;;  %v1944_v50 = vadd.f32 %v1943_v5, %v1936_v9  ;;  %v1948_v58 = vadd.f32 %v1947_v27, %v1940_v6  ;;  %v5945_v11 = vstv %s5097_s11  ;;  %s5953_s11 = sld [smem:[#allocation69_spill]] }
 0x244   :  { %v1951_v24 = vmul.f32 %v5945_v11, %v1868_v0  ;;  %v5946_v4 = vstv %s5939_s28  ;;  %v2049_v10 = vadd.f32 %v2048_v13, %v2041_v51  ;;  %v2053_v19 = vadd.f32 %v2052_v34, %v2045_v39 }
 0x245   :  { %v1955_v54 = vmul.f32 %v5946_v4, %v1868_v0  ;;  %v5947_v46 = vstv %s5105_s4  ;;  %v5948_v31 = vstv %s5107_s1  ;;  %v2154_v45 = vadd.f32 %v2153_v61, %v2146_v37  ;;  %s5954_s4 = sld [smem:[#allocation34_spill]]  ;;  %s2646_s1 = sld [smem:[#allocation12 + $0x2f]] }
 0x246   :  { %v2056_v18 = vmul.f32 %v5947_v46, %v1868_v0  ;;  %v2060_v14 = vmul.f32 %v5948_v31, %v1868_v0  ;;  %v2158_v25 = vadd.f32 %v2157_v2, %v2150_v42  ;;  %v1952_v26 = vadd.f32 %v1951_v24, %v1944_v50 }
 0x247   :  { %v1956_v55 = vadd.f32 %v1955_v54, %v1948_v58  ;;  %v5951_v22 = vstv %s5121_s0  ;;  %v5952_v27 = vstv %s5123_s19  ;;  %v2259_v21 = vadd.f32 %v2258_v44, %v2251_v47  ;;  %s2594_s0 = sld [smem:[#allocation12 + $0x17]]  ;;  %s2620_s19 = sld [smem:[#allocation12 + $0x23]] }
 0x248   :  { %v2161_v5 = vmul.f32 %v5951_v22, %v1868_v0  ;;  %v2165_v9 = vmul.f32 %v5952_v27, %v1868_v0  ;;  %v2057_v6 = vadd.f32 %v2056_v18, %v2049_v10  ;;  %v2061_v20 = vadd.f32 %v2060_v14, %v2053_v19 }
 0x249   :  { %v2263_v51 = vadd.f32 %v2262_v35, %v2255_v43  ;;  %v1960_v39 = vadd.f32 %v5163_v29, %v1952_v26  ;;  %v1964_v49 = vadd.f32 %v5169_v1, %v1956_v55  ;;  %v5955_v62 = vstv %s5949_s5 }
 0x24a   :  { %v2162_v8 = vadd.f32 %v2161_v5, %v2154_v45  ;;  %v2166_v56 = vadd.f32 %v2165_v9, %v2158_v25  ;;  %v2065_v23 = vadd.f32 %v5174_v7, %v2057_v6  ;;  %v2069_v13 = vadd.f32 %v5179_v52, %v2061_v20 }
 0x24b   :  { %v2266_v40 = vmul.f32 %v5955_v62, %v1868_v0  ;;  %v5956_v60 = vstv %s5139_s30  ;;  %v5957_v63 = vstv %s5950_s26  ;;  %v1972_v33 = vadd.f32 %v1971_v53, %v1964_v49  ;;  %s2568_s30 = sld [smem:[#allocation12 + $0xb]]  ;;  %v2693_v49 = vld [vmem:[#allocation2] sm:$0xf] }
 0x24c   :  { %v2270_v30 = vmul.f32 %v5956_v60, %v1868_v0  ;;  %v2181_v34 = vmul.f32 %v5957_v63, %v5336_v28  ;;  %v2170_v61 = vadd.f32 %v5184_v16, %v2162_v8  ;;  %v2174_v29 = vadd.f32 %v5189_v15, %v2166_v56  ;;  %v2694_v8 = vld [vmem:[#allocation2 + $0x4] sm:$0xf] }
 0x24d   :  { %v5958_v1 = vstv %s5953_s11  ;;  %v2077_v42 = vadd.f32 %v2076_v48, %v2069_v13  ;;  %v2267_v38 = vadd.f32 %v2266_v40, %v2259_v21  ;;  %v1973_v2 = vmul.f32 0.5, %v1972_v33  ;;  %v2696_v40 = vld [vmem:[#allocation2 + $0xc] sm:$0xf] }
 0x24e   :  { %v2278_v37 = vmul.f32 %v5958_v1, %v4748_v57  ;;  %v2271_v7 = vadd.f32 %v2270_v30, %v2263_v51  ;;  %v2182_v52 = vadd.f32 %v2181_v34, %v2174_v29  ;;  %v5959_v12 = vstv %s5954_s4  ;;  %v2697_v30 = vld [vmem:[#allocation2 + $0x10] sm:$0xf]  ;;  %v2698_v34 = vld [vmem:[#allocation2 + $0x14] sm:$0xf]  ;;  %v2700_v1 = vld [vmem:[#allocation2 + $0x1c] sm:$0xf] }
 0x24f   :  { %v2286_v36 = vmul.f32 %v5959_v12, %v5336_v28  ;;  %v2078_v0 = vmul.f32 0.5, %v2077_v42  ;;  %v2275_v59 = vadd.f32 %v5192_v41, %v2267_v38  ;;  %2670 = vtanh.f32 %v1973_v2 }
 0x250   :  { %v2279_v44 = vadd.f32 %v2278_v37, %v2271_v7  ;;  %v2183_v16 = vmul.f32 0.5, %v2182_v52  ;;  %v2071_v35 = vstv %s2594_s0  ;;  %v2176_v53 = vstv %s2620_s19 }
 0x251   :  { %2672 = vtanh.f32 %v2078_v0  ;;  %v1966_v32 = vstv %s2568_s30  ;;  %v2281_v48 = vstv %s2646_s1  ;;  %v2072_v50 = vmul.f32 %v2071_v35, %v5336_v28 }
 0x252   :  { %v2287_v15 = vadd.f32 %v2286_v36, %v2279_v44  ;;  %2674 = vtanh.f32 %v2183_v16  ;;  %v1967_v41 = vmul.f32 %v1966_v32, %v5336_v28  ;;  %v2177_v11 = vmul.f32 %v2176_v53, %v5336_v28 }
 0x253   :  { %v2282_v10 = vmul.f32 %v2281_v48, %v5336_v28  ;;  %v2073_v19 = vadd.f32 %v2072_v50, %v2065_v23  ;;  %v2695_v23 = vld [vmem:[#allocation2 + $0x8] sm:$0xf] }
 0x254   :  { %v2288_v57 = vmul.f32 0.5, %v2287_v15  ;;  %v1968_v24 = vadd.f32 %v1967_v41, %v1960_v39  ;;  %v2178_v14 = vadd.f32 %v2177_v11, %v2170_v61  ;;  %v2699_v61 = vld [vmem:[#allocation2 + $0x18] sm:$0xf] }
 0x255   :  { %v2283_v26 = vadd.f32 %v2282_v10, %v2275_v59 }
 0x256   :  { %2676 = vtanh.f32 %v2288_v57 }
 0x259   :  { %v2671_v3 = vpop.eup %2670 }
 0x25a   :  { %v1975_v47 = vadd.f32 1.0, %v2671_v3 }
 0x25b   :  { %v2673_v17 = vpop.eup %2672 }
 0x25c   :  { %v2675_v43 = vpop.eup %2674  ;;  %v2080_v58 = vadd.f32 1.0, %v2673_v17  ;;  %v1976_v4 = vmul.f32 0.5, %v1975_v47 }
 0x25d   :  { %v2185_v54 = vadd.f32 1.0, %v2675_v43 }
 0x25e   :  { %v2081_v46 = vmul.f32 0.5, %v2080_v58  ;;  %v1977_v31 = vmul.f32 %v1976_v4, %v1968_v24 }
 0x25f   :  { %v2186_v45 = vmul.f32 0.5, %v2185_v54 }
 0x260   :  { %v2677_v18 = vpop.eup %2676  ;;  %v2082_v25 = vmul.f32 %v2081_v46, %v2073_v19  ;;  %v2294_v5 = vrot.slane %v1977_v31, 1  ;;  %v2295_v27 = vrot.slane %v1977_v31, 2  ;;  %v2296_v9 = vrot.slane %v1977_v31, 3 }
 0x261   :  { %v2290_v55 = vadd.f32 1.0, %v2677_v18  ;;  %v2187_v22 = vmul.f32 %v2186_v45, %v2178_v14  ;;  %v2297_v20 = vrot.slane %v1977_v31, 4  ;;  %v2298_v21 = vrot.slane %v1977_v31, 5 }
 0x262   :  { %v2299_v51 = vrot.slane %v1977_v31, 6  ;;  %v2300_v39 = vrot.slane %v1977_v31, 7  ;;  %v5395_v28 = vadd.f32 %v2693_v49, %v1977_v31  ;;  %v5397_v56 = vadd.f32 %v2694_v8, %v2294_v5 }
 0x263   :  { %v2291_v6 = vmul.f32 0.5, %v2290_v55  ;;  %v5399_v13 = vadd.f32 %v2695_v23, %v2295_v27  ;;  %v2312_v60 = vadd.f32 %v2696_v40, %v2296_v9  ;;  %v2313_v63 = vadd.f32 %v2697_v30, %v2297_v20 }
 0x264   :  { %v2314_v33 = vadd.f32 %v2698_v34, %v2298_v21  ;;  %v2315_v29 = vadd.f32 %v2699_v61, %v2299_v51  ;;  %v2316_v37 = vadd.f32 %v2700_v1, %v2300_v39  ;;  %v2318_v42 = vrot.slane %v2082_v25, 7 }
 0x265   :  { %v2292_v62 = vmul.f32 %v2291_v6, %v2283_v26  ;;  %v2319_v38 = vrot.slane %v2082_v25, 1  ;;  %v2320_v7 = vrot.slane %v2082_v25, 2  ;;  %v2321_v2 = vrot.slane %v2082_v25, 3 }
 0x266   :  { %v2322_v52 = vrot.slane %v2082_v25, 4  ;;  %v2323_v12 = vrot.slane %v2082_v25, 5  ;;  %v2324_v36 = vrot.slane %v2082_v25, 6  ;;  %v2333_v0 = vadd.f32 %v2693_v49, %v2318_v42 }
 0x267   :  { %v2334_v59 = vadd.f32 %v2694_v8, %v2082_v25  ;;  %v2335_v44 = vadd.f32 %v2695_v23, %v2319_v38  ;;  %v2336_v16 = vadd.f32 %v2696_v40, %v2320_v7  ;;  %v2337_v15 = vadd.f32 %v2697_v30, %v2321_v2 }
 0x268   :  { %v2338_v57 = vadd.f32 %v2698_v34, %v2322_v52  ;;  %v2339_v32 = vadd.f32 %v2699_v61, %v2323_v12  ;;  %v2340_v35 = vadd.f32 %v2700_v1, %v2324_v36  ;;  %v2342_v3 = vrot.slane %v2187_v22, 6 }
 0x269   :  { %v2343_v53 = vrot.slane %v2187_v22, 7  ;;  %v2344_v17 = vrot.slane %v2187_v22, 1  ;;  %v2345_v48 = vrot.slane %v2187_v22, 2  ;;  %v2346_v41 = vrot.slane %v2187_v22, 3 }
 0x26a   :  { %v2347_v47 = vrot.slane %v2187_v22, 4  ;;  %v2348_v43 = vrot.slane %v2187_v22, 5  ;;  %v2357_v50 = vadd.f32 %v2693_v49, %v2342_v3  ;;  %v2359_v11 = vadd.f32 %v2695_v23, %v2187_v22 }
 0x26b   :  { %v2358_v58 = vadd.f32 %v2694_v8, %v2343_v53  ;;  %v2360_v24 = vadd.f32 %v2696_v40, %v2344_v17  ;;  %v2361_v4 = vadd.f32 %v2697_v30, %v2345_v48  ;;  %v2362_v54 = vadd.f32 %v2698_v34, %v2346_v41 }
 0x26c   :  { %v2363_v10 = vadd.f32 %v2699_v61, %v2347_v47  ;;  %v2364_v19 = vadd.f32 %v2700_v1, %v2348_v43  ;;  %v2366_v46 = vrot.slane %v2292_v62, 5  ;;  %v2367_v18 = vrot.slane %v2292_v62, 6 }
 0x26d   :  { %v2368_v31 = vrot.slane %v2292_v62, 7  ;;  %v2369_v14 = vrot.slane %v2292_v62, 1  ;;  %v2370_v45 = vrot.slane %v2292_v62, 2  ;;  %v2371_v25 = vrot.slane %v2292_v62, 3 }
 0x26e   :  { %v2372_v26 = vrot.slane %v2292_v62, 4  ;;  %v2384_v55 = vadd.f32 %v2696_v40, %v2292_v62  ;;  %v2381_v5 = vadd.f32 %v2693_v49, %v2366_v46  ;;  %v2382_v27 = vadd.f32 %v2694_v8, %v2367_v18 }
 0x26f   :  { %v2383_v9 = vadd.f32 %v2695_v23, %v2368_v31  ;;  %v2385_v6 = vadd.f32 %v2697_v30, %v2369_v14  ;;  %v2386_v20 = vadd.f32 %v2698_v34, %v2370_v45  ;;  %v2387_v21 = vadd.f32 %v2699_v61, %v2371_v25 }
 0x270   :  { %v2388_v22 = vadd.f32 %v2700_v1, %v2372_v26  ;;  %v2390_v51 = vsel %vm2389_vm12, %v5395_v28, %v2333_v0  ;;  %v2391_v39 = vsel %vm2389_vm12, %v5397_v56, %v2334_v59  ;;  %v2392_v42 = vsel %vm2389_vm12, %v5399_v13, %v2335_v44 }
 0x271   :  { %v2393_v38 = vsel %vm2389_vm12, %v2312_v60, %v2336_v16  ;;  %v2394_v62 = vsel %vm2389_vm12, %v2313_v63, %v2337_v15  ;;  %v2395_v49 = vsel %vm2389_vm12, %v2314_v33, %v2338_v57  ;;  %v2396_v8 = vsel %vm2389_vm12, %v2315_v29, %v2339_v32 }
 0x272   :  { %v2397_v23 = vsel %vm2389_vm12, %v2316_v37, %v2340_v35  ;;  %v2399_v40 = vsel %vm2398_vm13, %v2390_v51, %v2357_v50  ;;  %v2400_v28 = vsel %vm2398_vm13, %v2391_v39, %v2358_v58  ;;  %v2401_v56 = vsel %vm2398_vm13, %v2392_v42, %v2359_v11 }
 0x273   :  { %v2402_v13 = vsel %vm2398_vm13, %v2393_v38, %v2360_v24  ;;  %v2403_v60 = vsel %vm2398_vm13, %v2394_v62, %v2361_v4  ;;  %v2404_v30 = vsel %vm2398_vm13, %v2395_v49, %v2362_v54  ;;  %v2405_v63 = vsel %vm2398_vm13, %v2396_v8, %v2363_v10 }
 0x274   :  { %v2406_v34 = vsel %vm2398_vm13, %v2397_v23, %v2364_v19  ;;  %v2408_v33 = vsel %vm2407_vm14, %v2399_v40, %v2381_v5  ;;  %v2409_v61 = vsel %vm2407_vm14, %v2400_v28, %v2382_v27  ;;  %v2410_v29 = vsel %vm2407_vm14, %v2401_v56, %v2383_v9 }
 0x275   :  { %v2411_v1 = vsel %vm2407_vm14, %v2402_v13, %v2384_v55  ;;  %v2412_v37 = vsel %vm2407_vm14, %v2403_v60, %v2385_v6  ;;  %2418 = vst.msk [vmem:[#allocation18] sm:$0xf] %vm2417_vm15, %v2408_v33  ;;  %v2413_v7 = vsel %vm2407_vm14, %v2404_v30, %v2386_v20  ;;  %v2414_v2 = vsel %vm2407_vm14, %v2405_v63, %v2387_v21 }
 0x276   :  { %v2415_v52 = vsel %vm2407_vm14, %v2406_v34, %v2388_v22  ;;  %2419 = vst.msk [vmem:[#allocation18 + $0x4] sm:$0xf] %vm2417_vm15, %v2409_v61  ;;  %2420 = vst.msk [vmem:[#allocation18 + $0x8] sm:$0xf] %vm2417_vm15, %v2410_v29 }
 0x277   :  { %2421 = vst.msk [vmem:[#allocation18 + $0xc] sm:$0xf] %vm2417_vm15, %v2411_v1  ;;  %2422 = vst.msk [vmem:[#allocation18 + $0x10] sm:$0xf] %vm2417_vm15, %v2412_v37 }
 0x278   :  { %2423 = vst.msk [vmem:[#allocation18 + $0x14] sm:$0xf] %vm2417_vm15, %v2413_v7  ;;  %2424 = vst.msk [vmem:[#allocation18 + $0x18] sm:$0xf] %vm2417_vm15, %v2414_v2 }
 0x279   :  { %2425 = vst.msk [vmem:[#allocation18 + $0x1c] sm:$0xf] %vm2417_vm15, %v2415_v52 }
 0x27a   :  { %2830 = shalt.err (!%p2827_p10)
}
 0x27b   :  { %s5960_s9 = sld [smem:[#allocation100_spill]] }
 0x281   :  { %s2831_s20 = scalar_lea.hbm %s5960_s9, 512 }
 0x282   :  { %p2832_p11 = scmp.ne.s32.totalorder %s5960_s9, %s2831_s20  ;;  %p2835_p12 = scmp.lt.u32.totalorder %s2831_s20, %s5960_s9 }
 0x284   :  { %p2837_p13 = pnand %p2835_p12, %p2832_p11 }
 0x286   :  { %2840 = shalt.err (!%p2837_p13)
}
 0x287   :  { %s5961_s17 = smov 4   ;;  %s5962_s27 = smov 64  }
 0x288   :  { %2437 = dma.vmem_to_hbm [thread:$0]  %s2432_s18, 512, %s5960_s9, [#allocation4], %s5962_s27, %s5962_s27, %s5961_s17  }
 0x289   :  { %2853 = dma.done.wait [#allocation4], 512  }
 0x28a   :  { %2854 = vsyncadd [#allocation4], 4294966784 }
 0x28b   :  { %2441 = vsyncpa [#allocation3], 1 }
 0x28c   :  { %2442 = vsyncpa [#allocation4], 1 }
 0x28d   :  { %2443 = vsyncpa [#allocation5], 1 }
 0x28e   :  { %2444 = vsyncpa [#allocation8], 1 }
 0x28f   :  { %2445 = vsyncpa [#allocation11], 1 }
 0x290   :  { %2446 = vsyncpa [#allocation14], 1 }
 0x291   :  { %2447 = vsyncpa [#allocation17], 1 }

</bundles_post_ra>
